<compile_context>
chip_gen: v7x
topology: tpu7x:2x2x1
jax: 0.10.0
libtpu: 0.0.40
codegen_flags: <defaults>
</compile_context>

<pallas_src>
import jax
import jax.numpy as jnp
from jax import lax
from jax.experimental import pallas as pl
from jax.experimental.pallas import tpu as pltpu


# ----------------------------- fused Pallas kernel -------------------------- #

def _fused_block_kernel(x_ref, w1_ref, b1_ref, w2_ref, b2_ref, o_ref, pad_ref):
    """Whole LowRankBasicBlock for `block_b` images, fully in VMEM.

    x_ref  : (B, C, H*W)   NCHW input slab (lane-dense, H*W multiple of 128)
    w*_ref : (9*C, C)      folded conv3x3_u . conv1x1_v weight (BN scales in)
    b1_ref : (1, C)        folded stage-1 shift (applied in (M, C) layout)
    b2_ref : (C, 1)        folded stage-2 shift (applied in (C, HW) layout)
    o_ref  : (B, C, H*W)   NCHW output slab
    pad_ref: (H+2, W+2, C) persistent zero-bordered halo scratch
    """
    B, C, HW = x_ref.shape
    H = pad_ref.shape[0] - 2
    W = pad_ref.shape[1] - 2
    mm_dt = w1_ref.dtype                       # f32 or bf16 (wrapper decides)

    # Zero the halo scratch once per grid step.  (Cannot rely on a
    # program_id(0)==0 init: with "parallel" semantics a v7x core may never
    # execute step 0.)  The interior is overwritten before every read, so only
    # the border actually matters; zeroing the whole ~20 KiB buffer is cheap.
    pad_ref[...] = jnp.zeros_like(pad_ref)

    def im2col(img_hwc):
        # Store the image into the interior of the zero-bordered scratch, then
        # read the 9 shifted taps straight off the scratch ref.
        # TODO(synk): for production C (>=128) on v7x, replace the explicit
        # (HW, 9C) patches buffer with 9 accumulated dots (MRB accumulation)
        # to avoid the 9x activation copy.
        pad_ref[1:H + 1, 1:W + 1, :] = img_hwc
        taps = [pad_ref[dy:dy + H, dx:dx + W, :]          # 9 x (H, W, C)
                for dy in range(3) for dx in range(3)]
        return jnp.concatenate(taps, axis=-1).reshape(H * W, 9 * C)

    # ---- stage 1: conv3x3_u + BN_u + conv1x1_v + BN_v folded into ONE matmul.
    pats = []
    for b in range(B):                                     # static, unrolled
        img = x_ref[b].T.reshape(H, W, C).astype(jnp.float32)   # (C,HW)->(H,W,C)
        pats.append(im2col(img))
    patches = pats[0] if B == 1 else jnp.concatenate(pats, axis=0)   # (B*HW, 9C)
    h = jnp.dot(patches.astype(mm_dt), w1_ref[...],
                preferred_element_type=jnp.float32)        # (B*HW, C)
    h = jnp.maximum(h + b1_ref[...], 0.0)                  # BN shift + ReLU

    # ---- stage 2: second folded conv.
    h = h.reshape(B, H, W, C)
    pats = [im2col(h[b]) for b in range(B)]
    patches = pats[0] if B == 1 else jnp.concatenate(pats, axis=0)
    g = jnp.dot(patches.astype(mm_dt), w2_ref[...],
                preferred_element_type=jnp.float32)        # (B*HW, C)
    g = g.reshape(B, H * W, C)

    # ---- final epilogue in the NCHW (C, H*W) layout: fully lane-dense VPU
    # work, and the residual identity is already in this layout, so the only
    # transpose is the one the NCHW output store requires anyway.
    for b in range(B):
        out_chw = g[b].T + b2_ref[...] + x_ref[b].astype(jnp.float32)  # (C, HW)
        o_ref[b] = jnp.maximum(out_chw, 0.0).astype(o_ref.dtype)


# ------------------------------ wrapper ------------------------------------- #

def _fold_stage(w3_hwio, bn_u, w1x1, bn_v):
    """Fold conv3x3_u + BN_u + conv1x1_v + BN_v into one weight/bias.

    w3_hwio: (3,3,Cin,R), bn_u: (2,R) [scale;shift], w1x1: (R,Cout), bn_v: (2,Cout)
    Returns W: (9*Cin, Cout) im2col weight, b: (Cout,).
    """
    su, tu = bn_u[0], bn_u[1]
    sv, tv = bn_v[0], bn_v[1]
    kh, kw, cin, r = w3_hwio.shape
    wu = (w3_hwio * su).reshape(kh * kw * cin, r)   # BN_u scale folded
    wv = w1x1 * sv                                  # BN_v scale folded, (R, Cout)
    return wu @ wv, tu @ wv + tv


def low_rank_basic_block(x_nchw, p, *, block_b=None, use_bf16_matmul=False):
    """Forward pass of LowRankBasicBlock (stride=1, downsample=None, eval BN)."""
    # TODO(synk): stride > 1 and the optional `downsample` branch are not
    # implemented (module defaults stride=1, downsample=None are assumed).
    N, C, H, W = x_nchw.shape
    assert p["w1u"].shape[2] == C and p["w2v"].shape[-1] == C, \
        "residual add requires planes == inplanes"

    w1, b1 = _fold_stage(p["w1u"], p["bn1u"], p["w1v"], p["bn1v"])   # (9C,C),(C,)
    w2, b2 = _fold_stage(p["w2u"], p["bn2u"], p["w2v"], p["bn2v"])
    mm_dt = jnp.bfloat16 if use_bf16_matmul else jnp.float32
    w1 = w1.astype(mm_dt)
    w2 = w2.astype(mm_dt)
    b1 = b1.reshape(1, C).astype(jnp.float32)
    b2 = b2.reshape(C, 1).astype(jnp.float32)

    # NCHW stays NCHW end-to-end: (N,C,H,W) -> (N,C,H*W) is a free reshape
    # (no HBM transpose pass); H*W = lane-dense last dim for loads and stores.
    x = x_nchw.reshape(N, C, H * W)

    if block_b is None:
        # Batch several images per grid step to amortize per-step overhead, but
        # keep >= 2 grid steps when N >= 2 (so both v7x TensorCores get work)
        # and cap the per-step input slab (VMEM-friendly on 64 MiB v7x parts).
        bytes_per_img = C * H * W * x.dtype.itemsize
        cap = max(1, (512 * 1024) // bytes_per_img)
        block_b = 1
        for d in range(1, N + 1):
            if N % d == 0 and d <= cap and (N // d) >= min(N, 2):
                block_b = d
    grid = (N // block_b,)
    kC = 9 * C

    out = pl.pallas_call(
        _fused_block_kernel,
        out_shape=jax.ShapeDtypeStruct((N, C, H * W), x.dtype),
        grid=grid,
        in_specs=[
            pl.BlockSpec((block_b, C, H * W), lambda n: (n, 0, 0)),
            pl.BlockSpec((kC, C), lambda n: (0, 0)),
            pl.BlockSpec((1, C), lambda n: (0, 0)),
            pl.BlockSpec((kC, C), lambda n: (0, 0)),
            pl.BlockSpec((C, 1), lambda n: (0, 0)),
        ],
        out_specs=pl.BlockSpec((block_b, C, H * W), lambda n: (n, 0, 0)),
        scratch_shapes=[pltpu.VMEM((H + 2, W + 2, C), jnp.float32)],
        compiler_params=pltpu.CompilerParams(
            dimension_semantics=("parallel",),
            vmem_limit_bytes=32 * 1024 * 1024),   # safe ceiling on v5e/v6e/v7x
    )(x, w1, b1, w2, b2)

    return out.reshape(N, C, H, W)


# ---------------------------- parameters ------------------------------------ #

def _bn_scale_shift(key, c, eps=1e-5):
    k1, k2, k3, k4 = jax.random.split(key, 4)
    gamma = 1.0 + 0.1 * jax.random.normal(k1, (c,), jnp.float32)
    beta = 0.1 * jax.random.normal(k2, (c,), jnp.float32)
    mean = 0.1 * jax.random.normal(k3, (c,), jnp.float32)
    var = jnp.abs(jax.random.normal(k4, (c,), jnp.float32)) + 0.5
    scale = gamma / jnp.sqrt(var + eps)
    shift = beta - mean * scale
    return jnp.stack([scale, shift])                       # (2, c)


def init_params(key, inplanes, planes, rank):
    ks = jax.random.split(key, 8)

    def conv_w(k, kh, kw, cin, cout):
        return 0.1 * jax.random.normal(k, (kh, kw, cin, cout), jnp.float32)

    return {
        "w1u": conv_w(ks[0], 3, 3, inplanes, rank),        # conv3x3, HWIO
        "bn1u": _bn_scale_shift(ks[1], rank),
        "w1v": conv_w(ks[2], 1, 1, rank, planes)[0, 0],    # conv1x1 -> (Cin,Cout)
        "bn1v": _bn_scale_shift(ks[3], planes),
        "w2u": conv_w(ks[4], 3, 3, planes, rank),
        "bn2u": _bn_scale_shift(ks[5], rank),
        "w2v": conv_w(ks[6], 1, 1, rank, planes)[0, 0],
        "bn2v": _bn_scale_shift(ks[7], planes),
    }


# ----------------------------- reference ------------------------------------ #

def ref_forward(x_nchw, p):
    dn = ("NCHW", "HWIO", "NCHW")

    def bn(o, sb):
        return o * sb[0][None, :, None, None] + sb[1][None, :, None, None]

    identity = x_nchw
    o = lax.conv_general_dilated(x_nchw, p["w1u"], (1, 1), "SAME",
                                 dimension_numbers=dn)
    o = bn(o, p["bn1u"])
    o = jnp.einsum("nchw,cd->ndhw", o, p["w1v"])
    o = bn(o, p["bn1v"])
    o = jnp.maximum(o, 0.0)
    o = lax.conv_general_dilated(o, p["w2u"], (1, 1), "SAME",
                                 dimension_numbers=dn)
    o = bn(o, p["bn2u"])
    o = jnp.einsum("nchw,cd->ndhw", o, p["w2v"])
    o = bn(o, p["bn2v"])
    return jnp.maximum(o + identity, 0.0)


# -------------------------------- main --------------------------------------- #

if __name__ == "__main__":
    key = jax.random.PRNGKey(0)
    kx, kp = jax.random.split(key)

    N, inplanes, planes, H, W = 2, 16, 16, 16, 16
    rank_factor = 4
    rank = planes // rank_factor                           # int(planes / rank_factor)

    x_nchw = jax.random.normal(kx, (N, inplanes, H, W), jnp.float32)
    params = init_params(kp, inplanes, planes, rank)

    out = low_rank_basic_block(x_nchw, params)
    out = jax.block_until_ready(out)

    # correctness check vs. plain-JAX reference (eval-mode BN)
    ref = ref_forward(x_nchw, params)
    assert out.shape == x_nchw.shape, (out.shape, x_nchw.shape)
    max_err = float(jnp.max(jnp.abs(out - ref)))
    assert jnp.allclose(out, ref, atol=1e-3, rtol=1e-3), max_err

    print("KERNEL_OK")
</pallas_src>

<mosaic_0001>
module attributes {stable_mosaic.version = 11 : i64} {
  func.func @_fused_block_kernel(%arg0: i32, %arg1: memref<1x16x256xf32, #tpu.memory_space<vmem>>, %arg2: memref<144x16xf32, #tpu.memory_space<vmem>>, %arg3: memref<1x16xf32, #tpu.memory_space<vmem>>, %arg4: memref<144x16xf32, #tpu.memory_space<vmem>>, %arg5: memref<16x1xf32, #tpu.memory_space<vmem>>, %arg6: memref<1x16x256xf32, #tpu.memory_space<vmem>>, %arg7: memref<18x18x16xf32, #tpu.memory_space<vmem>>) attributes {dimension_semantics = [#tpu.dimension_semantics<parallel>], iteration_bounds = array<i64: 2>, scalar_prefetch = 0 : i64, scratch_operands = 1 : i64, tpu.core_type = #tpu.core_type<tc>, window_params = [{transform_indices = @transform_0, window_bounds = array<i64: 1, 16, 256>}, {pipeline_mode = #tpu.pipeline_mode<synchronous>, transform_indices = @transform_1, window_bounds = array<i64: 144, 16>}, {pipeline_mode = #tpu.pipeline_mode<synchronous>, transform_indices = @transform_2, window_bounds = array<i64: 1, 16>}, {pipeline_mode = #tpu.pipeline_mode<synchronous>, transform_indices = @transform_3, window_bounds = array<i64: 144, 16>}, {pipeline_mode = #tpu.pipeline_mode<synchronous>, transform_indices = @transform_4, window_bounds = array<i64: 16, 1>}, {transform_indices = @transform_5, window_bounds = array<i64: 1, 16, 256>}]} {
    %cst = arith.constant 0.000000e+00 : f32
    %0 = vector.broadcast %cst : f32 to vector<18x18x16xf32>
    %c0 = arith.constant 0 : index
    %c0_0 = arith.constant 0 : index
    %c0_1 = arith.constant 0 : index
    %1 = vector.load %arg7[%c0, %c0_0, %c0_1] : memref<18x18x16xf32, #tpu.memory_space<vmem>>, vector<18x18x16xf32>
    tpu.vector_store %arg7[%c0, %c0_0, %c0_1], %0 {strides = array<i32>} : memref<18x18x16xf32, #tpu.memory_space<vmem>>, vector<18x18x16xf32>,
    %c0_2 = arith.constant 0 : index
    %c0_3 = arith.constant 0 : index
    %c0_4 = arith.constant 0 : index
    %2 = vector.load %arg1[%c0_2, %c0_3, %c0_4] : memref<1x16x256xf32, #tpu.memory_space<vmem>>, vector<1x16x256xf32>
    %3 = vector.shape_cast %2 : vector<1x16x256xf32> to vector<16x256xf32>
    %4 = tpu.transpose %3, [1, 0] : vector<16x256xf32> -> vector<256x16xf32>
    %5 = vector.shape_cast %4 : vector<256x16xf32> to vector<16x16x16xf32>
    %c1 = arith.constant 1 : index
    %c1_5 = arith.constant 1 : index
    %c0_6 = arith.constant 0 : index
    %6 = vector.load %arg7[%c1, %c1_5, %c0_6] : memref<18x18x16xf32, #tpu.memory_space<vmem>>, vector<16x16x16xf32>
    tpu.vector_store %arg7[%c1, %c1_5, %c0_6], %5 {strides = array<i32>} : memref<18x18x16xf32, #tpu.memory_space<vmem>>, vector<16x16x16xf32>,
    %c0_7 = arith.constant 0 : index
    %c0_8 = arith.constant 0 : index
    %c0_9 = arith.constant 0 : index
    %7 = vector.load %arg7[%c0_7, %c0_8, %c0_9] : memref<18x18x16xf32, #tpu.memory_space<vmem>>, vector<16x16x16xf32>
    %c0_10 = arith.constant 0 : index
    %c1_11 = arith.constant 1 : index
    %c0_12 = arith.constant 0 : index
    %8 = vector.load %arg7[%c0_10, %c1_11, %c0_12] : memref<18x18x16xf32, #tpu.memory_space<vmem>>, vector<16x16x16xf32>
    %c0_13 = arith.constant 0 : index
    %c2 = arith.constant 2 : index
    %c0_14 = arith.constant 0 : index
    %9 = vector.load %arg7[%c0_13, %c2, %c0_14] : memref<18x18x16xf32, #tpu.memory_space<vmem>>, vector<16x16x16xf32>
    %c1_15 = arith.constant 1 : index
    %c0_16 = arith.constant 0 : index
    %c0_17 = arith.constant 0 : index
    %10 = vector.load %arg7[%c1_15, %c0_16, %c0_17] : memref<18x18x16xf32, #tpu.memory_space<vmem>>, vector<16x16x16xf32>
    %c1_18 = arith.constant 1 : index
    %c1_19 = arith.constant 1 : index
    %c0_20 = arith.constant 0 : index
    %11 = vector.load %arg7[%c1_18, %c1_19, %c0_20] : memref<18x18x16xf32, #tpu.memory_space<vmem>>, vector<16x16x16xf32>
    %c1_21 = arith.constant 1 : index
    %c2_22 = arith.constant 2 : index
    %c0_23 = arith.constant 0 : index
    %12 = vector.load %arg7[%c1_21, %c2_22, %c0_23] : memref<18x18x16xf32, #tpu.memory_space<vmem>>, vector<16x16x16xf32>
    %c2_24 = arith.constant 2 : index
    %c0_25 = arith.constant 0 : index
    %c0_26 = arith.constant 0 : index
    %13 = vector.load %arg7[%c2_24, %c0_25, %c0_26] : memref<18x18x16xf32, #tpu.memory_space<vmem>>, vector<16x16x16xf32>
    %c2_27 = arith.constant 2 : index
    %c1_28 = arith.constant 1 : index
    %c0_29 = arith.constant 0 : index
    %14 = vector.load %arg7[%c2_27, %c1_28, %c0_29] : memref<18x18x16xf32, #tpu.memory_space<vmem>>, vector<16x16x16xf32>
    %c2_30 = arith.constant 2 : index
    %c2_31 = arith.constant 2 : index
    %c0_32 = arith.constant 0 : index
    %15 = vector.load %arg7[%c2_30, %c2_31, %c0_32] : memref<18x18x16xf32, #tpu.memory_space<vmem>>, vector<16x16x16xf32>
    %16 = tpu.concatenate %7, %8, %9, %10, %11, %12, %13, %14, %15 in 2 : vector<16x16x16xf32>, vector<16x16x16xf32>, vector<16x16x16xf32>, vector<16x16x16xf32>, vector<16x16x16xf32>, vector<16x16x16xf32>, vector<16x16x16xf32>, vector<16x16x16xf32>, vector<16x16x16xf32> -> vector<16x16x144xf32>
    %17 = vector.shape_cast %16 : vector<16x16x144xf32> to vector<256x144xf32>
    %c0_33 = arith.constant 0 : index
    %c0_34 = arith.constant 0 : index
    %18 = vector.load %arg2[%c0_33, %c0_34] : memref<144x16xf32, #tpu.memory_space<vmem>>, vector<144x16xf32>
    %cst_35 = arith.constant dense<0.000000e+00> : vector<256x16xf32>
    %19 = tpu.matmul %17, %18, %cst_35 {dimension_numbers = #tpu.dot_dimension_numbers<[1], [0], [0], [1], [0, 0, 1, 1], [], []>} : vector<256x144xf32>, vector<144x16xf32>, vector<256x16xf32> -> vector<256x16xf32>
    %c0_36 = arith.constant 0 : index
    %c0_37 = arith.constant 0 : index
    %20 = vector.load %arg3[%c0_36, %c0_37] : memref<1x16xf32, #tpu.memory_space<vmem>>, vector<1x16xf32>
    %21 = vector.broadcast %20 : vector<1x16xf32> to vector<256x16xf32>
    %22 = arith.addf %19, %21 : vector<256x16xf32>
    %cst_38 = arith.constant 0.000000e+00 : f32
    %23 = vector.broadcast %cst_38 : f32 to vector<256x16xf32>
    %24 = arith.maximumf %22, %23 : vector<256x16xf32>
    %25 = vector.shape_cast %24 : vector<256x16xf32> to vector<1x16x16x16xf32>
    %26 = vector.shape_cast %25 : vector<1x16x16x16xf32> to vector<16x16x16xf32>
    %c1_39 = arith.constant 1 : index
    %c1_40 = arith.constant 1 : index
    %c0_41 = arith.constant 0 : index
    %27 = vector.load %arg7[%c1_39, %c1_40, %c0_41] : memref<18x18x16xf32, #tpu.memory_space<vmem>>, vector<16x16x16xf32>
    tpu.vector_store %arg7[%c1_39, %c1_40, %c0_41], %26 {strides = array<i32>} : memref<18x18x16xf32, #tpu.memory_space<vmem>>, vector<16x16x16xf32>,
    %c0_42 = arith.constant 0 : index
    %c0_43 = arith.constant 0 : index
    %c0_44 = arith.constant 0 : index
    %28 = vector.load %arg7[%c0_42, %c0_43, %c0_44] : memref<18x18x16xf32, #tpu.memory_space<vmem>>, vector<16x16x16xf32>
    %c0_45 = arith.constant 0 : index
    %c1_46 = arith.constant 1 : index
    %c0_47 = arith.constant 0 : index
    %29 = vector.load %arg7[%c0_45, %c1_46, %c0_47] : memref<18x18x16xf32, #tpu.memory_space<vmem>>, vector<16x16x16xf32>
    %c0_48 = arith.constant 0 : index
    %c2_49 = arith.constant 2 : index
    %c0_50 = arith.constant 0 : index
    %30 = vector.load %arg7[%c0_48, %c2_49, %c0_50] : memref<18x18x16xf32, #tpu.memory_space<vmem>>, vector<16x16x16xf32>
    %c1_51 = arith.constant 1 : index
    %c0_52 = arith.constant 0 : index
    %c0_53 = arith.constant 0 : index
    %31 = vector.load %arg7[%c1_51, %c0_52, %c0_53] : memref<18x18x16xf32, #tpu.memory_space<vmem>>, vector<16x16x16xf32>
    %c1_54 = arith.constant 1 : index
    %c1_55 = arith.constant 1 : index
    %c0_56 = arith.constant 0 : index
    %32 = vector.load %arg7[%c1_54, %c1_55, %c0_56] : memref<18x18x16xf32, #tpu.memory_space<vmem>>, vector<16x16x16xf32>
    %c1_57 = arith.constant 1 : index
    %c2_58 = arith.constant 2 : index
    %c0_59 = arith.constant 0 : index
    %33 = vector.load %arg7[%c1_57, %c2_58, %c0_59] : memref<18x18x16xf32, #tpu.memory_space<vmem>>, vector<16x16x16xf32>
    %c2_60 = arith.constant 2 : index
    %c0_61 = arith.constant 0 : index
    %c0_62 = arith.constant 0 : index
    %34 = vector.load %arg7[%c2_60, %c0_61, %c0_62] : memref<18x18x16xf32, #tpu.memory_space<vmem>>, vector<16x16x16xf32>
    %c2_63 = arith.constant 2 : index
    %c1_64 = arith.constant 1 : index
    %c0_65 = arith.constant 0 : index
    %35 = vector.load %arg7[%c2_63, %c1_64, %c0_65] : memref<18x18x16xf32, #tpu.memory_space<vmem>>, vector<16x16x16xf32>
    %c2_66 = arith.constant 2 : index
    %c2_67 = arith.constant 2 : index
    %c0_68 = arith.constant 0 : index
    %36 = vector.load %arg7[%c2_66, %c2_67, %c0_68] : memref<18x18x16xf32, #tpu.memory_space<vmem>>, vector<16x16x16xf32>
    %37 = tpu.concatenate %28, %29, %30, %31, %32, %33, %34, %35, %36 in 2 : vector<16x16x16xf32>, vector<16x16x16xf32>, vector<16x16x16xf32>, vector<16x16x16xf32>, vector<16x16x16xf32>, vector<16x16x16xf32>, vector<16x16x16xf32>, vector<16x16x16xf32>, vector<16x16x16xf32> -> vector<16x16x144xf32>
    %38 = vector.shape_cast %37 : vector<16x16x144xf32> to vector<256x144xf32>
    %c0_69 = arith.constant 0 : index
    %c0_70 = arith.constant 0 : index
    %39 = vector.load %arg4[%c0_69, %c0_70] : memref<144x16xf32, #tpu.memory_space<vmem>>, vector<144x16xf32>
    %cst_71 = arith.constant dense<0.000000e+00> : vector<256x16xf32>
    %40 = tpu.matmul %38, %39, %cst_71 {dimension_numbers = #tpu.dot_dimension_numbers<[1], [0], [0], [1], [0, 0, 1, 1], [], []>} : vector<256x144xf32>, vector<144x16xf32>, vector<256x16xf32> -> vector<256x16xf32>
    %41 = vector.shape_cast %40 : vector<256x16xf32> to vector<1x256x16xf32>
    %42 = vector.shape_cast %41 : vector<1x256x16xf32> to vector<256x16xf32>
    %43 = tpu.transpose %42, [1, 0] : vector<256x16xf32> -> vector<16x256xf32>
    %c0_72 = arith.constant 0 : index
    %c0_73 = arith.constant 0 : index
    %44 = vector.load %arg5[%c0_72, %c0_73] : memref<16x1xf32, #tpu.memory_space<vmem>>, vector<16x1xf32>
    %45 = vector.broadcast %44 : vector<16x1xf32> to vector<16x256xf32>
    %46 = arith.addf %43, %45 : vector<16x256xf32>
    %c0_74 = arith.constant 0 : index
    %c0_75 = arith.constant 0 : index
    %c0_76 = arith.constant 0 : index
    %47 = vector.load %arg1[%c0_74, %c0_75, %c0_76] : memref<1x16x256xf32, #tpu.memory_space<vmem>>, vector<1x16x256xf32>
    %48 = vector.shape_cast %47 : vector<1x16x256xf32> to vector<16x256xf32>
    %49 = arith.addf %46, %48 : vector<16x256xf32>
    %cst_77 = arith.constant 0.000000e+00 : f32
    %50 = vector.broadcast %cst_77 : f32 to vector<16x256xf32>
    %51 = arith.maximumf %49, %50 : vector<16x256xf32>
    %c0_78 = arith.constant 0 : index
    %c0_79 = arith.constant 0 : index
    %c0_80 = arith.constant 0 : index
    %52 = vector.load %arg6[%c0_78, %c0_79, %c0_80] : memref<1x16x256xf32, #tpu.memory_space<vmem>>, vector<1x16x256xf32>
    %53 = vector.shape_cast %52 : vector<1x16x256xf32> to vector<16x256xf32>
    %54 = vector.shape_cast %51 : vector<16x256xf32> to vector<1x16x256xf32>
    tpu.vector_store %arg6[%c0_78, %c0_79, %c0_80], %54 {strides = array<i32>} : memref<1x16x256xf32, #tpu.memory_space<vmem>>, vector<1x16x256xf32>,
    return
  }
  func.func @transform_0(%arg0: i32) -> (i32, i32, i32) {
    %c0_i32 = arith.constant 0 : i32
    %c0_i32_0 = arith.constant 0 : i32
    %c0_i32_1 = arith.constant 0 : i32
    return %arg0, %c0_i32, %c0_i32_0 : i32, i32, i32
  }
  func.func @transform_1(%arg0: i32) -> (i32, i32) {
    %c0_i32 = arith.constant 0 : i32
    %c0_i32_0 = arith.constant 0 : i32
    %c0_i32_1 = arith.constant 0 : i32
    return %c0_i32, %c0_i32_0 : i32, i32
  }
  func.func @transform_2(%arg0: i32) -> (i32, i32) {
    %c0_i32 = arith.constant 0 : i32
    %c0_i32_0 = arith.constant 0 : i32
    %c0_i32_1 = arith.constant 0 : i32
    return %c0_i32, %c0_i32_0 : i32, i32
  }
  func.func @transform_3(%arg0: i32) -> (i32, i32) {
    %c0_i32 = arith.constant 0 : i32
    %c0_i32_0 = arith.constant 0 : i32
    %c0_i32_1 = arith.constant 0 : i32
    return %c0_i32, %c0_i32_0 : i32, i32
  }
  func.func @transform_4(%arg0: i32) -> (i32, i32) {
    %c0_i32 = arith.constant 0 : i32
    %c0_i32_0 = arith.constant 0 : i32
    %c0_i32_1 = arith.constant 0 : i32
    return %c0_i32, %c0_i32_0 : i32, i32
  }
  func.func @transform_5(%arg0: i32) -> (i32, i32, i32) {
    %c0_i32 = arith.constant 0 : i32
    %c0_i32_0 = arith.constant 0 : i32
    %c0_i32_1 = arith.constant 0 : i32
    return %arg0, %c0_i32, %c0_i32_0 : i32, i32, i32
  }
}

</mosaic_0001>

<bundles_post_ra>
// kernel: tpu_custom_call.1
= control target key start
LH: loop header
LB: loop body
LE: loop exit
PB: predicated region body
PF: predicated region fallthrough
CT: control target
= control target key end

     0   :  { %10 = vsyncpa [#allocation4], 0  ;;  %s7659_s0 = inlined_call_operand.vmem [shape: f32[2,16,256], index: 0, kind: input, shape index: {}]   ;;  %s7660_s1 = inlined_call_operand.vmem [shape: f32[144,16], index: 1, kind: input, shape index: {}]   ;;  %s7661_s2 = inlined_call_operand.vmem [shape: f32[1,16], index: 2, kind: input, shape index: {}]   ;;  %s7662_s3 = inlined_call_operand.vmem [shape: f32[144,16], index: 3, kind: input, shape index: {}]   ;;  %s7663_s4 = inlined_call_operand.vmem [shape: f32[16,1], index: 4, kind: input, shape index: {}]   ;;  %s7664_s5 = inlined_call_operand.hbm [shape: f32[2,16,256], index: 5, kind: output, shape index: {}]  }
   0x1   :  { %12 = vsyncpa [#allocation4 + $0x1], 0  ;;  %s5551_s18 = smov 0   ;;  %s5553_s19 = smov 0  }
   0x2   :  { %s5555_s20 = smov 0   ;;  %s5557_s21 = smov 0  }
   0x3 LB: > { %s5572_s22 = sadd.s32 4294967295, %s5507_s21   ;;  %s4124_s23 = sadd.s32 4294967294, %s5507_s21   ;;  %s5507_s21 = sphi %s5557_s21, %s7787_s21   ;;  %s5503_s20 = sphi %s5555_s20, %s7786_s20   ;;  %s5499_s19 = sphi %s5553_s19, %s7785_s19   ;;  %s5495_s18 = sphi %s5551_s18, %s7784_s18  }
   0x4   : > { %s5576_s24 = sadd.s32 1, %s5507_s21   ;;  %s135_s25 = sadd.s32 1, %s5503_s20 }
   0x5   : > { %s132_s26 = ssub.s32 %s5507_s21, %s5576_s24  ;;  %p145_p0 = scmp.ne.s32.totalorder %s5503_s20, %s5499_s19 }
   0x6   : > { %p133_p1 = scmp.eq.s32.totalorder %s132_s26, 0  ;;  %p146_p2 = scmp.eq.s32.totalorder %s5572_s22, 1 }
   0x7   : > { %p151_p3 = scmp.ne.s32.totalorder %s5499_s19, %s5495_s18  ;;  %p152_p4 = scmp.eq.s32.totalorder %s4124_s23, 1 }
   0x8   : > { %s5587_s27 = scalar_select %p133_p1, %s5503_s20, %s135_s25  }
   0x9   : > { %p5589_p5 = por %p146_p2, %p145_p0  ;;  %p5593_p6 = por %p152_p4, %p151_p3 }
   0xa   : > { %p4127_p7 = scmp.ge.s32.totalorder %s5507_s21, 1  ;;  %p190_p8 = scmp.lt.s32.totalorder %s5507_s21, 3 }
   0xc   : > { %p191_p9 = pnand %p4127_p7, %p190_p8 }
   0xe   : > { %194 = sbr.rel (%p191_p9) target bundleno = 1312 (0x520), region = 40 }
  0x15   : > { %p218_p10 = scmp.lt.s32.totalorder %s5572_s22, 1  ;;  %vm223_vm0 = vcmask 130048   ;;  %v5509_v0 = vmov 0.0   ;;  %vm226_vm1 = vcmask 123904   ;;  %s5510_s10 = smov 16   ;;  %vm1597_vm2 = vcmask 261120  }
  0x16   : > { %252 = vst.msk [vmem:[#allocation2 + $0xd8] sm:$0xff] %vm223_vm0, %v5509_v0  ;;  %253 = vst.msk [vmem:[#allocation2 + $0xe0] sm:$0xff] %vm223_vm0, %v5509_v0  ;;  %s5511_s11 = smov 32   ;;  %s5512_s12 = smov 48   ;;  %vm1630_vm3 = vcmask 392192   ;;  %vm1663_vm4 = vcmask 523264  }
  0x17   : > { %224 = vst.msk [vmem:[#allocation2] sm:$0xff] %vm223_vm0, %v5509_v0  ;;  %225 = vst.msk [vmem:[#allocation2 + $0x8] sm:$0xff] %vm223_vm0, %v5509_v0  ;;  %s219_s30 = scalar_select %p218_p10, %s5572_s22, 1  ;;  %vm1696_vm5 = vcmask 654336   ;;  %vm1729_vm6 = vcmask 785408   ;;  %vm1762_vm7 = vcmask 916480  }
  0x18   : > { %228 = vst.msk [vmem:[#allocation2 + $0x18] sm:$0xff] %vm223_vm0, %v5509_v0  ;;  %229 = vst.msk [vmem:[#allocation2 + $0x20] sm:$0xff] %vm223_vm0, %v5509_v0  ;;  %s5514_s17 = smov 64   ;;  %s5515_s16 = smov 80  }
  0x19   : > { %231 = vst.msk [vmem:[#allocation2 + $0x30] sm:$0xff] %vm223_vm0, %v5509_v0  ;;  %232 = vst.msk [vmem:[#allocation2 + $0x38] sm:$0xff] %vm223_vm0, %v5509_v0  ;;  %s4201_s6 = sshll.u32 %s219_s30, 5  ;;  %s7705_s23 = smov 96  }
  0x1a   : > { %234 = vst.msk [vmem:[#allocation2 + $0x48] sm:$0xff] %vm223_vm0, %v5509_v0  ;;  %235 = vst.msk [vmem:[#allocation2 + $0x50] sm:$0xff] %vm223_vm0, %v5509_v0  ;;  %s5678_s9 = scalar_lea.vmem %s7659_s0, %s4201_s6  ;;  %s7703_s25 = smov 112  }
  0x1b   : > { %237 = vst.msk [vmem:[#allocation2 + $0x60] sm:$0xff] %vm223_vm0, %v5509_v0  ;;  %238 = vst.msk [vmem:[#allocation2 + $0x68] sm:$0xff] %vm223_vm0, %v5509_v0  ;;  %v280_v1 = vld [vmem:[%s5678_s9 + $0x8] sm:$0xff]  ;;  %v279_v2 = vld [vmem:[%s5678_s9] sm:$0xff]  ;;  %s7782_s14 = smov 96   ;;  %s7783_s15 = smov 112  }
  0x1c   : > { %240 = vst.msk [vmem:[#allocation2 + $0x78] sm:$0xff] %vm223_vm0, %v5509_v0  ;;  %241 = vst.msk [vmem:[#allocation2 + $0x80] sm:$0xff] %vm223_vm0, %v5509_v0  ;;  %315 = vxpose.xlu1.b32.start [1/2] (short) %v280_v1, 128  ;;  %283 = vxpose.xlu0.b32.start [1/2] (short) %v279_v2, 128  ;;  %v282_v3 = vld [vmem:[%s5678_s9 + $0x18] sm:$0xff]  ;;  %v281_v4 = vld [vmem:[%s5678_s9 + $0x10] sm:$0xff]  ;;  %s215_s26 = sand.u32 1, %s5499_s19   ;;  %s4202_s8 = sshll.u32 %s5572_s22, 9 }
  0x1d   : > { %243 = vst.msk [vmem:[#allocation2 + $0x90] sm:$0xff] %vm223_vm0, %v5509_v0  ;;  %244 = vst.msk [vmem:[#allocation2 + $0x98] sm:$0xff] %vm223_vm0, %v5509_v0  ;;  %s4128_s30 = sshll.u32 %s215_s26, 5  ;;  %s7612_s13 = scalar_lea.hbm %s7664_s5, %s4202_s8 }
  0x1e   : > { %246 = vst.msk [vmem:[#allocation2 + $0xa8] sm:$0xff] %vm223_vm0, %v5509_v0  ;;  %247 = vst.msk [vmem:[#allocation2 + $0xb0] sm:$0xff] %vm223_vm0, %v5509_v0  ;;  %v412_v5 = vld [vmem:[#allocation2 + $0x1] sm:$0xff]  ;;  %s7598_s6 = scalar_lea.vmem [#allocation3], %s4128_s30  ;;  %s5519_s22 = smov [#allocation3]  }
  0x1f   : > { %249 = vst.msk [vmem:[#allocation2 + $0xc0] sm:$0xff] %vm223_vm0, %v5509_v0  ;;  %250 = vst.msk [vmem:[#allocation2 + $0xc8] sm:$0xff] %vm223_vm0, %v5509_v0  ;;  %v444_v36 = vld [vmem:[#allocation2 + $0x2] sm:$0xff]  ;;  %s4062_s7 = sshll.u32 %s7598_s6, 4  ;;  %s7607_s7 = int_to_ptr.vmem [resolvable:$true] %s4062_s7 }
  0x20   : > { %255 = vst.msk [vmem:[#allocation2 + $0xf0] sm:$0xff] %vm223_vm0, %v5509_v0  ;;  %256 = vst.msk [vmem:[#allocation2 + $0xf8] sm:$0xff] %vm223_vm0, %v5509_v0  ;;  %316 = vxpose.xlu1.b32.end [2/2] (short) %v282_v3, 128  ;;  %284 = vxpose.xlu0.b32.end [2/2] (short) %v281_v4, 128 }
  0x21   : > { %258 = vst.msk [vmem:[#allocation2 + $0x108] sm:$0xff] %vm223_vm0, %v5509_v0  ;;  %259 = vst.msk [vmem:[#allocation2 + $0x110] sm:$0xff] %vm223_vm0, %v5509_v0 }
  0x22   : > { %261 = vst.msk [vmem:[#allocation2 + $0x120] sm:$0xff] %vm223_vm0, %v5509_v0  ;;  %262 = vst.msk [vmem:[#allocation2 + $0x128] sm:$0xff] %vm223_vm0, %v5509_v0 }
  0x23   : > { %264 = vst.msk [vmem:[#allocation2 + $0x138] sm:$0xff] %vm223_vm0, %v5509_v0  ;;  %265 = vst.msk [vmem:[#allocation2 + $0x140] sm:$0xff] %vm223_vm0, %v5509_v0 }
  0x24   : > { %267 = vst.msk [vmem:[#allocation2 + $0x150] sm:$0xff] %vm223_vm0, %v5509_v0  ;;  %268 = vst.msk [vmem:[#allocation2 + $0x158] sm:$0xff] %vm223_vm0, %v5509_v0 }
  0x25   : > { %270 = vst.msk [vmem:[#allocation2 + $0x168] sm:$0xff] %vm223_vm0, %v5509_v0  ;;  %271 = vst.msk [vmem:[#allocation2 + $0x170] sm:$0xff] %vm223_vm0, %v5509_v0 }
  0x26   : > { %273 = vst.msk [vmem:[#allocation2 + $0x180] sm:$0xff] %vm223_vm0, %v5509_v0  ;;  %274 = vst.msk [vmem:[#allocation2 + $0x188] sm:$0xff] %vm223_vm0, %v5509_v0 }
  0x27   : > { %276 = vst.msk [vmem:[#allocation2 + $0x198] sm:$0xff] %vm223_vm0, %v5509_v0  ;;  %277 = vst.msk [vmem:[#allocation2 + $0x1a0] sm:$0xff] %vm223_vm0, %v5509_v0 }
  0x28   : > { %254 = vst.msk [vmem:[#allocation2 + $0xe8] sm:$0x3] %vm226_vm1, %v5509_v0  ;;  %227 = vst.msk [vmem:[#allocation2 + $0x10] sm:$0x3] %vm226_vm1, %v5509_v0 }
  0x29   : > { %230 = vst.msk [vmem:[#allocation2 + $0x28] sm:$0x3] %vm226_vm1, %v5509_v0  ;;  %233 = vst.msk [vmem:[#allocation2 + $0x40] sm:$0x3] %vm226_vm1, %v5509_v0 }
  0x2a   : > { %236 = vst.msk [vmem:[#allocation2 + $0x58] sm:$0x3] %vm226_vm1, %v5509_v0  ;;  %239 = vst.msk [vmem:[#allocation2 + $0x70] sm:$0x3] %vm226_vm1, %v5509_v0 }
  0x2b   : > { %242 = vst.msk [vmem:[#allocation2 + $0x88] sm:$0x3] %vm226_vm1, %v5509_v0  ;;  %245 = vst.msk [vmem:[#allocation2 + $0xa0] sm:$0x3] %vm226_vm1, %v5509_v0 }
  0x2c   : > { %248 = vst.msk [vmem:[#allocation2 + $0xb8] sm:$0x3] %vm226_vm1, %v5509_v0  ;;  %251 = vst.msk [vmem:[#allocation2 + $0xd0] sm:$0x3] %vm226_vm1, %v5509_v0 }
  0x2d   : > { %257 = vst.msk [vmem:[#allocation2 + $0x100] sm:$0x3] %vm226_vm1, %v5509_v0  ;;  %260 = vst.msk [vmem:[#allocation2 + $0x118] sm:$0x3] %vm226_vm1, %v5509_v0 }
  0x2e   : > { %263 = vst.msk [vmem:[#allocation2 + $0x130] sm:$0x3] %vm226_vm1, %v5509_v0  ;;  %266 = vst.msk [vmem:[#allocation2 + $0x148] sm:$0x3] %vm226_vm1, %v5509_v0 }
  0x2f   : > { %269 = vst.msk [vmem:[#allocation2 + $0x160] sm:$0x3] %vm226_vm1, %v5509_v0  ;;  %272 = vst.msk [vmem:[#allocation2 + $0x178] sm:$0x3] %vm226_vm1, %v5509_v0  ;;  %v413_v6 = vld [vmem:[#allocation2 + $0x9] sm:$0xff] }
  0x30   : > { %275 = vst.msk [vmem:[#allocation2 + $0x190] sm:$0x3] %vm226_vm1, %v5509_v0  ;;  %278 = vst.msk [vmem:[#allocation2 + $0x1a8] sm:$0x3] %vm226_vm1, %v5509_v0  ;;  %v4307_v7 = vpack.i.bf16 %v413_v6, %v412_v5  ;;  %v445_v37 = vld [vmem:[#allocation2 + $0xa] sm:$0xff] }
  0x31   : > { %v4342_v47 = vpack.i.bf16 %v445_v37, %v444_v36 }
  0x81   : > { %4308 = vrot.lane.b32.xlu0 %v4307_v7, %s5510_s10 }
  0x9c   : > { %v331_v8 = vpop.trf.xlu1  ;;  %v299_v9 = vpop.trf.xlu0 }
  0x9d   : > { %364 = vst.msk [vmem:[#allocation2 + $0xd9] sm:$0xff] %vm223_vm0, %v331_v8  ;;  %348 = vst.msk [vmem:[#allocation2 + $0x19] sm:$0xff] %vm223_vm0, %v299_v9 }
  0xa0   : > { %v332_v10 = vpop.trf.xlu1  ;;  %v300_v11 = vpop.trf.xlu0 }
  0xa1   : > { %365 = vst.msk [vmem:[#allocation2 + $0xe1] sm:$0xff] %vm223_vm0, %v332_v10  ;;  %349 = vst.msk [vmem:[#allocation2 + $0x21] sm:$0xff] %vm223_vm0, %v300_v11 }
  0xa4   : > { %v333_v12 = vpop.trf.xlu1  ;;  %v301_v13 = vpop.trf.xlu0  ;;  %v430_v14 = vld [vmem:[#allocation2 + $0xd9] sm:$0xff] }
  0xa5   : > { %366 = vst.msk [vmem:[#allocation2 + $0xf1] sm:$0xff] %vm223_vm0, %v333_v12  ;;  %350 = vst.msk [vmem:[#allocation2 + $0x31] sm:$0xff] %vm223_vm0, %v301_v13  ;;  %v414_v18 = vld [vmem:[#allocation2 + $0x19] sm:$0xff] }
  0xa8   : > { %v334_v15 = vpop.trf.xlu1  ;;  %v302_v16 = vpop.trf.xlu0  ;;  %v431_v17 = vld [vmem:[#allocation2 + $0xe1] sm:$0xff] }
  0xa9   : > { %v415_v19 = vld [vmem:[#allocation2 + $0x21] sm:$0xff]  ;;  %367 = vst.msk [vmem:[#allocation2 + $0xf9] sm:$0xff] %vm223_vm0, %v334_v15  ;;  %351 = vst.msk [vmem:[#allocation2 + $0x39] sm:$0xff] %vm223_vm0, %v302_v16  ;;  %v5729_v20 = vpack.i.bf16 %v431_v17, %v430_v14 }
  0xaa   : > { %v5731_v21 = vpack.i.bf16 %v415_v19, %v414_v18  ;;  %v446_v45 = vld [vmem:[#allocation2 + $0x1a] sm:$0xff]  ;;  %v447_v46 = vld [vmem:[#allocation2 + $0x22] sm:$0xff] }
  0xab   : > { %4318 = vrot.lane.b32.xlu0 %v5729_v20, %s5510_s10  ;;  %v5767_v50 = vpack.i.bf16 %v447_v46, %v446_v45 }
  0xac   : > { %4313 = vrot.lane.b32.xlu1 %v5731_v21, %s5510_s10  ;;  %v335_v22 = vpop.trf.xlu1  ;;  %v303_v23 = vpop.trf.xlu0  ;;  %v416_v27 = vld [vmem:[#allocation2 + $0x31] sm:$0xff] }
  0xad   : > { %368 = vst.msk [vmem:[#allocation2 + $0x109] sm:$0xff] %vm223_vm0, %v335_v22  ;;  %352 = vst.msk [vmem:[#allocation2 + $0x49] sm:$0xff] %vm223_vm0, %v303_v23  ;;  %v432_v30 = vld [vmem:[#allocation2 + $0xf1] sm:$0xff] }
  0xb0   : > { %v336_v24 = vpop.trf.xlu1  ;;  %v304_v25 = vpop.trf.xlu0  ;;  %v5739_v26 = vld [vmem:[#allocation2 + $0x32] sm:$0xff]  ;;  %v449_v61 = vld [vmem:[#allocation2 + $0x3a] sm:$0xff] }
  0xb1   : > { %v417_v28 = vld [vmem:[#allocation2 + $0x39] sm:$0xff]  ;;  %369 = vst.msk [vmem:[#allocation2 + $0x111] sm:$0xff] %vm223_vm0, %v336_v24  ;;  %353 = vst.msk [vmem:[#allocation2 + $0x51] sm:$0xff] %vm223_vm0, %v304_v25  ;;  %4132 = vmatprep.mubr.msk.f32.mxu0 %vm223_vm0, %v5739_v26  ;;  %v5787_v2 = vpack.i.bf16 %v449_v61, %v5739_v26 }
  0xb2   : > { %v5745_v29 = vpack.i.bf16 %v417_v28, %v416_v27  ;;  %v433_v31 = vld [vmem:[#allocation2 + $0xf9] sm:$0xff] }
  0xb3   : > { %v5751_v34 = vpack.i.bf16 %v433_v31, %v432_v30 }
  0xb4   : > { %4323 = vrot.lane.b32.xlu1 %v5745_v29, %s5510_s10  ;;  %v337_v32 = vpop.trf.xlu1  ;;  %v305_v33 = vpop.trf.xlu0  ;;  %v434_v35 = vld [vmem:[#allocation2 + $0x109] sm:$0xff] }
  0xb5   : > { %370 = vst.msk [vmem:[#allocation2 + $0x121] sm:$0xff] %vm223_vm0, %v337_v32  ;;  %354 = vst.msk [vmem:[#allocation2 + $0x61] sm:$0xff] %vm223_vm0, %v305_v33  ;;  %v418_v41 = vld [vmem:[#allocation2 + $0x49] sm:$0xff] }
  0xb8   : > { %4328 = vrot.lane.b32.xlu1 %v5751_v34, %s5510_s10  ;;  %v338_v38 = vpop.trf.xlu1  ;;  %v306_v39 = vpop.trf.xlu0  ;;  %v435_v40 = vld [vmem:[#allocation2 + $0x111] sm:$0xff] }
  0xb9   : > { %v419_v42 = vld [vmem:[#allocation2 + $0x51] sm:$0xff]  ;;  %371 = vst.msk [vmem:[#allocation2 + $0x129] sm:$0xff] %vm223_vm0, %v338_v38  ;;  %355 = vst.msk [vmem:[#allocation2 + $0x69] sm:$0xff] %vm223_vm0, %v306_v39  ;;  %v5757_v43 = vpack.i.bf16 %v435_v40, %v434_v35 }
  0xba   : > { %v5759_v44 = vpack.i.bf16 %v419_v42, %v418_v41  ;;  %v450_v12 = vld [vmem:[#allocation2 + $0x4a] sm:$0xff]  ;;  %v451_v13 = vld [vmem:[#allocation2 + $0x52] sm:$0xff]  ;;  %v465_v41 = vld [vmem:[#allocation2 + $0xfa] sm:$0xff] }
  0xbb   : > { %4338 = vrot.lane.b32.xlu0 %v5757_v43, %s5510_s10  ;;  %v5807_v18 = vpack.i.bf16 %v451_v13, %v450_v12  ;;  %v464_v40 = vld [vmem:[#allocation2 + $0xf2] sm:$0xff] }
  0xbc   : > { %4333 = vrot.lane.b32.xlu1 %v5759_v44, %s5510_s10  ;;  %v339_v48 = vpop.trf.xlu1  ;;  %v307_v49 = vpop.trf.xlu0  ;;  %v420_v53 = vld [vmem:[#allocation2 + $0x61] sm:$0xff]  ;;  %v5835_v46 = vpack.i.bf16 %v465_v41, %v464_v40 }
  0xbd   : > { %372 = vst.msk [vmem:[#allocation2 + $0x139] sm:$0xff] %vm223_vm0, %v339_v48  ;;  %356 = vst.msk [vmem:[#allocation2 + $0x79] sm:$0xff] %vm223_vm0, %v307_v49  ;;  %v436_v56 = vld [vmem:[#allocation2 + $0x121] sm:$0xff] }
  0xbf   : > { %4348 = vrot.lane.b32.xlu0 %v5767_v50, %s5511_s11 }
  0xc0   : > { %4343 = vrot.lane.b32.xlu1 %v4342_v47, %s5511_s11  ;;  %v340_v51 = vpop.trf.xlu1  ;;  %v308_v52 = vpop.trf.xlu0  ;;  %v421_v54 = vld [vmem:[#allocation2 + $0x69] sm:$0xff] }
  0xc1   : > { %373 = vst.msk [vmem:[#allocation2 + $0x141] sm:$0xff] %vm223_vm0, %v340_v51  ;;  %357 = vst.msk [vmem:[#allocation2 + $0x81] sm:$0xff] %vm223_vm0, %v308_v52  ;;  %v5774_v55 = vpack.i.bf16 %v421_v54, %v420_v53  ;;  %v437_v57 = vld [vmem:[#allocation2 + $0x129] sm:$0xff] }
  0xc2   : > { %v5780_v60 = vpack.i.bf16 %v437_v57, %v436_v56  ;;  %v452_v4 = vld [vmem:[#allocation2 + $0x62] sm:$0xff]  ;;  %v453_v5 = vld [vmem:[#allocation2 + $0x6a] sm:$0xff]  ;;  %v462_v56 = vld [vmem:[#allocation2 + $0xda] sm:$0xff] }
  0xc3   : > { %v5797_v10 = vpack.i.bf16 %v453_v5, %v452_v4  ;;  %v463_v57 = vld [vmem:[#allocation2 + $0xe2] sm:$0xff]  ;;  %v469_v4 = vld [vmem:[#allocation2 + $0x12a] sm:$0xff] }
  0xc4   : > { %4353 = vrot.lane.b32.xlu1 %v5774_v55, %s5510_s10  ;;  %v341_v58 = vpop.trf.xlu1  ;;  %v309_v59 = vpop.trf.xlu0  ;;  %v422_v0 = vld [vmem:[#allocation2 + $0x79] sm:$0xff]  ;;  %v5851_v61 = vpack.i.bf16 %v463_v57, %v462_v56 }
  0xc5   : > { %374 = vst.msk [vmem:[#allocation2 + $0x151] sm:$0xff] %vm223_vm0, %v341_v58  ;;  %358 = vst.msk [vmem:[#allocation2 + $0x91] sm:$0xff] %vm223_vm0, %v309_v59  ;;  %v438_v6 = vld [vmem:[#allocation2 + $0x139] sm:$0xff] }
  0xc6   : > { %v5900_v40 = vld [vmem:[#allocation2 + $0x78] sm:$0xff] }
  0xc8   : > { %4358 = vrot.lane.b32.xlu1 %v5780_v60, %s5510_s10  ;;  %v342_v62 = vpop.trf.xlu1  ;;  %v310_v63 = vpop.trf.xlu0  ;;  %v423_v1 = vld [vmem:[#allocation2 + $0x81] sm:$0xff] }
  0xc9   : > { %375 = vst.msk [vmem:[#allocation2 + $0x159] sm:$0xff] %vm223_vm0, %v342_v62  ;;  %359 = vst.msk [vmem:[#allocation2 + $0x99] sm:$0xff] %vm223_vm0, %v310_v63  ;;  %v5789_v3 = vpack.i.bf16 %v423_v1, %v422_v0  ;;  %v439_v7 = vld [vmem:[#allocation2 + $0x141] sm:$0xff]  ;;  %v466_v63 = vld [vmem:[#allocation2 + $0x10a] sm:$0xff] }
  0xca   : > { %v5799_v11 = vpack.i.bf16 %v439_v7, %v438_v6  ;;  %v454_v22 = vld [vmem:[#allocation2 + $0x7a] sm:$0xff]  ;;  %v455_v23 = vld [vmem:[#allocation2 + $0x82] sm:$0xff]  ;;  %v467_v0 = vld [vmem:[#allocation2 + $0x112] sm:$0xff] }
  0xcb   : > { %4368 = vrot.lane.b32.xlu0 %v5789_v3, %s5510_s10  ;;  %v5816_v28 = vpack.i.bf16 %v455_v23, %v454_v22  ;;  %v468_v1 = vld [vmem:[#allocation2 + $0x122] sm:$0xff]  ;;  %v5859_v5 = vpack.i.bf16 %v467_v0, %v466_v63  ;;  %v470_v7 = vld [vmem:[#allocation2 + $0x13a] sm:$0xff] }
  0xcc   : > { %4363 = vrot.lane.b32.xlu1 %v5787_v2, %s5511_s11  ;;  %v343_v8 = vpop.trf.xlu1  ;;  %v311_v9 = vpop.trf.xlu0  ;;  %v424_v16 = vld [vmem:[#allocation2 + $0x91] sm:$0xff]  ;;  %v4447_v6 = vpack.i.bf16 %v469_v4, %v468_v1 }
  0xcd   : > { %376 = vst.msk [vmem:[#allocation2 + $0x169] sm:$0xff] %vm223_vm0, %v343_v8  ;;  %360 = vst.msk [vmem:[#allocation2 + $0xa9] sm:$0xff] %vm223_vm0, %v311_v9  ;;  %v440_v24 = vld [vmem:[#allocation2 + $0x151] sm:$0xff]  ;;  %v471_v8 = vld [vmem:[#allocation2 + $0x142] sm:$0xff] }
  0xce   : > { %v4452_v13 = vpack.i.bf16 %v471_v8, %v470_v7  ;;  %v5868_v22 = vld [vmem:[#allocation2 + $0x18] sm:$0xff]  ;;  %v494_v4 = vld [vmem:[#allocation2 + $0xf0] sm:$0xff]  ;;  %v496_v7 = vld [vmem:[#allocation2 + $0x108] sm:$0xff] }
  0xcf   : > { %4373 = vrot.lane.b32.xlu0 %v5799_v11, %s5510_s10  ;;  %v497_v8 = vld [vmem:[#allocation2 + $0x110] sm:$0xff] }
  0xd0   : > { %4383 = vrot.lane.b32.xlu1 %v5797_v10, %s5511_s11  ;;  %v344_v14 = vpop.trf.xlu1  ;;  %v312_v15 = vpop.trf.xlu0  ;;  %v425_v17 = vld [vmem:[#allocation2 + $0x99] sm:$0xff] }
  0xd1   : > { %377 = vst.msk [vmem:[#allocation2 + $0x171] sm:$0xff] %vm223_vm0, %v344_v14  ;;  %361 = vst.msk [vmem:[#allocation2 + $0xb1] sm:$0xff] %vm223_vm0, %v312_v15  ;;  %v5809_v19 = vpack.i.bf16 %v425_v17, %v424_v16  ;;  %v441_v25 = vld [vmem:[#allocation2 + $0x159] sm:$0xff] }
  0xd2   : > { %v5818_v30 = vpack.i.bf16 %v441_v25, %v440_v24  ;;  %v456_v31 = vld [vmem:[#allocation2 + $0x92] sm:$0xff]  ;;  %v457_v32 = vld [vmem:[#allocation2 + $0x9a] sm:$0xff] }
  0xd3   : > { %4378 = vrot.lane.b32.xlu0 %v5807_v18, %s5511_s11  ;;  %v5826_v38 = vpack.i.bf16 %v457_v32, %v456_v31  ;;  %v472_v9 = vld [vmem:[#allocation2 + $0x152] sm:$0xff]  ;;  %v473_v12 = vld [vmem:[#allocation2 + $0x15a] sm:$0xff]  ;;  %v5880_v31 = vld [vmem:[#allocation2 + $0x48] sm:$0xff] }
  0xd4   : > { %4393 = vrot.lane.b32.xlu1 %v5809_v19, %s5510_s10  ;;  %v313_v26 = vpop.trf.xlu0  ;;  %v345_v27 = vpop.trf.xlu1  ;;  %v426_v35 = vld [vmem:[#allocation2 + $0xa9] sm:$0xff]  ;;  %v4457_v14 = vpack.i.bf16 %v473_v12, %v472_v9  ;;  %v5864_v17 = vld [vmem:[#allocation2 + $0x20] sm:$0xff]  ;;  %v5872_v25 = vld [vmem:[#allocation2 + $0x38] sm:$0xff]  ;;  %v5935_v12 = vpack.i.bf16 %v497_v8, %v496_v7 }
  0xd5   : > { %362 = vst.msk [vmem:[#allocation2 + $0xc1] sm:$0xff] %vm223_vm0, %v313_v26  ;;  %378 = vst.msk [vmem:[#allocation2 + $0x181] sm:$0xff] %vm223_vm0, %v345_v27  ;;  %v442_v42 = vld [vmem:[#allocation2 + $0x169] sm:$0xff]  ;;  %v4467_v24 = vpack.i.bf16 %v5864_v17, %v5868_v22 }
  0xd6   : > { %v5874_v26 = vld [vmem:[#allocation2 + $0x50] sm:$0xff]  ;;  %v1796_v7 = vld [vmem:[%s7660_s1 + $0x8] sm:$0xff] }
  0xd7   : > { %4388 = vrot.lane.b32.xlu0 %v5816_v28, %s5511_s11  ;;  %v5878_v27 = vld [vmem:[#allocation2 + $0x30] sm:$0xff] }
  0xd8   : > { %4398 = vrot.lane.b32.xlu1 %v5818_v30, %s5510_s10  ;;  %v314_v33 = vpop.trf.xlu0  ;;  %v427_v36 = vld [vmem:[#allocation2 + $0xb1] sm:$0xff]  ;;  %v346_v37 = vpop.trf.xlu1  ;;  %v5884_v32 = vpack.i.bf16 %v5872_v25, %v5878_v27 }
  0xd9   : > { %363 = vst.msk [vmem:[#allocation2 + $0xc9] sm:$0xff] %vm223_vm0, %v314_v33  ;;  %v5828_v39 = vpack.i.bf16 %v427_v36, %v426_v35  ;;  %379 = vst.msk [vmem:[#allocation2 + $0x189] sm:$0xff] %vm223_vm0, %v346_v37  ;;  %v443_v45 = vld [vmem:[#allocation2 + $0x171] sm:$0xff]  ;;  %v5888_v33 = vpack.i.bf16 %v5874_v26, %v5880_v31  ;;  %v5890_v35 = vld [vmem:[#allocation2 + $0x68] sm:$0xff] }
  0xda   : > { %v5837_v47 = vpack.i.bf16 %v443_v45, %v442_v42  ;;  %v458_v48 = vld [vmem:[#allocation2 + $0xaa] sm:$0xff]  ;;  %v459_v49 = vld [vmem:[#allocation2 + $0xb2] sm:$0xff]  ;;  %v5892_v36 = vld [vmem:[#allocation2 + $0x80] sm:$0xff] }
  0xdb   : > { %4408 = vrot.lane.b32.xlu0 %v5828_v39, %s5510_s10  ;;  %v5843_v53 = vpack.i.bf16 %v459_v49, %v458_v48  ;;  %v474_v15 = vld [vmem:[#allocation2 + $0x16a] sm:$0xff]  ;;  %v475_v16 = vld [vmem:[#allocation2 + $0x172] sm:$0xff]  ;;  %v5898_v37 = vld [vmem:[#allocation2 + $0x60] sm:$0xff]  ;;  %v5908_v42 = vpack.i.bf16 %v5892_v36, %v5900_v40 }
  0xdc   : > { %4403 = vrot.lane.b32.xlu1 %v5826_v38, %s5511_s11  ;;  %v428_v51 = vld [vmem:[#allocation2 + $0xc1] sm:$0xff]  ;;  %v4462_v23 = vpack.i.bf16 %v475_v16, %v474_v15  ;;  %v5904_v41 = vpack.i.bf16 %v5890_v35, %v5898_v37  ;;  %v487_v45 = vld [vmem:[#allocation2 + $0x98] sm:$0xff]  ;;  %v489_v48 = vld [vmem:[#allocation2 + $0xb0] sm:$0xff] }
  0xdd   : > { %v5914_v49 = vld [vmem:[#allocation2 + $0x90] sm:$0xff]  ;;  %v490_v63 = vld [vmem:[#allocation2 + $0xc0] sm:$0xff]  ;;  %v500_v15 = vld [vmem:[#allocation2 + $0x138] sm:$0xff] }
  0xde   : > { %v501_v16 = vld [vmem:[#allocation2 + $0x140] sm:$0xff] }
  0xdf   : > { %4413 = vrot.lane.b32.xlu0 %v5837_v47, %s5510_s10 }
  0xe0   : > { %4428 = vrot.lane.b32.xlu1 %v5835_v46, %s5511_s11  ;;  %v429_v52 = vld [vmem:[#allocation2 + $0xc9] sm:$0xff] }
  0xe1   : > { %v5845_v54 = vpack.i.bf16 %v429_v52, %v428_v51  ;;  %v460_v58 = vld [vmem:[#allocation2 + $0xc2] sm:$0xff]  ;;  %v461_v59 = vld [vmem:[#allocation2 + $0xca] sm:$0xff]  ;;  %v5917_v52 = vpack.i.bf16 %v487_v45, %v5914_v49 }
  0xe2   : > { %v5853_v62 = vpack.i.bf16 %v461_v59, %v460_v58  ;;  %v488_v51 = vld [vmem:[#allocation2 + $0xa8] sm:$0xff]  ;;  %v492_v58 = vld [vmem:[#allocation2 + $0xd8] sm:$0xff]  ;;  %v493_v59 = vld [vmem:[#allocation2 + $0xe0] sm:$0xff] }
  0xe3   : > { %4418 = vrot.lane.b32.xlu0 %v5843_v53, %s5511_s11  ;;  %v5919_v56 = vpack.i.bf16 %v489_v48, %v488_v51  ;;  %v491_v57 = vld [vmem:[#allocation2 + $0xc8] sm:$0xff]  ;;  %v5927_v1 = vpack.i.bf16 %v493_v59, %v492_v58  ;;  %v502_v45 = vld [vmem:[#allocation2 + $0x150] sm:$0xff]  ;;  %v503_v48 = vld [vmem:[#allocation2 + $0x158] sm:$0xff] }
  0xe4   : > { %4438 = vrot.lane.b32.xlu1 %v5845_v54, %s5510_s10  ;;  %v5925_v0 = vpack.i.bf16 %v491_v57, %v490_v63  ;;  %v504_v51 = vld [vmem:[#allocation2 + $0x168] sm:$0xff]  ;;  %v505_v57 = vld [vmem:[#allocation2 + $0x170] sm:$0xff]  ;;  %v5949_v58 = vpack.i.bf16 %v503_v48, %v502_v45  ;;  %v506_v63 = vld [vmem:[#allocation2 + $0x180] sm:$0xff] }
  0xe5   : > { %v5951_v59 = vpack.i.bf16 %v505_v57, %v504_v51  ;;  %v1800_v48 = vld [vmem:[%s7660_s1 + $0x28] sm:$0xff]  ;;  %v1801_v57 = vld [vmem:[%s7660_s1 + $0x30] sm:$0xff] }
  0xe7   : > { %4423 = vrot.lane.b32.xlu0 %v5851_v61, %s5511_s11 }
  0xe8   : > { %4443 = vrot.lane.b32.xlu1 %v5853_v62, %s5511_s11 }
  0xeb   : > { %4433 = vrot.lane.b32.xlu0 %v5859_v5, %s5511_s11 }
  0xec   : > { %4448 = vrot.lane.b32.xlu1 %v4447_v6, %s5511_s11  ;;  %v495_v6 = vld [vmem:[#allocation2 + $0xf8] sm:$0xff] }
  0xed   : > { %v5933_v9 = vpack.i.bf16 %v495_v6, %v494_v4  ;;  %v507_v4 = vld [vmem:[#allocation2 + $0x188] sm:$0xff]  ;;  %v1795_v6 = vld [vmem:[%s7660_s1] sm:$0xff] }
  0xee   : > { %v4204_v8 = vpack.c.bf16 %v1796_v7, %v1795_v6  ;;  %v1803_v6 = vld [vmem:[%s7660_s1 + $0x40] sm:$0xff]  ;;  %v1804_v7 = vld [vmem:[%s7660_s1 + $0x48] sm:$0xff] }
  0xef   : > { %4453 = vrot.lane.b32.xlu0 %v4452_v13, %s5511_s11  ;;  %v498_v13 = vld [vmem:[#allocation2 + $0x120] sm:$0xff] }
  0xf0   : > { %4458 = vrot.lane.b32.xlu1 %v4457_v14, %s5511_s11  ;;  %v499_v14 = vld [vmem:[#allocation2 + $0x128] sm:$0xff] }
  0xf3   : > { %4463 = vrot.lane.b32.xlu0 %v4462_v23, %s5511_s11  ;;  %v5941_v23 = vpack.i.bf16 %v499_v14, %v498_v13  ;;  %v4542_v13 = vpack.i.bf16 %v507_v4, %v506_v63  ;;  %v7665_v14 = vmov 0.0|0.0   ;;  %v1802_v63 = vld [vmem:[%s7660_s1 + $0x38] sm:$0xff] }
  0xf4   : > { %4468 = vrot.lane.b32.xlu1 %v4467_v24, %s5512_s12  ;;  %v5943_v24 = vpack.i.bf16 %v501_v16, %v500_v15  ;;  %4203 = vmatprep.subr.bf16.mxu0 %v7665_v14  ;;  %v1797_v15 = vld [vmem:[%s7660_s1 + $0x10] sm:$0xff]  ;;  %v1798_v16 = vld [vmem:[%s7660_s1 + $0x18] sm:$0xff]  ;;  %v4213_v4 = vpack.c.bf16 %v1802_v63, %v1801_v57  ;;  %v6033_v57 = vpop.permute.xlu0 %4308 }
  0xf5   : > { %4230 = vmatprep.subr.bf16.mxu1 %v7665_v14  ;;  %4205 = vmatpush1.bf16.msra.mxu0 %v4204_v8  ;;  %v4207_v45 = vpack.c.bf16 %v1798_v16, %v1797_v15  ;;  %v1805_v15 = vld [vmem:[%s7660_s1 + $0x50] sm:$0xff]  ;;  %v1806_v16 = vld [vmem:[%s7660_s1 + $0x58] sm:$0xff] }
  0xf6   : > { %4206 = vmatprep.subr.bf16.mxu0 %v7665_v14 }
  0xf7   : > { %4473 = vrot.lane.b32.xlu0 %v5884_v32, %s5512_s12 }
  0xf8   : > { %4478 = vrot.lane.b32.xlu1 %v5888_v33, %s5512_s12 }
  0xf9   : > { %4208 = vmatpush1.bf16.msra.mxu0 %v4207_v45  ;;  %v4219_v45 = vpack.c.bf16 %v1806_v16, %v1805_v15  ;;  %v1811_v15 = vld [vmem:[%s7660_s1 + $0x80] sm:$0xff]  ;;  %v1812_v16 = vld [vmem:[%s7660_s1 + $0x88] sm:$0xff] }
  0xfa   : > { %4209 = vmatprep.subr.bf16.mxu0 %v7665_v14 }
  0xfb   : > { %4483 = vrot.lane.b32.xlu0 %v5904_v41, %s5512_s12 }
  0xfc   : > { %4488 = vrot.lane.b32.xlu1 %v5908_v42, %s5512_s12 }
  0xff   : > { %4493 = vrot.lane.b32.xlu0 %v5917_v52, %s5512_s12 }
 0x100   : > { %4498 = vrot.lane.b32.xlu1 %v5919_v56, %s5512_s12 }
 0x103   : > { %4503 = vrot.lane.b32.xlu0 %v5925_v0, %s5512_s12 }
 0x104   : > { %4508 = vrot.lane.b32.xlu1 %v5927_v1, %s5512_s12 }
 0x107   : > { %4513 = vrot.lane.b32.xlu0 %v5933_v9, %s5512_s12 }
 0x108   : > { %4518 = vrot.lane.b32.xlu1 %v5935_v12, %s5512_s12 }
 0x10b   : > { %4523 = vrot.lane.b32.xlu0 %v5941_v23, %s5512_s12 }
 0x10c   : > { %4528 = vrot.lane.b32.xlu1 %v5943_v24, %s5512_s12 }
 0x10f   : > { %4533 = vrot.lane.b32.xlu0 %v5949_v58, %s5512_s12 }
 0x110   : > { %4538 = vrot.lane.b32.xlu1 %v5951_v59, %s5512_s12 }
 0x113   : > { %4543 = vrot.lane.b32.xlu0 %v4542_v13, %s5512_s12  ;;  %v4216_v13 = vpack.c.bf16 %v1804_v7, %v1803_v6  ;;  %v538_v7 = vld [vmem:[#allocation2 + $0x181] sm:$0xff] }
 0x114   : > { %4548 = vrot.lane.b32.xlu1 %v5731_v21, %s5514_s17  ;;  %v1799_v21 = vld [vmem:[%s7660_s1 + $0x20] sm:$0xff] }
 0x115   : > { %v4210_v51 = vpack.c.bf16 %v1800_v48, %v1799_v21  ;;  %v1808_v48 = vld [vmem:[%s7660_s1 + $0x68] sm:$0xff] }
 0x117   : > { %4553 = vrot.lane.b32.xlu0 %v5745_v29, %s5514_s17  ;;  %4211 = vmatpush1.bf16.msra.mxu0 %v4210_v51 }
 0x118   : > { %4558 = vrot.lane.b32.xlu1 %v5759_v44, %s5514_s17  ;;  %4212 = vmatprep.subr.bf16.mxu0 %v7665_v14 }
 0x11b   : > { %4563 = vrot.lane.b32.xlu0 %v5774_v55, %s5514_s17  ;;  %4214 = vmatpush1.bf16.msra.mxu0 %v4213_v4 }
 0x11c   : > { %4568 = vrot.lane.b32.xlu1 %v5789_v3, %s5514_s17  ;;  %4215 = vmatprep.subr.bf16.mxu0 %v7665_v14 }
 0x11e   : > { %v6008_v8 = vpop.permute.xlu1 %4313 }
 0x11f   : > { %4573 = vrot.lane.b32.xlu0 %v5809_v19, %s5514_s17  ;;  %4217 = vmatpush1.bf16.msra.mxu0 %v4216_v13  ;;  %v539_v13 = vld [vmem:[#allocation2 + $0x189] sm:$0xff] }
 0x120   : > { %4578 = vrot.lane.b32.xlu1 %v5828_v39, %s5514_s17  ;;  %4218 = vmatprep.subr.bf16.mxu0 %v7665_v14 }
 0x123   : > { %4583 = vrot.lane.b32.xlu0 %v5845_v54, %s5514_s17  ;;  %4220 = vmatpush1.bf16.msra.mxu0 %v4219_v45 }
 0x124   : > { %4588 = vrot.lane.b32.xlu1 %v5729_v20, %s5514_s17  ;;  %v1807_v20 = vld [vmem:[%s7660_s1 + $0x60] sm:$0xff]  ;;  %4221 = vmatprep.subr.bf16.mxu0 %v7665_v14 }
 0x125   : > { %v4222_v51 = vpack.c.bf16 %v1808_v48, %v1807_v20  ;;  %v6065_v20 = vpack.i.bf16 %v539_v13, %v538_v7  ;;  %v621_v7 = vld [vmem:[#allocation2 + $0xf1] sm:$0xff]  ;;  %v622_v13 = vld [vmem:[#allocation2 + $0xf9] sm:$0xff] }
 0x126   : > { %v6020_v21 = vpop.permute.xlu1 %4323 }
 0x127   : > { %4593 = vrot.lane.b32.xlu0 %v5751_v34, %s5514_s17  ;;  %v1809_v34 = vld [vmem:[%s7660_s1 + $0x70] sm:$0xff]  ;;  %4223 = vmatpush1.bf16.msra.mxu0 %v4222_v51 }
 0x128   : > { %4598 = vrot.lane.b32.xlu1 %v5757_v43, %s5514_s17  ;;  %v1810_v43 = vld [vmem:[%s7660_s1 + $0x78] sm:$0xff]  ;;  %4224 = vmatprep.subr.bf16.mxu0 %v7665_v14 }
 0x129   : > { %v4225_v4 = vpack.c.bf16 %v1810_v43, %v1809_v34  ;;  %v619_v43 = vld [vmem:[#allocation2 + $0xd9] sm:$0xff] }
 0x12a   : > { %v6035_v63 = vpop.permute.xlu1 %4328 }
 0x12b   : > { %7709 = vst [vmem:[#allocation6_spill] sm:$0xff] %v6035_v63  ;;  %4603 = vrot.lane.b32.xlu0 %v5780_v60, %s5514_s17  ;;  %v6057_v60 = vpop.permute.xlu0 %4318  ;;  %4226 = vmatpush1.bf16.msra.mxu0 %v4225_v4  ;;  %v620_v4 = vld [vmem:[#allocation2 + $0xe1] sm:$0xff]  ;;  %v4315_v63 = vunpack.i.l.bf16 %v6008_v8 }
 0x12c   : > { %4608 = vrot.lane.b32.xlu1 %v5799_v11, %s5514_s17  ;;  %7710 = vst [vmem:[#allocation7_spill] sm:$0xff] %v6057_v60  ;;  %v4228_v11 = vpack.c.bf16 %v1812_v16, %v1811_v15  ;;  %4227 = vmatprep.subr.bf16.mxu0 %v7665_v14  ;;  %v6193_v14 = vld [vmem:[#allocation2 + $0x122] sm:$0xff] }
 0x12d   : > { %7725 = vst [vmem:[#allocation22_spill] sm:$0xff] %v6193_v14 }
 0x12e   : > { %v6048_v6 = vpop.permute.xlu1 %4333 }
 0x12f   : > { %4613 = vrot.lane.b32.xlu0 %v5818_v30, %s5514_s17  ;;  %v6068_v48 = vpop.permute.xlu0 %4338  ;;  %4229 = vmatpush1.bf16.msra.mxu0 %v4228_v11  ;;  %v623_v11 = vld [vmem:[#allocation2 + $0x109] sm:$0xff] }
 0x130   : > { %4618 = vrot.lane.b32.xlu1 %v5837_v47, %s5514_s17  ;;  %7711 = vst [vmem:[#allocation8_spill] sm:$0xff] %v6068_v48  ;;  %v380_v48 = vld [vmem:[#allocation2] sm:$0xff] }
 0x132   : > { %v6063_v45 = vpop.permute.xlu1 %4343 }
 0x133   : > { %4623 = vrot.lane.b32.xlu0 %v6065_v20, %s5514_s17  ;;  %v6080_v47 = vpop.permute.xlu0 %4348 }
 0x134   : > { %4628 = vrot.lane.b32.xlu1 %v5767_v50, %s5515_s16 }
 0x136   : > { %v6074_v30 = vpop.permute.xlu1 %4353 }
 0x137   : > { %4633 = vrot.lane.b32.xlu0 %v5787_v2, %s5515_s16 }
 0x138   : > { %4638 = vrot.lane.b32.xlu1 %v5807_v18, %s5515_s16 }
 0x13a   : > { %v6082_v51 = vpop.permute.xlu1 %4358 }
 0x13b   : > { %7712 = vst [vmem:[#allocation9_spill] sm:$0xff] %v6082_v51  ;;  %4643 = vrot.lane.b32.xlu0 %v5884_v32, %s7705_s23  ;;  %v632_v51 = vld [vmem:[#allocation2 + $0x171] sm:$0xff] }
 0x13c   : > { %4648 = vrot.lane.b32.xlu1 %v5745_v29, %s7703_s25 }
 0x13d   : > { %v6090_v34 = vpop.permute.xlu0 %4368 }
 0x13e   : > { %v6088_v50 = vpop.permute.xlu1 %4363 }
 0x13f   : > { %4653 = vrot.lane.b32.xlu0 %v5888_v33, %s7705_s23 }
 0x140   : > { %4658 = vrot.lane.b32.xlu1 %v5759_v44, %s7703_s25 }
 0x141   : > { %v6098_v18 = vpop.permute.xlu0 %4373 }
 0x142   : > { %v6096_v2 = vpop.permute.xlu1 %4383  ;;  %7713 = vst [vmem:[#allocation10_spill] sm:$0xff] %v6098_v18 }
 0x143   : > { %4663 = vrot.lane.b32.xlu0 %v5904_v41, %s7705_s23 }
 0x144   : > { %4668 = vrot.lane.b32.xlu1 %v5774_v55, %s7703_s25 }
 0x145   : > { %v6106_v32 = vpop.permute.xlu0 %4378 }
 0x146   : > { %v6104_v29 = vpop.permute.xlu1 %4393 }
 0x147   : > { %4673 = vrot.lane.b32.xlu0 %v5797_v10, %s5515_s16 }
 0x148   : > { %4678 = vrot.lane.b32.xlu1 %v5908_v42, %s7705_s23 }
 0x149   : > { %v6114_v33 = vpop.permute.xlu0 %4388 }
 0x14a   : > { %v6112_v44 = vpop.permute.xlu1 %4398 }
 0x14b   : > { %7714 = vst [vmem:[#allocation11_spill] sm:$0xff] %v6112_v44  ;;  %4683 = vrot.lane.b32.xlu0 %v5789_v3, %s7703_s25  ;;  %v629_v44 = vld [vmem:[#allocation2 + $0x151] sm:$0xff] }
 0x14c   : > { %4688 = vrot.lane.b32.xlu1 %v5816_v28, %s5515_s16 }
 0x14d   : > { %v6122_v41 = vpop.permute.xlu0 %4408 }
 0x14e   : > { %v6120_v55 = vpop.permute.xlu1 %4403 }
 0x14f   : > { %4693 = vrot.lane.b32.xlu0 %v5917_v52, %s7705_s23 }
 0x150   : > { %4698 = vrot.lane.b32.xlu1 %v5809_v19, %s7703_s25 }
 0x151   : > { %v6130_v42 = vpop.permute.xlu0 %4413 }
 0x152   : > { %v6128_v10 = vpop.permute.xlu1 %4428  ;;  %7716 = vst [vmem:[#allocation13_spill] sm:$0xff] %v6130_v42  ;;  %v6206_v42 = vld [vmem:[#allocation2 + $0x13a] sm:$0xff] }
 0x153   : > { %7715 = vst [vmem:[#allocation12_spill] sm:$0xff] %v6128_v10  ;;  %4703 = vrot.lane.b32.xlu0 %v5826_v38, %s5515_s16  ;;  %7728 = vst [vmem:[#allocation25_spill] sm:$0xff] %v6206_v42 }
 0x154   : > { %4708 = vrot.lane.b32.xlu1 %v5919_v56, %s7705_s23 }
 0x155   : > { %v6138_v28 = vpop.permute.xlu0 %4418 }
 0x156   : > { %v6136_v3 = vpop.permute.xlu1 %4438 }
 0x157   : > { %7717 = vst [vmem:[#allocation14_spill] sm:$0xff] %v6136_v3  ;;  %4713 = vrot.lane.b32.xlu0 %v5828_v39, %s7703_s25 }
 0x158   : > { %4718 = vrot.lane.b32.xlu1 %v5843_v53, %s5515_s16 }
 0x159   : > { %v6146_v52 = vpop.permute.xlu0 %4423 }
 0x15a   : > { %v6144_v19 = vpop.permute.xlu1 %4443  ;;  %7719 = vst [vmem:[#allocation16_spill] sm:$0xff] %v6146_v52  ;;  %v4350_v52 = vunpack.i.l.bf16 %v6080_v47 }
 0x15b   : > { %7718 = vst [vmem:[#allocation15_spill] sm:$0xff] %v6144_v19  ;;  %4723 = vrot.lane.b32.xlu0 %v5925_v0, %s7705_s23  ;;  %v4742_v0 = vpack.i.bf16 %v620_v4, %v619_v43  ;;  %v624_v43 = vld [vmem:[#allocation2 + $0x111] sm:$0xff] }
 0x15c   : > { %4728 = vrot.lane.b32.xlu1 %v5845_v54, %s7703_s25 }
 0x15d   : > { %v6154_v56 = vpop.permute.xlu0 %4433 }
 0x15e   : > { %v6152_v38 = vpop.permute.xlu1 %4448  ;;  %7721 = vst [vmem:[#allocation18_spill] sm:$0xff] %v6154_v56  ;;  %v4310_v56 = vunpack.i.l.bf16 %v6033_v57 }
 0x15f   : > { %7720 = vst [vmem:[#allocation17_spill] sm:$0xff] %v6152_v38  ;;  %4733 = vrot.lane.b32.xlu0 %v5853_v62, %s5515_s16  ;;  %v4757_v62 = vpack.i.bf16 %v622_v13, %v621_v7  ;;  %v626_v7 = vld [vmem:[#allocation2 + $0x129] sm:$0xff] }
 0x160   : > { %4738 = vrot.lane.b32.xlu1 %v5927_v1, %s7705_s23  ;;  %v1565_v10 = vsel %vm223_vm0, %v380_v48, %v4310_v56 }
 0x161   : > { %v6162_v53 = vpop.permute.xlu0 %4453 }
 0x162   : > { %v6160_v39 = vpop.permute.xlu1 %4458  ;;  %7723 = vst [vmem:[#allocation20_spill] sm:$0xff] %v6162_v53  ;;  %v630_v53 = vld [vmem:[#allocation2 + $0x159] sm:$0xff] }
 0x163   : > { %7722 = vst [vmem:[#allocation19_spill] sm:$0xff] %v6160_v39  ;;  %4743 = vrot.lane.b32.xlu0 %v4742_v0, %s7703_s25  ;;  %v4772_v0 = vpack.i.bf16 %v624_v43, %v623_v11 }
 0x164   : > { %4748 = vrot.lane.b32.xlu1 %v5851_v61, %s5515_s16 }
 0x165   : > { %v6169_v15 = vpop.permute.xlu0 %4463 }
 0x166   : > { %v6167_v54 = vpop.permute.xlu1 %4468  ;;  %7724 = vst [vmem:[#allocation21_spill] sm:$0xff] %v6169_v15  ;;  %v628_v15 = vld [vmem:[#allocation2 + $0x141] sm:$0xff] }
 0x167   : > { %4753 = vrot.lane.b32.xlu0 %v5933_v9, %s7705_s23  ;;  %v625_v9 = vld [vmem:[#allocation2 + $0x121] sm:$0xff] }
 0x168   : > { %4758 = vrot.lane.b32.xlu1 %v4757_v62, %s7703_s25 }
 0x169   : > { %v6176_v16 = vpop.permute.xlu0 %4473 }
 0x16a   : > { %v6174_v1 = vpop.permute.xlu1 %4478 }
 0x16b   : > { %4763 = vrot.lane.b32.xlu0 %v5835_v46, %s5515_s16  ;;  %v4787_v46 = vpack.i.bf16 %v626_v7, %v625_v9  ;;  %v565_v9 = vld [vmem:[#allocation2 + $0x142] sm:$0xff] }
 0x16c   : > { %4768 = vrot.lane.b32.xlu1 %v5935_v12, %s7705_s23  ;;  %v6195_v12 = vld [vmem:[#allocation2 + $0x12a] sm:$0xff]  ;;  %v4807_v39 = vpack.i.bf16 %v565_v9, %v6206_v42 }
 0x16d   : > { %v6184_v4 = vpop.permute.xlu0 %4483  ;;  %7726 = vst [vmem:[#allocation23_spill] sm:$0xff] %v6195_v12  ;;  %v568_v42 = vld [vmem:[#allocation2 + $0x16a] sm:$0xff] }
 0x16e   : > { %v6182_v61 = vpop.permute.xlu1 %4488 }
 0x16f   : > { %4773 = vrot.lane.b32.xlu0 %v4772_v0, %s7703_s25  ;;  %v627_v0 = vld [vmem:[#allocation2 + $0x139] sm:$0xff] }
 0x170   : > { %4778 = vrot.lane.b32.xlu1 %v5859_v5, %s5515_s16  ;;  %v4792_v5 = vpack.i.bf16 %v6195_v12, %v6193_v14  ;;  %v566_v12 = vld [vmem:[#allocation2 + $0x152] sm:$0xff] }
 0x171   : > { %v6191_v62 = vpop.permute.xlu0 %4493 }
 0x172   : > { %v6189_v13 = vpop.permute.xlu1 %4498 }
 0x173   : > { %4783 = vrot.lane.b32.xlu0 %v5941_v23, %s7705_s23 }
 0x174   : > { %4788 = vrot.lane.b32.xlu1 %v4787_v46, %s7703_s25  ;;  %v4802_v46 = vpack.i.bf16 %v628_v15, %v627_v0 }
 0x175   : > { %v6202_v43 = vpop.permute.xlu0 %4503 }
 0x176   : > { %v6200_v11 = vpop.permute.xlu1 %4508 }
 0x177   : > { %7727 = vst [vmem:[#allocation24_spill] sm:$0xff] %v6200_v11  ;;  %4793 = vrot.lane.b32.xlu0 %v4792_v5, %s5515_s16  ;;  %v4817_v5 = vpack.i.bf16 %v630_v53, %v629_v44 }
 0x178   : > { %4798 = vrot.lane.b32.xlu1 %v5943_v24, %s7705_s23  ;;  %v567_v24 = vld [vmem:[#allocation2 + $0x15a] sm:$0xff] }
 0x179   : > { %v6213_v7 = vpop.permute.xlu0 %4513  ;;  %v4822_v9 = vpack.i.bf16 %v567_v24, %v566_v12  ;;  %v603_v12 = vld [vmem:[#allocation2 + $0x198] sm:$0xff]  ;;  %v604_v24 = vld [vmem:[#allocation2 + $0x1a0] sm:$0xff] }
 0x17a   : > { %v6211_v23 = vpop.permute.xlu1 %4518  ;;  %7730 = vst [vmem:[#allocation27_spill] sm:$0xff] %v6213_v7 }
 0x17b   : > { %7729 = vst [vmem:[#allocation26_spill] sm:$0xff] %v6211_v23  ;;  %4803 = vrot.lane.b32.xlu0 %v4802_v46, %s7703_s25  ;;  %v631_v46 = vld [vmem:[#allocation2 + $0x169] sm:$0xff] }
 0x17c   : > { %4808 = vrot.lane.b32.xlu1 %v4807_v39, %s5515_s16  ;;  %v569_v39 = vld [vmem:[#allocation2 + $0x172] sm:$0xff]  ;;  %v381_v23 = vld [vmem:[#allocation2 + $0x8] sm:$0xff] }
 0x17d   : > { %v6220_v38 = vpop.permute.xlu0 %4523 }
 0x17e   : > { %v6218_v18 = vpop.permute.xlu1 %4528  ;;  %7732 = vst [vmem:[#allocation29_spill] sm:$0xff] %v6220_v38  ;;  %v571_v38 = vld [vmem:[#allocation2 + $0x18a] sm:$0xff] }
 0x17f   : > { %7731 = vst [vmem:[#allocation28_spill] sm:$0xff] %v6218_v18  ;;  %4813 = vrot.lane.b32.xlu0 %v5949_v58, %s7705_s23  ;;  %v4832_v58 = vpack.i.bf16 %v632_v51, %v631_v46  ;;  %v601_v18 = vld [vmem:[#allocation2 + $0x180] sm:$0xff]  ;;  %v4857_v51 = vpack.i.bf16 %v604_v24, %v603_v12 }
 0x180   : > { %4818 = vrot.lane.b32.xlu1 %v4817_v5, %s7703_s25  ;;  %v4837_v5 = vpack.i.bf16 %v569_v39, %v568_v42  ;;  %v635_v42 = vld [vmem:[#allocation2 + $0x199] sm:$0xff]  ;;  %v636_v46 = vld [vmem:[#allocation2 + $0x1a1] sm:$0xff] }
 0x181   : > { %v6227_v0 = vpop.permute.xlu0 %4533 }
 0x182   : > { %v6225_v15 = vpop.permute.xlu1 %4538  ;;  %7734 = vst [vmem:[#allocation31_spill] sm:$0xff] %v6227_v0 }
 0x183   : > { %7733 = vst [vmem:[#allocation30_spill] sm:$0xff] %v6225_v15  ;;  %4823 = vrot.lane.b32.xlu0 %v4822_v9, %s5515_s16  ;;  %v602_v15 = vld [vmem:[#allocation2 + $0x188] sm:$0xff] }
 0x184   : > { %4828 = vrot.lane.b32.xlu1 %v5951_v59, %s7705_s23  ;;  %v4842_v59 = vpack.i.bf16 %v602_v15, %v601_v18  ;;  %v570_v9 = vld [vmem:[#allocation2 + $0x182] sm:$0xff]  ;;  %v4862_v18 = vpack.i.bf16 %v636_v46, %v635_v42 }
 0x185   : > { %v6234_v53 = vpop.permute.xlu0 %4543 }
 0x186   : > { %v6232_v44 = vpop.permute.xlu1 %4548  ;;  %7735 = vst [vmem:[#allocation32_spill] sm:$0xff] %v6234_v53 }
 0x187   : > { %4833 = vrot.lane.b32.xlu0 %v4832_v58, %s7703_s25  ;;  %v4852_v58 = vpack.i.bf16 %v571_v38, %v570_v9  ;;  %v4551_v60 = vunpack.i.h.bf16 %v6232_v44 }
 0x188   : > { %4838 = vrot.lane.b32.xlu1 %v4837_v5, %s5515_s16 }
 0x189   : > { %v6240_v14 = vpop.permute.xlu0 %4553 }
 0x18a   : > { %v6238_v0 = vpop.permute.xlu1 %4558 }
 0x18b   : > { %4843 = vrot.lane.b32.xlu0 %v4842_v59, %s7705_s23 }
 0x18c   : > { %4848 = vrot.lane.b32.xlu1 %v6065_v20, %s7703_s25 }
 0x18d   : > { %v6247_v5 = vpop.permute.xlu0 %4563 }
 0x18e   : > { %v6245_v39 = vpop.permute.xlu1 %4568 }
 0x18f   : > { %4853 = vrot.lane.b32.xlu0 %v4852_v58, %s5515_s16 }
 0x190   : > { %4858 = vrot.lane.b32.xlu1 %v4857_v51, %s7705_s23 }
 0x191   : > { %v6253_v53 = vpop.permute.xlu0 %4573 }
 0x192   : > { %v6251_v15 = vpop.permute.xlu1 %4578 }
 0x193   : > { %4863 = vrot.lane.b32.xlu0 %v4862_v18, %s7703_s25  ;;  %v4311_v18 = vunpack.i.h.bf16 %v6033_v57  ;;  %v4550_v57 = vunpack.i.l.bf16 %v6232_v44  ;;  %v4475_v44 = vunpack.i.l.bf16 %v6176_v16 }
 0x195   : > { %v6258_v12 = vpop.permute.xlu0 %4583 }
 0x196   : > { %v6256_v20 = vpop.permute.xlu1 %4588  ;;  %7737 = vst [vmem:[#allocation34_spill] sm:$0xff] %v6258_v12 }
 0x197   : > { %7736 = vst [vmem:[#allocation33_spill] sm:$0xff] %v6256_v20 }
 0x199   : > { %v6262_v59 = vpop.permute.xlu0 %4593 }
 0x19a   : > { %v6260_v24 = vpop.permute.xlu1 %4598  ;;  %7739 = vst [vmem:[#allocation36_spill] sm:$0xff] %v6262_v59  ;;  %v4471_v59 = vunpack.i.h.bf16 %v6167_v54 }
 0x19b   : > { %7738 = vst [vmem:[#allocation35_spill] sm:$0xff] %v6260_v24  ;;  %v4345_v24 = vunpack.i.l.bf16 %v6063_v45 }
 0x19d   : > { %v6266_v9 = vpop.permute.xlu0 %4603 }
 0x19e   : > { %v6264_v38 = vpop.permute.xlu1 %4608  ;;  %7741 = vst [vmem:[#allocation38_spill] sm:$0xff] %v6266_v9  ;;  %v4470_v9 = vunpack.i.l.bf16 %v6167_v54 }
 0x19f   : > { %7740 = vst [vmem:[#allocation37_spill] sm:$0xff] %v6264_v38  ;;  %v4346_v38 = vunpack.i.h.bf16 %v6063_v45  ;;  %v1598_v45 = vsel %vm1597_vm2, %v1565_v10, %v4345_v24  ;;  %v4316_v10 = vunpack.i.h.bf16 %v6008_v8 }
 0x1a0   : > { %v1631_v48 = vsel %vm1630_vm3, %v1598_v45, %v4470_v9 }
 0x1a1   : > { %v6270_v42 = vpop.permute.xlu0 %4613  ;;  %v1664_v11 = vsel %vm1663_vm4, %v1631_v48, %v4550_v57  ;;  %v1568_v48 = vsel %vm223_vm0, %v5864_v17, %v4316_v10  ;;  %v4365_v17 = vunpack.i.l.bf16 %v6088_v50 }
 0x1a2   : > { %v6268_v51 = vpop.permute.xlu1 %4618  ;;  %7743 = vst [vmem:[#allocation40_spill] sm:$0xff] %v6270_v42 }
 0x1a3   : > { %7742 = vst [vmem:[#allocation39_spill] sm:$0xff] %v6268_v51 }
 0x1a5   : > { %v6272_v58 = vpop.permute.xlu0 %4623 }
 0x1a6   : > { %v4629_v46 = vpop.permute.xlu1 %4628  ;;  %7744 = vst [vmem:[#allocation41_spill] sm:$0xff] %v6272_v58  ;;  %v1566_v58 = vsel %vm223_vm0, %v381_v23, %v4311_v18 }
 0x1a7   : > { %v4630_v7 = vunpack.i.l.bf16 %v4629_v46  ;;  %v1599_v23 = vsel %vm1597_vm2, %v1566_v58, %v4346_v38  ;;  %v4631_v56 = vunpack.i.h.bf16 %v4629_v46  ;;  %v1567_v38 = vsel %vm223_vm0, %v5868_v22, %v4315_v63  ;;  %v638_v63 = vld [vmem:[#allocation2 + $0x3a] sm:$0xff] }
 0x1a8   : > { %v1632_v24 = vsel %vm1630_vm3, %v1599_v23, %v4471_v59  ;;  %v4555_v46 = vunpack.i.l.bf16 %v6240_v14 }
 0x1a9   : > { %v6281_v42 = vpop.permute.xlu0 %4633  ;;  %v1697_v12 = vsel %vm1696_vm5, %v1664_v11, %v4630_v7  ;;  %v1665_v9 = vsel %vm1663_vm4, %v1632_v24, %v4551_v60  ;;  %v4351_v11 = vunpack.i.h.bf16 %v6080_v47  ;;  %v1600_v7 = vsel %vm1597_vm2, %v1567_v38, %v4350_v52 }
 0x1aa   : > { %v6279_v51 = vpop.permute.xlu1 %4638  ;;  %v4635_v57 = vunpack.i.l.bf16 %v6281_v42  ;;  %v1698_v23 = vsel %vm1696_vm5, %v1665_v9, %v4631_v56  ;;  %v4325_v56 = vunpack.i.l.bf16 %v6020_v21  ;;  %v4556_v47 = vunpack.i.h.bf16 %v6240_v14  ;;  %v639_v14 = vld [vmem:[#allocation2 + $0x4a] sm:$0xff] }
 0x1ab   : > { %v1601_v38 = vsel %vm1597_vm2, %v1568_v48, %v4351_v11 }
 0x1ad   : > { %v4644_v20 = vpop.permute.xlu0 %4643 }
 0x1ae   : > { %v4649_v18 = vpop.permute.xlu1 %4648  ;;  %v4646_v19 = vunpack.i.h.bf16 %v4644_v20  ;;  %v4645_v3 = vunpack.i.l.bf16 %v4644_v20 }
 0x1af   : > { %v4650_v54 = vunpack.i.l.bf16 %v4649_v18  ;;  %v4651_v20 = vunpack.i.h.bf16 %v4649_v18  ;;  %v4636_v18 = vunpack.i.h.bf16 %v6281_v42  ;;  %v4480_v42 = vunpack.i.l.bf16 %v6174_v1 }
 0x1b0   : > { %v1730_v58 = vsel %vm1729_vm6, %v1697_v12, %v4645_v3  ;;  %v1731_v60 = vsel %vm1729_vm6, %v1698_v23, %v4646_v19  ;;  %v4476_v3 = vunpack.i.h.bf16 %v6176_v16  ;;  %v1633_v12 = vsel %vm1630_vm3, %v1600_v7, %v4475_v44 }
 0x1b1   : > { %v4654_v8 = vpop.permute.xlu0 %4653  ;;  %v1763_v59 = vsel %vm1762_vm7, %v1730_v58, %v4650_v54  ;;  %v1666_v52 = vsel %vm1663_vm4, %v1633_v12, %v4555_v46  ;;  %v1764_v16 = vsel %vm1762_vm7, %v1731_v60, %v4651_v20  ;;  %v4326_v58 = vunpack.i.h.bf16 %v6020_v21 }
 0x1b2   : > { %v4659_v45 = vpop.permute.xlu1 %4658  ;;  %v4655_v22 = vunpack.i.l.bf16 %v4654_v8  ;;  %1981 = vmatmul.mubr.f32.vlgmr.msra.gmra.mrb[0].mxu0 %v1763_v59  ;;  %v1699_v44 = vsel %vm1696_vm5, %v1666_v52, %v4635_v57  ;;  %v4656_v10 = vunpack.i.h.bf16 %v4654_v8  ;;  %v1634_v46 = vsel %vm1630_vm3, %v1601_v38, %v4476_v3  ;;  %v640_v3 = vld [vmem:[#allocation2 + $0x52] sm:$0xff] }
 0x1b3   : > { %4133 = vmatprep.mubr.msk.f32.mxu0 %vm223_vm0, %v638_v63  ;;  %v4660_v54 = vunpack.i.l.bf16 %v4659_v45  ;;  %v1569_v57 = vsel %vm223_vm0, %v5878_v27, %v4325_v56  ;;  %v4560_v20 = vunpack.i.l.bf16 %v6238_v0  ;;  %v1667_v59 = vsel %vm1663_vm4, %v1634_v46, %v4556_v47 }
 0x1b4   : > { %v1732_v9 = vsel %vm1729_vm6, %v1699_v44, %v4655_v22  ;;  %v4640_v8 = vunpack.i.l.bf16 %v6279_v51  ;;  %v4661_v23 = vunpack.i.h.bf16 %v4659_v45  ;;  %v1700_v63 = vsel %vm1696_vm5, %v1667_v59, %v4636_v18 }
 0x1b5   : > { %v6320_v19 = vpop.permute.xlu0 %4663  ;;  %v1765_v22 = vsel %vm1762_vm7, %v1732_v9, %v4660_v54  ;;  %v4366_v21 = vunpack.i.h.bf16 %v6088_v50  ;;  %v1602_v60 = vsel %vm1597_vm2, %v1569_v57, %v4365_v17  ;;  %v1733_v12 = vsel %vm1729_vm6, %v1700_v63, %v4656_v10  ;;  %v641_v10 = vld [vmem:[#allocation2 + $0x62] sm:$0xff]  ;;  %v642_v63 = vld [vmem:[#allocation2 + $0x6a] sm:$0xff] }
 0x1b6   : > { %v6318_v24 = vpop.permute.xlu1 %4668  ;;  %1986 = vmatmul.mubr.f32.gmra.mrb[2].mxu0 %v1764_v16  ;;  %v4665_v27 = vunpack.i.l.bf16 %v6320_v19  ;;  %v4481_v45 = vunpack.i.h.bf16 %v6174_v1  ;;  %v1635_v48 = vsel %vm1630_vm3, %v1602_v60, %v4480_v42  ;;  %v1570_v56 = vsel %vm223_vm0, %v5872_v25, %v4326_v58 }
 0x1b7   : > { %4134 = vmatprep.mubr.msk.f32.mxu0 %vm223_vm0, %v639_v14  ;;  %v4335_v47 = vunpack.i.l.bf16 %v6048_v6  ;;  %v4561_v50 = vunpack.i.h.bf16 %v6238_v0  ;;  %v1668_v52 = vsel %vm1663_vm4, %v1635_v48, %v4560_v20  ;;  %v4641_v18 = vunpack.i.h.bf16 %v6279_v51 }
 0x1b8   : > { %v4670_v54 = vunpack.i.l.bf16 %v6318_v24  ;;  %v1766_v44 = vsel %vm1762_vm7, %v1733_v12, %v4661_v23  ;;  %v1701_v38 = vsel %vm1696_vm5, %v1668_v52, %v4640_v8  ;;  %v1603_v25 = vsel %vm1597_vm2, %v1570_v56, %v4366_v21 }
 0x1b9   : > { %v6338_v7 = vpop.permute.xlu0 %4673  ;;  %v4380_v17 = vunpack.i.l.bf16 %v6106_v32  ;;  %v4666_v0 = vunpack.i.h.bf16 %v6320_v19  ;;  %v1734_v51 = vsel %vm1729_vm6, %v1701_v38, %v4665_v27  ;;  %v1636_v14 = vsel %vm1630_vm3, %v1603_v25, %v4481_v45 }
 0x1ba   : > { %v6336_v11 = vpop.permute.xlu1 %4678  ;;  %1991 = vmatmul.mubr.f32.gmra.mrb[4].mxu0 %v1765_v22  ;;  %v4485_v9 = vunpack.i.l.bf16 %v6184_v4  ;;  %v4336_v42 = vunpack.i.h.bf16 %v6048_v6  ;;  %v1571_v46 = vsel %vm223_vm0, %v5880_v31, %v4335_v47  ;;  %v1669_v58 = vsel %vm1663_vm4, %v1636_v14, %v4561_v50 }
 0x1bb   : > { %4135 = vmatprep.mubr.msk.f32.mxu0 %vm223_vm0, %v640_v3  ;;  %v4565_v57 = vunpack.i.l.bf16 %v6247_v5  ;;  %v4671_v19 = vunpack.i.h.bf16 %v6318_v24  ;;  %v4675_v20 = vunpack.i.l.bf16 %v6338_v7  ;;  %v1767_v23 = vsel %vm1762_vm7, %v1734_v51, %v4670_v54 }
 0x1bc   : > { %v1702_v22 = vsel %vm1696_vm5, %v1669_v58, %v4641_v18  ;;  %v4381_v6 = vunpack.i.h.bf16 %v6106_v32  ;;  %v1604_v31 = vsel %vm1597_vm2, %v1571_v46, %v4380_v17  ;;  %v4355_v24 = vunpack.i.l.bf16 %v6074_v30 }
 0x1bd   : > { %v6358_v1 = vpop.permute.xlu0 %4683  ;;  %v1735_v21 = vsel %vm1729_vm6, %v1702_v22, %v4666_v0  ;;  %v4486_v60 = vunpack.i.h.bf16 %v6184_v4  ;;  %v1637_v27 = vsel %vm1630_vm3, %v1604_v31, %v4485_v9  ;;  %v1572_v3 = vsel %vm223_vm0, %v5874_v26, %v4336_v42 }
 0x1be   : > { %v6356_v16 = vpop.permute.xlu1 %4688  ;;  %1996 = vmatmul.mubr.f32.gmra.mrb[6].mxu0 %v1766_v44  ;;  %v4566_v12 = vunpack.i.h.bf16 %v6247_v5  ;;  %v1670_v32 = vsel %vm1663_vm4, %v1637_v27, %v4565_v57  ;;  %v4680_v45 = vunpack.i.l.bf16 %v6336_v11  ;;  %v4676_v48 = vunpack.i.h.bf16 %v6338_v7  ;;  %v643_v5 = vld [vmem:[#allocation2 + $0x7a] sm:$0xff]  ;;  %v645_v27 = vld [vmem:[#allocation2 + $0x92] sm:$0xff] }
 0x1bf   : > { %4136 = vmatprep.mubr.msk.f32.mxu0 %vm223_vm0, %v641_v10  ;;  %v4685_v56 = vunpack.i.l.bf16 %v6358_v1  ;;  %v1768_v4 = vsel %vm1762_vm7, %v1735_v21, %v4671_v19  ;;  %v1703_v50 = vsel %vm1696_vm5, %v1670_v32, %v4675_v20  ;;  %v4385_v52 = vunpack.i.l.bf16 %v6096_v2 }
 0x1c0   : > { %v1605_v26 = vsel %vm1597_vm2, %v1572_v3, %v4381_v6  ;;  %v4356_v54 = vunpack.i.h.bf16 %v6074_v30  ;;  %v1573_v7 = vsel %vm223_vm0, %v5898_v37, %v4355_v24  ;;  %v4490_v44 = vunpack.i.l.bf16 %v6182_v61 }
 0x1c1   : > { %v6378_v8 = vpop.permute.xlu0 %4693  ;;  %v1638_v38 = vsel %vm1630_vm3, %v1605_v26, %v4486_v60  ;;  %v4570_v25 = vunpack.i.l.bf16 %v6245_v39  ;;  %v4681_v0 = vunpack.i.h.bf16 %v6336_v11  ;;  %v1736_v10 = vsel %vm1729_vm6, %v1703_v50, %v4680_v45  ;;  %v644_v11 = vld [vmem:[#allocation2 + $0x82] sm:$0xff] }
 0x1c2   : > { %v6376_v59 = vpop.permute.xlu1 %4698  ;;  %2001 = vmatmul.mubr.f32.gmra.mrb[8].mxu0 %v1767_v23  ;;  %v1671_v17 = vsel %vm1663_vm4, %v1638_v38, %v4566_v12  ;;  %v4690_v51 = vunpack.i.l.bf16 %v6356_v16  ;;  %v4686_v30 = vunpack.i.h.bf16 %v6358_v1  ;;  %v1769_v37 = vsel %vm1762_vm7, %v1736_v10, %v4685_v56 }
 0x1c3   : > { %4137 = vmatprep.mubr.msk.f32.mxu0 %vm223_vm0, %v642_v63  ;;  %v1704_v9 = vsel %vm1696_vm5, %v1671_v17, %v4676_v48  ;;  %v4386_v42 = vunpack.i.h.bf16 %v6096_v2  ;;  %v1606_v46 = vsel %vm1597_vm2, %v1573_v7, %v4385_v52  ;;  %v4695_v58 = vunpack.i.l.bf16 %v6378_v8 }
 0x1c4   : > { %v1574_v57 = vsel %vm223_vm0, %v5890_v35, %v4356_v54  ;;  %v4491_v19 = vunpack.i.h.bf16 %v6182_v61  ;;  %v1639_v1 = vsel %vm1630_vm3, %v1606_v46, %v4490_v44  ;;  %v4370_v20 = vunpack.i.l.bf16 %v6090_v34 }
 0x1c5   : > { %v6396_v47 = vpop.permute.xlu0 %4703  ;;  %v4571_v23 = vunpack.i.h.bf16 %v6245_v39  ;;  %v1672_v2 = vsel %vm1663_vm4, %v1639_v1, %v4570_v25  ;;  %v1737_v6 = vsel %vm1729_vm6, %v1704_v9, %v4681_v0  ;;  %v4691_v31 = vunpack.i.h.bf16 %v6356_v16 }
 0x1c6   : > { %v6402_v18 = vpop.permute.xlu1 %4708  ;;  %2006 = vmatmul.mubr.f32.gmra.mrb[10].mxu0 %v1768_v4  ;;  %v4700_v35 = vunpack.i.l.bf16 %v6376_v59  ;;  %v1770_v61 = vsel %vm1762_vm7, %v1737_v6, %v4686_v30  ;;  %v1705_v63 = vsel %vm1696_vm5, %v1672_v2, %v4690_v51  ;;  %v1607_v21 = vsel %vm1597_vm2, %v1574_v57, %v4386_v42 }
 0x1c7   : > { %4138 = vmatprep.mubr.msk.f32.mxu0 %vm223_vm0, %v643_v5  ;;  %v4390_v24 = vunpack.i.l.bf16 %v6114_v33  ;;  %v4696_v39 = vunpack.i.h.bf16 %v6378_v8  ;;  %v1738_v3 = vsel %vm1729_vm6, %v1705_v63, %v4695_v58  ;;  %v1640_v16 = vsel %vm1630_vm3, %v1607_v21, %v4491_v19 }
 0x1c8   : > { %v4495_v12 = vunpack.i.l.bf16 %v6191_v62  ;;  %v4371_v32 = vunpack.i.h.bf16 %v6090_v34  ;;  %v1575_v45 = vsel %vm223_vm0, %v5900_v40, %v4370_v20  ;;  %v1673_v48 = vsel %vm1663_vm4, %v1640_v16, %v4571_v23  ;;  %v646_v40 = vld [vmem:[#allocation2 + $0x9a] sm:$0xff] }
 0x1c9   : > { %v6416_v14 = vpop.permute.xlu0 %4713  ;;  %v4575_v8 = vunpack.i.l.bf16 %v6253_v53  ;;  %v4701_v56 = vunpack.i.h.bf16 %v6376_v59  ;;  %v4705_v4 = vunpack.i.l.bf16 %v6396_v47  ;;  %v1771_v50 = vsel %vm1762_vm7, %v1738_v3, %v4700_v35 }
 0x1ca   : > { %2011 = vmatmul.mubr.f32.gmra.mrb[12].mxu0 %v1769_v37  ;;  %v6431_v22 = vpop.permute.xlu1 %4718  ;;  %v1706_v52 = vsel %vm1696_vm5, %v1673_v48, %v4691_v31  ;;  %v4391_v26 = vunpack.i.h.bf16 %v6114_v33  ;;  %v1608_v5 = vsel %vm1597_vm2, %v1575_v45, %v4390_v24  ;;  %v4395_v7 = vunpack.i.l.bf16 %v6104_v29 }
 0x1cb   : > { %4139 = vmatprep.mubr.msk.f32.mxu0 %vm223_vm0, %v644_v11  ;;  %v1739_v54 = vsel %vm1729_vm6, %v1706_v52, %v4696_v39  ;;  %v4496_v59 = vunpack.i.h.bf16 %v6191_v62  ;;  %v1641_v44 = vsel %vm1630_vm3, %v1608_v5, %v4495_v12  ;;  %v1576_v38 = vsel %vm223_vm0, %v5892_v36, %v4371_v32  ;;  %v5415_v52 = vld [vmem:[#allocation2 + $0xa8] sm:$0xff] }
 0x1cc   : > { %v4576_v33 = vunpack.i.h.bf16 %v6253_v53  ;;  %v1674_v25 = vsel %vm1663_vm4, %v1641_v44, %v4575_v8  ;;  %v4710_v17 = vunpack.i.l.bf16 %v6402_v18  ;;  %v4706_v10 = vunpack.i.h.bf16 %v6396_v47  ;;  %v647_v53 = vld [vmem:[#allocation2 + $0xaa] sm:$0xff] }
 0x1cd   : > { %v6441_v60 = vpop.permute.xlu0 %4723  ;;  %v4715_v51 = vunpack.i.l.bf16 %v6416_v14  ;;  %v1772_v62 = vsel %vm1762_vm7, %v1739_v54, %v4701_v56  ;;  %v1707_v30 = vsel %vm1696_vm5, %v1674_v25, %v4705_v4  ;;  %v1609_v37 = vsel %vm1597_vm2, %v1576_v38, %v4391_v26  ;;  %v650_v25 = vld [vmem:[#allocation2 + $0xca] sm:$0xff] }
 0x1ce   : > { %2016 = vmatmul.mubr.f32.gmra.mrb[14].mxu0 %v1770_v61  ;;  %v6458_v34 = vpop.permute.xlu1 %4728  ;;  %v4405_v36 = vunpack.i.l.bf16 %v6120_v55  ;;  %v4396_v9 = vunpack.i.h.bf16 %v6104_v29  ;;  %v1577_v42 = vsel %vm223_vm0, %v5914_v49, %v4395_v7  ;;  %v4500_v46 = vunpack.i.l.bf16 %v6189_v13  ;;  %v5414_v61 = vld [vmem:[#allocation2 + $0x98] sm:$0xff] }
 0x1cf   : > { %4140 = vmatprep.mubr.msk.f32.mxu0 %vm223_vm0, %v645_v27  ;;  %v1642_v47 = vsel %vm1630_vm3, %v1609_v37, %v4496_v59  ;;  %v4580_v58 = vunpack.i.l.bf16 %v6251_v15  ;;  %v4711_v57 = vunpack.i.h.bf16 %v6402_v18  ;;  %v1740_v1 = vsel %vm1729_vm6, %v1707_v30, %v4710_v17  ;;  %v648_v18 = vld [vmem:[#allocation2 + $0xb2] sm:$0xff] }
 0x1d0   : > { %v1675_v11 = vsel %vm1663_vm4, %v1642_v47, %v4576_v33  ;;  %v4720_v29 = vunpack.i.l.bf16 %v6431_v22  ;;  %v4716_v49 = vunpack.i.h.bf16 %v6416_v14  ;;  %v1773_v20 = vsel %vm1762_vm7, %v1740_v1, %v4715_v51  ;;  %v5416_v30 = vld [vmem:[#allocation2 + $0xb0] sm:$0xff] }
 0x1d1   : > { %v6470_v0 = vpop.permute.xlu0 %4733  ;;  %v1708_v23 = vsel %vm1696_vm5, %v1675_v11, %v4706_v10  ;;  %v4406_v2 = vunpack.i.h.bf16 %v6120_v55  ;;  %v1610_v6 = vsel %vm1597_vm2, %v1577_v42, %v4405_v36  ;;  %v4725_v31 = vunpack.i.l.bf16 %v6441_v60  ;;  %v7746_v10 = vld [vmem:[#allocation14_spill] sm:$0xff]  ;;  %v7747_v11 = vld [vmem:[#allocation15_spill] sm:$0xff] }
 0x1d2   : > { %2021 = vmatmul.mubr.f32.gmra.mrb[16].mxu0 %v1771_v50  ;;  %v6487_v19 = vpop.permute.xlu1 %4738  ;;  %v1578_v63 = vsel %vm223_vm0, %v5414_v61, %v4396_v9  ;;  %v4501_v21 = vunpack.i.h.bf16 %v6189_v13  ;;  %v1643_v14 = vsel %vm1630_vm3, %v1610_v6, %v4500_v46  ;;  %v4410_v24 = vunpack.i.l.bf16 %v6122_v41 }
 0x1d3   : > { %4141 = vmatprep.mubr.msk.f32.mxu0 %vm223_vm0, %v646_v40  ;;  %v4581_v55 = vunpack.i.h.bf16 %v6251_v15  ;;  %v1676_v39 = vsel %vm1663_vm4, %v1643_v14, %v4580_v58  ;;  %v1741_v27 = vsel %vm1729_vm6, %v1708_v23, %v4711_v57  ;;  %v4721_v3 = vunpack.i.h.bf16 %v6431_v22  ;;  %v649_v15 = vld [vmem:[#allocation2 + $0xc2] sm:$0xff] }
 0x1d4   : > { %v4730_v16 = vunpack.i.l.bf16 %v6458_v34  ;;  %v1774_v12 = vsel %vm1762_vm7, %v1741_v27, %v4716_v49  ;;  %v1709_v13 = vsel %vm1696_vm5, %v1676_v39, %v4720_v29  ;;  %v1611_v32 = vsel %vm1597_vm2, %v1578_v63, %v4406_v2  ;;  %v651_v29 = vld [vmem:[#allocation2 + $0xda] sm:$0xff] }
 0x1d5   : > { %v6497_v35 = vpop.permute.xlu0 %4743  ;;  %v4420_v45 = vunpack.i.l.bf16 %v6138_v28  ;;  %v4726_v48 = vunpack.i.h.bf16 %v6441_v60  ;;  %v1742_v56 = vsel %vm1729_vm6, %v1709_v13, %v4725_v31  ;;  %v1644_v22 = vsel %vm1630_vm3, %v1611_v32, %v4501_v21  ;;  %v7745_v60 = vld [vmem:[#allocation34_spill] sm:$0xff]  ;;  %v7749_v31 = vld [vmem:[#allocation33_spill] sm:$0xff]  ;;  %v7750_v13 = vld [vmem:[#allocation7_spill] sm:$0xff] }
 0x1d6   : > { %2026 = vmatmul.mubr.f32.gmra.mrb[18].mxu0 %v1772_v62  ;;  %v6514_v8 = vpop.permute.xlu1 %4748  ;;  %v4505_v4 = vunpack.i.l.bf16 %v6202_v43  ;;  %v4411_v50 = vunpack.i.h.bf16 %v6122_v41  ;;  %v1579_v26 = vsel %vm223_vm0, %v5415_v52, %v4410_v24  ;;  %v1677_v5 = vsel %vm1663_vm4, %v1644_v22, %v4581_v55 }
 0x1d7   : > { %4142 = vmatprep.mubr.msk.f32.mxu0 %vm223_vm0, %v647_v53  ;;  %v4585_v40 = vunpack.i.l.bf16 %v7745_v60  ;;  %v4731_v7 = vunpack.i.h.bf16 %v6458_v34  ;;  %v4735_v59 = vunpack.i.l.bf16 %v6470_v0  ;;  %v1775_v44 = vsel %vm1762_vm7, %v1742_v56, %v4730_v16 }
 0x1d8   : > { %v1710_v38 = vsel %vm1696_vm5, %v1677_v5, %v4721_v3  ;;  %v4421_v33 = vunpack.i.h.bf16 %v6138_v28  ;;  %v1612_v41 = vsel %vm1597_vm2, %v1579_v26, %v4420_v45  ;;  %v4440_v51 = vunpack.i.l.bf16 %v7746_v10 }
 0x1d9   : > { %v6524_v54 = vpop.permute.xlu0 %4753  ;;  %v1743_v17 = vsel %vm1729_vm6, %v1710_v38, %v4726_v48  ;;  %v4506_v62 = vunpack.i.h.bf16 %v6202_v43  ;;  %v1645_v34 = vsel %vm1630_vm3, %v1612_v41, %v4505_v4  ;;  %v1580_v37 = vsel %vm223_vm0, %v5416_v30, %v4411_v50  ;;  %v5418_v48 = vld [vmem:[#allocation2 + $0xc8] sm:$0xff]  ;;  %v653_v38 = vld [vmem:[#allocation2 + $0xf2] sm:$0xff] }
 0x1da   : > { %2031 = vmatmul.mubr.f32.gmra.mrb[20].mxu0 %v1773_v20  ;;  %v4586_v36 = vunpack.i.h.bf16 %v7745_v60  ;;  %v1678_v28 = vsel %vm1663_vm4, %v1645_v34, %v4585_v40  ;;  %v4740_v53 = vunpack.i.l.bf16 %v6487_v19  ;;  %v6541_v9 = vpop.permute.xlu1 %4758  ;;  %v4736_v42 = vunpack.i.h.bf16 %v6470_v0  ;;  %v5417_v20 = vld [vmem:[#allocation2 + $0xc0] sm:$0xff] }
 0x1db   : > { %4143 = vmatprep.mubr.msk.f32.mxu0 %vm223_vm0, %v648_v18  ;;  %v4745_v46 = vunpack.i.l.bf16 %v6497_v35  ;;  %v1776_v43 = vsel %vm1762_vm7, %v1743_v17, %v4731_v7  ;;  %v1711_v47 = vsel %vm1696_vm5, %v1678_v28, %v4735_v59  ;;  %v1613_v58 = vsel %vm1597_vm2, %v1580_v37, %v4421_v33  ;;  %v7748_v0 = vld [vmem:[#allocation24_spill] sm:$0xff] }
 0x1dc   : > { %v4445_v57 = vunpack.i.l.bf16 %v7747_v11  ;;  %v4441_v49 = vunpack.i.h.bf16 %v7746_v10  ;;  %v1581_v23 = vsel %vm223_vm0, %v5417_v20, %v4440_v51  ;;  %v4510_v2 = vunpack.i.l.bf16 %v7748_v0  ;;  %v7751_v7 = vld [vmem:[#allocation16_spill] sm:$0xff]  ;;  %v5419_v10 = vld [vmem:[#allocation2 + $0xd8] sm:$0xff] }
 0x1dd   : > { %v6549_v1 = vpop.permute.xlu0 %4763  ;;  %v1646_v6 = vsel %vm1630_vm3, %v1613_v58, %v4506_v62  ;;  %v4590_v18 = vunpack.i.l.bf16 %v7749_v31  ;;  %v4741_v63 = vunpack.i.h.bf16 %v6487_v19  ;;  %v1744_v21 = vsel %vm1729_vm6, %v1711_v47, %v4740_v53  ;;  %v652_v19 = vld [vmem:[#allocation2 + $0xe2] sm:$0xff]  ;;  %v654_v47 = vld [vmem:[#allocation2 + $0xfa] sm:$0xff] }
 0x1de   : > { %2036 = vmatmul.mubr.f32.gmra.mrb[22].mxu0 %v1774_v12  ;;  %v1679_v61 = vsel %vm1663_vm4, %v1646_v6, %v4586_v36  ;;  %v4750_v14 = vunpack.i.l.bf16 %v6514_v8  ;;  %v4746_v24 = vunpack.i.h.bf16 %v6497_v35  ;;  %v1777_v55 = vsel %vm1762_vm7, %v1744_v21, %v4745_v46  ;;  %v6567_v12 = vpop.permute.xlu1 %4768  ;;  %v7753_v34 = vld [vmem:[#allocation36_spill] sm:$0xff] }
 0x1df   : > { %4144 = vmatprep.mubr.msk.f32.mxu0 %vm223_vm0, %v649_v15  ;;  %v1712_v39 = vsel %vm1696_vm5, %v1679_v61, %v4736_v42  ;;  %v4446_v27 = vunpack.i.h.bf16 %v7747_v11  ;;  %v1614_v3 = vsel %vm1597_vm2, %v1581_v23, %v4445_v57  ;;  %v4755_v16 = vunpack.i.l.bf16 %v6524_v54  ;;  %v7754_v11 = vld [vmem:[#allocation6_spill] sm:$0xff] }
 0x1e0   : > { %v4320_v32 = vunpack.i.l.bf16 %v7750_v13  ;;  %v4511_v45 = vunpack.i.h.bf16 %v7748_v0  ;;  %v1647_v35 = vsel %vm1630_vm3, %v1614_v3, %v4510_v2  ;;  %v1582_v15 = vsel %vm223_vm0, %v5418_v48, %v4441_v49  ;;  %v5420_v49 = vld [vmem:[#allocation2 + $0xe0] sm:$0xff] }
 0x1e1   : > { %v4591_v56 = vunpack.i.h.bf16 %v7749_v31  ;;  %v1680_v22 = vsel %vm1663_vm4, %v1647_v35, %v4590_v18  ;;  %v6576_v4 = vpop.permute.xlu0 %4773  ;;  %v1745_v50 = vsel %vm1729_vm6, %v1712_v39, %v4741_v63  ;;  %v4751_v52 = vunpack.i.h.bf16 %v6514_v8  ;;  %v7755_v63 = vld [vmem:[#allocation12_spill] sm:$0xff] }
 0x1e2   : > { %2041 = vmatmul.mubr.f32.gmra.mrb[24].mxu0 %v1775_v44  ;;  %v4760_v26 = vunpack.i.l.bf16 %v6541_v9  ;;  %v1778_v5 = vsel %vm1762_vm7, %v1745_v50, %v4746_v24  ;;  %v1713_v60 = vsel %vm1696_vm5, %v1680_v22, %v4750_v14  ;;  %v1615_v40 = vsel %vm1597_vm2, %v1582_v15, %v4446_v27  ;;  %v5421_v27 = vld [vmem:[#allocation2 + $0xf0] sm:$0xff] }
 0x1e3   : > { %4145 = vmatprep.mubr.msk.f32.mxu0 %vm223_vm0, %v650_v25  ;;  %v4425_v59 = vunpack.i.l.bf16 %v7751_v7  ;;  %v4756_v44 = vunpack.i.h.bf16 %v6524_v54  ;;  %v1746_v33 = vsel %vm1729_vm6, %v1713_v60, %v4755_v16  ;;  %v1648_v41 = vsel %vm1630_vm3, %v1615_v40, %v4511_v45  ;;  %v7752_v25 = vld [vmem:[#allocation27_spill] sm:$0xff]  ;;  %v6594_v54 = vpop.permute.xlu1 %4778 }
 0x1e4   : > { %v4515_v8 = vunpack.i.l.bf16 %v7752_v25  ;;  %v4321_v17 = vunpack.i.h.bf16 %v7750_v13  ;;  %v1583_v51 = vsel %vm223_vm0, %v5419_v10, %v4320_v32  ;;  %v1681_v62 = vsel %vm1663_vm4, %v1648_v41, %v4591_v56  ;;  %v7757_v13 = vld [vmem:[#allocation35_spill] sm:$0xff] }
 0x1e5   : > { %v4595_v30 = vunpack.i.l.bf16 %v7753_v34  ;;  %v4761_v37 = vunpack.i.h.bf16 %v6541_v9  ;;  %v4765_v36 = vunpack.i.l.bf16 %v6549_v1  ;;  %v1779_v28 = vsel %vm1762_vm7, %v1746_v33, %v4760_v26  ;;  %v5422_v40 = vld [vmem:[#allocation2 + $0xf8] sm:$0xff] }
 0x1e6   : > { %2046 = vmatmul.mubr.f32.gmra.mrb[26].mxu0 %v1776_v43  ;;  %v1714_v53 = vsel %vm1696_vm5, %v1681_v62, %v4751_v52  ;;  %v4426_v42 = vunpack.i.h.bf16 %v7751_v7  ;;  %v1616_v46 = vsel %vm1597_vm2, %v1583_v51, %v4425_v59  ;;  %v6602_v43 = vpop.permute.xlu0 %4783  ;;  %v4330_v57 = vunpack.i.l.bf16 %v7754_v11 }
 0x1e7   : > { %4146 = vmatprep.mubr.msk.f32.mxu0 %vm223_vm0, %v651_v29  ;;  %v1747_v58 = vsel %vm1729_vm6, %v1714_v53, %v4756_v44  ;;  %v4516_v9 = vunpack.i.h.bf16 %v7752_v25  ;;  %v1649_v29 = vsel %vm1630_vm3, %v1616_v46, %v4515_v8  ;;  %v1584_v20 = vsel %vm223_vm0, %v5420_v49, %v4321_v17  ;;  %v6619_v24 = vpop.permute.xlu1 %4788 }
 0x1e8   : > { %v4596_v23 = vunpack.i.h.bf16 %v7753_v34  ;;  %v1682_v0 = vsel %vm1663_vm4, %v1649_v29, %v4595_v30  ;;  %v4770_v2 = vunpack.i.l.bf16 %v6567_v12  ;;  %v4766_v6 = vunpack.i.h.bf16 %v6549_v1  ;;  %v7756_v1 = vld [vmem:[#allocation26_spill] sm:$0xff] }
 0x1e9   : > { %v4775_v31 = vunpack.i.l.bf16 %v6576_v4  ;;  %v1780_v18 = vsel %vm1762_vm7, %v1747_v58, %v4761_v37  ;;  %v1715_v61 = vsel %vm1696_vm5, %v1682_v0, %v4765_v36  ;;  %v4430_v21 = vunpack.i.l.bf16 %v7755_v63  ;;  %v7759_v30 = vld [vmem:[#allocation18_spill] sm:$0xff] }
 0x1ea   : > { %2051 = vmatmul.mubr.f32.gmra.mrb[28].mxu0 %v1777_v55  ;;  %v1617_v14 = vsel %vm1597_vm2, %v1584_v20, %v4426_v42  ;;  %v655_v55 = vld [vmem:[#allocation2 + $0x10a] sm:$0xff]  ;;  %v4331_v39 = vunpack.i.h.bf16 %v7754_v11  ;;  %v1585_v3 = vsel %vm223_vm0, %v5421_v27, %v4330_v57  ;;  %v4520_v16 = vunpack.i.l.bf16 %v7756_v1  ;;  %v6629_v48 = vpop.permute.xlu0 %4793 }
 0x1eb   : > { %4147 = vmatprep.mubr.msk.f32.mxu0 %vm223_vm0, %v652_v19  ;;  %v1650_v19 = vsel %vm1630_vm3, %v1617_v14, %v4516_v9  ;;  %v4600_v32 = vunpack.i.l.bf16 %v7757_v13  ;;  %v4771_v35 = vunpack.i.h.bf16 %v6567_v12  ;;  %v1748_v15 = vsel %vm1729_vm6, %v1715_v61, %v4770_v2  ;;  %v656_v12 = vld [vmem:[#allocation2 + $0x112] sm:$0xff]  ;;  %v6646_v25 = vpop.permute.xlu1 %4798  ;;  %v5423_v11 = vld [vmem:[#allocation2 + $0x108] sm:$0xff] }
 0x1ec   : > { %v1683_v45 = vsel %vm1663_vm4, %v1650_v19, %v4596_v23  ;;  %v4780_v56 = vunpack.i.l.bf16 %v6594_v54  ;;  %v4776_v22 = vunpack.i.h.bf16 %v6576_v4  ;;  %v1781_v50 = vsel %vm1762_vm7, %v1748_v15, %v4775_v31  ;;  %v7758_v4 = vld [vmem:[#allocation8_spill] sm:$0xff]  ;;  %v7763_v61 = vld [vmem:[#allocation9_spill] sm:$0xff] }
 0x1ed   : > { %v1716_v52 = vsel %vm1696_vm5, %v1683_v45, %v4766_v6  ;;  %v4431_v26 = vunpack.i.h.bf16 %v7755_v63  ;;  %v4785_v60 = vunpack.i.l.bf16 %v6602_v43  ;;  %v1586_v7 = vsel %vm223_vm0, %v5422_v40, %v4331_v39 }
 0x1ee   : > { %2056 = vmatmul.mubr.f32.gmra.mrb[30].mxu0 %v1778_v5  ;;  %v1618_v5 = vsel %vm1597_vm2, %v1585_v3, %v4430_v21  ;;  %v4521_v59 = vunpack.i.h.bf16 %v7756_v1  ;;  %v4601_v33 = vunpack.i.h.bf16 %v7757_v13  ;;  %v1749_v8 = vsel %vm1729_vm6, %v1716_v52, %v4771_v35  ;;  %v7765_v35 = vld [vmem:[#allocation17_spill] sm:$0xff] }
 0x1ef   : > { %4148 = vmatprep.mubr.msk.f32.mxu0 %vm223_vm0, %v653_v38  ;;  %v1651_v44 = vsel %vm1630_vm3, %v1618_v5, %v4520_v16  ;;  %v4340_v38 = vunpack.i.l.bf16 %v7758_v4  ;;  %v4781_v17 = vunpack.i.h.bf16 %v6594_v54  ;;  %v4790_v10 = vunpack.i.l.bf16 %v6619_v24  ;;  %v7760_v54 = vld [vmem:[#allocation29_spill] sm:$0xff]  ;;  %v6673_v31 = vpop.permute.xlu1 %4808 }
 0x1f0   : > { %v1684_v41 = vsel %vm1663_vm4, %v1651_v44, %v4600_v32  ;;  %v1782_v51 = vsel %vm1762_vm7, %v1749_v8, %v4776_v22  ;;  %v1619_v34 = vsel %vm1597_vm2, %v1586_v7, %v4431_v26  ;;  %v4435_v37 = vunpack.i.l.bf16 %v7759_v30  ;;  %v7766_v26 = vld [vmem:[#allocation28_spill] sm:$0xff] }
 0x1f1   : > { %v1717_v62 = vsel %vm1696_vm5, %v1684_v41, %v4780_v56  ;;  %v4786_v36 = vunpack.i.h.bf16 %v6602_v43  ;;  %v1652_v42 = vsel %vm1630_vm3, %v1619_v34, %v4521_v59  ;;  %v4525_v46 = vunpack.i.l.bf16 %v7760_v54  ;;  %v7762_v43 = vld [vmem:[#allocation38_spill] sm:$0xff] }
 0x1f2   : > { %2061 = vmatmul.mubr.f32.gmra.mrb[32].mxu0 %v1779_v28  ;;  %v6656_v28 = vpop.permute.xlu0 %4803  ;;  %v1750_v53 = vsel %vm1729_vm6, %v1717_v62, %v4785_v60  ;;  %v4341_v58 = vunpack.i.h.bf16 %v7758_v4  ;;  %v1587_v57 = vsel %vm223_vm0, %v5423_v11, %v4340_v38  ;;  %v1685_v9 = vsel %vm1663_vm4, %v1652_v42, %v4601_v33  ;;  %v7767_v60 = vld [vmem:[#allocation25_spill] sm:$0xff] }
 0x1f3   : > { %4149 = vmatprep.mubr.msk.f32.mxu0 %vm223_vm0, %v654_v47  ;;  %v7761_v47 = vld [vmem:[#allocation22_spill] sm:$0xff]  ;;  %v4605_v29 = vunpack.i.l.bf16 %v7762_v43  ;;  %v4791_v49 = vunpack.i.h.bf16 %v6619_v24  ;;  %v4795_v20 = vunpack.i.l.bf16 %v6629_v48  ;;  %v1783_v23 = vsel %vm1762_vm7, %v1750_v53, %v4790_v10  ;;  %v7764_v24 = vld [vmem:[#allocation23_spill] sm:$0xff]  ;;  %v6702_v44 = vpop.permute.xlu1 %4818 }
 0x1f4   : > { %v1718_v0 = vsel %vm1696_vm5, %v1685_v9, %v4781_v17  ;;  %v4436_v2 = vunpack.i.h.bf16 %v7759_v30  ;;  %v1620_v6 = vsel %vm1597_vm2, %v1587_v57, %v4435_v37  ;;  %v4360_v63 = vunpack.i.l.bf16 %v7763_v61 }
 0x1f5   : > { %v4526_v21 = vunpack.i.h.bf16 %v7760_v54  ;;  %v1653_v14 = vsel %vm1630_vm3, %v1620_v6, %v4525_v46  ;;  %v4606_v27 = vunpack.i.h.bf16 %v7762_v43  ;;  %v4800_v1 = vunpack.i.l.bf16 %v6646_v25  ;;  %v7770_v43 = vld [vmem:[#allocation20_spill] sm:$0xff] }
 0x1f6   : > { %2066 = vmatmul.mubr.f32.gmra.mrb[34].mxu0 %v1780_v18  ;;  %v1751_v18 = vsel %vm1729_vm6, %v1718_v0, %v4786_v36  ;;  %v1686_v3 = vsel %vm1663_vm4, %v1653_v14, %v4605_v29  ;;  %v6685_v16 = vpop.permute.xlu0 %4813  ;;  %v4796_v19 = vunpack.i.h.bf16 %v6629_v48  ;;  %v4805_v13 = vunpack.i.l.bf16 %v6656_v28  ;;  %v5427_v36 = vld [vmem:[#allocation2 + $0x142] sm:$0xff] }
 0x1f7   : > { %4150 = vmatprep.mubr.msk.f32.mxu0 %vm223_vm0, %v655_v55  ;;  %v5424_v55 = vld [vmem:[#allocation2 + $0x110] sm:$0xff]  ;;  %v1784_v32 = vsel %vm1762_vm7, %v1751_v18, %v4791_v49  ;;  %v1719_v45 = vsel %vm1696_vm5, %v1686_v3, %v4795_v20  ;;  %v4450_v15 = vunpack.i.l.bf16 %v7765_v35  ;;  %v4361_v22 = vunpack.i.h.bf16 %v7763_v61  ;;  %v6729_v20 = vpop.permute.xlu1 %4828  ;;  %v5429_v61 = vld [vmem:[#allocation2 + $0x138] sm:$0xff]  ;;  %v7772_v14 = vld [vmem:[#allocation40_spill] sm:$0xff] }
 0x1f8   : > { %v1588_v39 = vsel %vm223_vm0, %v5424_v55, %v4341_v58  ;;  %v4530_v5 = vunpack.i.l.bf16 %v7766_v26  ;;  %v4801_v59 = vunpack.i.h.bf16 %v6646_v25  ;;  %v1752_v4 = vsel %vm1729_vm6, %v1719_v45, %v4800_v1  ;;  %v5426_v25 = vld [vmem:[#allocation2 + $0x128] sm:$0xff] }
 0x1f9   : > { %v1621_v56 = vsel %vm1597_vm2, %v1588_v39, %v4436_v2  ;;  %v4810_v38 = vunpack.i.l.bf16 %v6673_v31  ;;  %v4806_v33 = vunpack.i.h.bf16 %v6656_v28  ;;  %v1785_v41 = vsel %vm1762_vm7, %v1752_v4, %v4805_v13  ;;  %v7769_v28 = vld [vmem:[#allocation10_spill] sm:$0xff]  ;;  %v7771_v2 = vld [vmem:[#allocation31_spill] sm:$0xff] }
 0x1fa   : > { %2071 = vmatmul.mubr.f32.gmra.mrb[36].mxu0 %v1781_v50  ;;  %v5425_v50 = vld [vmem:[#allocation2 + $0x120] sm:$0xff]  ;;  %v1654_v48 = vsel %vm1630_vm3, %v1621_v56, %v4526_v21  ;;  %v4451_v17 = vunpack.i.h.bf16 %v7765_v35  ;;  %v6712_v62 = vpop.permute.xlu0 %4823  ;;  %v1590_v34 = vsel %vm223_vm0, %v5426_v25, %v4361_v22  ;;  %v4531_v30 = vunpack.i.h.bf16 %v7766_v26  ;;  %v2238_v45 = vld [vmem:[#allocation2 + $0x9] sm:$0xff]  ;;  %v7773_v35 = vld [vmem:[#allocation11_spill] sm:$0xff] }
 0x1fb   : > { %4151 = vmatprep.mubr.msk.f32.mxu0 %vm223_vm0, %v656_v12  ;;  %v1589_v52 = vsel %vm223_vm0, %v5425_v50, %v4360_v63  ;;  %v7768_v12 = vld [vmem:[#allocation37_spill] sm:$0xff]  ;;  %v1687_v7 = vsel %vm1663_vm4, %v1654_v48, %v4606_v27  ;;  %v4375_v53 = vunpack.i.l.bf16 %v7769_v28  ;;  %v4820_v58 = vunpack.i.l.bf16 %v6702_v44  ;;  %v5430_v50 = vld [vmem:[#allocation2 + $0x15a] sm:$0xff] }
 0x1fc   : > { %v4610_v40 = vunpack.i.l.bf16 %v7768_v12  ;;  %v1720_v8 = vsel %vm1696_vm5, %v1687_v7, %v4796_v19  ;;  %v1622_v10 = vsel %vm1597_vm2, %v1589_v52, %v4450_v15  ;;  %v4611_v42 = vunpack.i.h.bf16 %v7768_v12  ;;  %v5431_v26 = vld [vmem:[#allocation2 + $0x140] sm:$0xff] }
 0x1fd   : > { %v1655_v37 = vsel %vm1630_vm3, %v1622_v10, %v4530_v5  ;;  %v1753_v46 = vsel %vm1729_vm6, %v1720_v8, %v4801_v59  ;;  %v1623_v9 = vsel %vm1597_vm2, %v1590_v34, %v4451_v17  ;;  %v4455_v29 = vunpack.i.l.bf16 %v7770_v43  ;;  %v2269_v10 = vld [vmem:[#allocation2 + $0x2] sm:$0xff]  ;;  %v7775_v34 = vld [vmem:[#allocation30_spill] sm:$0xff] }
 0x1fe   : > { %2076 = vmatmul.mubr.f32.gmra.mrb[38].mxu0 %v1782_v51  ;;  %v4815_v51 = vunpack.i.l.bf16 %v6685_v16  ;;  %v1688_v54 = vsel %vm1663_vm4, %v1655_v37, %v4610_v40  ;;  %v1786_v11 = vsel %vm1762_vm7, %v1753_v46, %v4806_v33  ;;  %v4816_v49 = vunpack.i.h.bf16 %v6685_v16  ;;  %v6739_v55 = vpop.permute.xlu0 %4833  ;;  %v6756_v40 = vpop.permute.xlu1 %4838  ;;  %v7774_v33 = vld [vmem:[#allocation19_spill] sm:$0xff] }
 0x1ff   : > { %4152 = vmatprep.mubr.msk.f32.mxu0 %vm223_vm0, %v7761_v47  ;;  %v4811_v47 = vunpack.i.h.bf16 %v6673_v31  ;;  %v1721_v57 = vsel %vm1696_vm5, %v1688_v54, %v4810_v38  ;;  %v1656_v0 = vsel %vm1630_vm3, %v1623_v9, %v4531_v30  ;;  %v4535_v6 = vunpack.i.l.bf16 %v7771_v2  ;;  %v5428_v31 = vld [vmem:[#allocation2 + $0x152] sm:$0xff] }
 0x200   : > { %v4376_v18 = vunpack.i.h.bf16 %v7769_v28  ;;  %v1591_v63 = vsel %vm223_vm0, %v5429_v61, %v4375_v53  ;;  %v1689_v21 = vsel %vm1663_vm4, %v1656_v0, %v4611_v42  ;;  %v4821_v39 = vunpack.i.h.bf16 %v6702_v44  ;;  %v7776_v53 = vld [vmem:[#allocation39_spill] sm:$0xff] }
 0x201   : > { %v4825_v27 = vunpack.i.l.bf16 %v6712_v62  ;;  %v1722_v1 = vsel %vm1696_vm5, %v1689_v21, %v4811_v47  ;;  %v4456_v16 = vunpack.i.h.bf16 %v7770_v43  ;;  %v1624_v19 = vsel %vm1597_vm2, %v1591_v63, %v4455_v29 }
 0x202   : > { %2081 = vmatmul.mubr.f32.gmra.mrb[40].mxu0 %v1783_v23  ;;  %v1754_v23 = vsel %vm1729_vm6, %v1721_v57, %v4815_v51  ;;  %v1755_v13 = vsel %vm1729_vm6, %v1722_v1, %v4816_v49  ;;  %v4400_v15 = vunpack.i.l.bf16 %v7773_v35  ;;  %v4536_v56 = vunpack.i.h.bf16 %v7771_v2  ;;  %v6766_v17 = vpop.permute.xlu0 %4843  ;;  %v2270_v51 = vld [vmem:[#allocation2 + $0xa] sm:$0xff]  ;;  %v4849_v49 = vpop.permute.xlu1 %4848 }
 0x203   : > { %4153 = vmatprep.mubr.msk.f32.mxu0 %vm223_vm0, %v7764_v24  ;;  %v4615_v24 = vunpack.i.l.bf16 %v7772_v14  ;;  %v1787_v3 = vsel %vm1762_vm7, %v1754_v23, %v4820_v58  ;;  %v1657_v22 = vsel %vm1630_vm3, %v1624_v19, %v4535_v6  ;;  %v1592_v5 = vsel %vm223_vm0, %v5431_v26, %v4376_v18  ;;  %v7777_v18 = vld [vmem:[#allocation13_spill] sm:$0xff] }
 0x204   : > { %v4616_v48 = vunpack.i.h.bf16 %v7772_v14  ;;  %v4830_v12 = vunpack.i.l.bf16 %v6729_v20  ;;  %v4826_v7 = vunpack.i.h.bf16 %v6712_v62  ;;  %v4835_v59 = vunpack.i.l.bf16 %v6739_v55  ;;  %v5432_v62 = vld [vmem:[#allocation2 + $0x150] sm:$0xff] }
 0x205   : > { %v1788_v44 = vsel %vm1762_vm7, %v1755_v13, %v4821_v39  ;;  %v4401_v38 = vunpack.i.h.bf16 %v7773_v35  ;;  %v1625_v8 = vsel %vm1597_vm2, %v1592_v5, %v4456_v16  ;;  %v1593_v25 = vsel %vm223_vm0, %v5432_v62, %v4400_v15  ;;  %v7778_v16 = vld [vmem:[#allocation21_spill] sm:$0xff]  ;;  %v7779_v35 = vld [vmem:[#allocation32_spill] sm:$0xff] }
 0x206   : > { %2086 = vmatmul.mubr.f32.gmra.mrb[42].mxu0 %v1784_v32  ;;  %v2237_v32 = vld [vmem:[#allocation2 + $0x1] sm:$0xff]  ;;  %v4540_v30 = vunpack.i.l.bf16 %v7775_v34  ;;  %v1658_v37 = vsel %vm1630_vm3, %v1625_v8, %v4536_v56  ;;  %v4872_v28 = vpack.i.bf16 %v2270_v51, %v2269_v10  ;;  %v4620_v42 = vunpack.i.l.bf16 %v7776_v53  ;;  %v4854_v14 = vpop.permute.xlu0 %4853  ;;  %v5439_v10 = vld [vmem:[#allocation2 + $0x170] sm:$0xff] }
 0x207   : > { %4154 = vmatprep.mubr.msk.f32.mxu0 %vm223_vm0, %v7767_v60  ;;  %v4867_v52 = vpack.i.bf16 %v2238_v45, %v2237_v32  ;;  %v1690_v60 = vsel %vm1663_vm4, %v1657_v22, %v4615_v24  ;;  %v1691_v54 = vsel %vm1663_vm4, %v1658_v37, %v4616_v48  ;;  %v4831_v46 = vunpack.i.h.bf16 %v6729_v20  ;;  %v5434_v20 = vld [vmem:[#allocation2 + $0x158] sm:$0xff]  ;;  %v5436_v56 = vld [vmem:[#allocation2 + $0x182] sm:$0xff] }
 0x208   : > { %v1723_v4 = vsel %vm1696_vm5, %v1690_v60, %v4825_v27  ;;  %v4840_v58 = vunpack.i.l.bf16 %v6756_v40  ;;  %v1724_v9 = vsel %vm1696_vm5, %v1691_v54, %v4826_v7  ;;  %v4461_v43 = vunpack.i.h.bf16 %v7774_v33  ;;  %v7780_v5 = vld [vmem:[#allocation41_spill] sm:$0xff] }
 0x209   : > { %4868 = vrot.lane.b32.xlu1 %v4867_v52, %s5510_s10  ;;  %v1756_v47 = vsel %vm1729_vm6, %v1723_v4, %v4830_v12  ;;  %v4845_v23 = vunpack.i.l.bf16 %v6766_v17  ;;  %v1594_v0 = vsel %vm223_vm0, %v5434_v20, %v4401_v38  ;;  %v4541_v2 = vunpack.i.h.bf16 %v7775_v34  ;;  %v3614_v20 = vld [vmem:[%s7662_s3 + $0x8] sm:$0xff] }
 0x20a   : > { %2091 = vmatmul.mubr.f32.gmra.mrb[44].mxu0 %v1785_v41  ;;  %v4460_v41 = vunpack.i.l.bf16 %v7774_v33  ;;  %v1789_v57 = vsel %vm1762_vm7, %v1756_v47, %v4835_v59  ;;  %v4415_v61 = vunpack.i.l.bf16 %v7777_v18  ;;  %v4621_v63 = vunpack.i.h.bf16 %v7776_v53  ;;  %v4864_v38 = vpop.permute.xlu0 %4863 }
 0x20b   : > { %4155 = vmatprep.mubr.msk.f32.mxu0 %vm223_vm0, %v5427_v36  ;;  %v5433_v36 = vld [vmem:[#allocation2 + $0x16a] sm:$0xff]  ;;  %v1757_v24 = vsel %vm1729_vm6, %v1724_v9, %v4831_v46  ;;  %v4850_v39 = vunpack.i.l.bf16 %v4849_v49  ;;  %v1627_v1 = vsel %vm1597_vm2, %v1594_v0, %v4461_v43  ;;  %v4465_v19 = vunpack.i.l.bf16 %v7778_v16 }
 0x20c   : > { %v1626_v29 = vsel %vm1597_vm2, %v1593_v25, %v4460_v41  ;;  %v4846_v13 = vunpack.i.h.bf16 %v6766_v17  ;;  %v1660_v45 = vsel %vm1630_vm3, %v1627_v1, %v4541_v2  ;;  %v4545_v15 = vunpack.i.l.bf16 %v7779_v35  ;;  %v5438_v17 = vld [vmem:[#allocation2 + $0x18a] sm:$0xff] }
 0x20d   : > { %4873 = vrot.lane.b32.xlu1 %v4872_v28, %s5511_s11  ;;  %v1659_v6 = vsel %vm1630_vm3, %v1626_v29, %v4540_v30  ;;  %v4416_v22 = vunpack.i.h.bf16 %v7777_v18  ;;  %v1693_v26 = vsel %vm1663_vm4, %v1660_v45, %v4621_v63  ;;  %v4625_v48 = vunpack.i.l.bf16 %v7780_v5  ;;  %v667_v30 = vld [vmem:[#allocation2 + $0x19a] sm:$0xff] }
 0x20e   : > { %2096 = vmatmul.mubr.f32.gmra.mrb[46].mxu0 %v1786_v11  ;;  %v4836_v11 = vunpack.i.h.bf16 %v6739_v55  ;;  %v1692_v21 = vsel %vm1663_vm4, %v1659_v6, %v4620_v42  ;;  %v4841_v55 = vunpack.i.h.bf16 %v6756_v40  ;;  %v4851_v60 = vunpack.i.h.bf16 %v4849_v49  ;;  %v4859_v40 = vpop.permute.xlu1 %4858  ;;  %v3615_v6 = vld [vmem:[%s7662_s3 + $0x10] sm:$0xff]  ;;  %v6845_v18 = vld [vmem:[%s7661_s2] ss:$0 sm:$0xff] }
 0x20f   : > { %4156 = vmatprep.mubr.msk.f32.mxu0 %vm223_vm0, %v5428_v31  ;;  %v5435_v31 = vld [vmem:[#allocation2 + $0x172] sm:$0xff]  ;;  %v4855_v12 = vunpack.i.l.bf16 %v4854_v14  ;;  %v4546_v41 = vunpack.i.h.bf16 %v7779_v35  ;;  %v1596_v51 = vsel %vm223_vm0, %v5439_v10, %v4416_v22  ;;  %v4626_v62 = vunpack.i.h.bf16 %v7780_v5  ;;  %v3626_v10 = vld [vmem:[%s7662_s3 + $0x68] sm:$0xff] }
 0x210   : > { %v1790_v27 = vsel %vm1762_vm7, %v1757_v24, %v4836_v11  ;;  %v1726_v59 = vsel %vm1696_vm5, %v1693_v26, %v4841_v55  ;;  %v4860_v34 = vunpack.i.l.bf16 %v4859_v40  ;;  %v4856_v37 = vunpack.i.h.bf16 %v4854_v14  ;;  %v668_v11 = vld [vmem:[#allocation2 + $0x1a2] sm:$0xff] }
 0x211   : > { %v1759_v33 = vsel %vm1729_vm6, %v1726_v59, %v4846_v13  ;;  %v4861_v47 = vunpack.i.h.bf16 %v4859_v40  ;;  %v7781_v2 = vmov 0.0|0.0   ;;  %v3617_v24 = vld [vmem:[%s7662_s3 + $0x20] sm:$0xff]  ;;  %v3618_v55 = vld [vmem:[%s7662_s3 + $0x28] sm:$0xff]  ;;  %v3624_v40 = vld [vmem:[%s7662_s3 + $0x58] sm:$0xff] }
 0x212   : > { %2101 = vmatmul.mubr.f32.gmra.mrb[48].mxu0 %v1787_v3  ;;  %v1725_v3 = vsel %vm1696_vm5, %v1692_v21, %v4840_v58  ;;  %v1792_v28 = vsel %vm1762_vm7, %v1759_v33, %v4851_v60  ;;  %v4237_v1 = vpack.c.bf16 %v3618_v55, %v3617_v24 }
 0x213   : > { %4157 = vmatprep.mubr.msk.f32.mxu0 %vm223_vm0, %v5430_v50  ;;  %v1758_v32 = vsel %vm1729_vm6, %v1725_v3, %v4845_v23  ;;  %v5437_v50 = vld [vmem:[#allocation2 + $0x168] sm:$0xff]  ;;  %v3613_v23 = vld [vmem:[%s7662_s3] sm:$0xff] }
 0x214   : > { %v1595_v52 = vsel %vm223_vm0, %v5437_v50, %v4415_v61  ;;  %v1791_v7 = vsel %vm1762_vm7, %v1758_v32, %v4850_v39  ;;  %v4231_v0 = vpack.c.bf16 %v3614_v20, %v3613_v23  ;;  %v3619_v39 = vld [vmem:[%s7662_s3 + $0x30] sm:$0xff] }
 0x215   : > { %v1628_v4 = vsel %vm1597_vm2, %v1595_v52, %v4465_v19 }
 0x216   : > { %2106 = vmatmul.mubr.f32.gmra.mrb[50].mxu0 %v1788_v44  ;;  %v4466_v44 = vunpack.i.h.bf16 %v7778_v16  ;;  %v1661_v8 = vsel %vm1630_vm3, %v1628_v4, %v4545_v15  ;;  %4232 = vmatpush1.bf16.msra.mxu1 %v4231_v0  ;;  %v3621_v15 = vld [vmem:[%s7662_s3 + $0x40] sm:$0xff] }
 0x217   : > { %4158 = vmatprep.mubr.msk.f32.mxu0 %vm223_vm0, %v5433_v36  ;;  %v1694_v25 = vsel %vm1663_vm4, %v1661_v8, %v4625_v48  ;;  %v4865_v36 = vunpack.i.l.bf16 %v4864_v38  ;;  %4233 = vmatprep.subr.bf16.mxu1 %v7781_v2  ;;  %v3623_v48 = vld [vmem:[%s7662_s3 + $0x50] sm:$0xff] }
 0x218   : > { %v1727_v53 = vsel %vm1696_vm5, %v1694_v25, %v4855_v12  ;;  %v1629_v42 = vsel %vm1597_vm2, %v1596_v51, %v4466_v44 }
 0x219   : > { %v1662_v54 = vsel %vm1630_vm3, %v1629_v42, %v4546_v41  ;;  %v1760_v58 = vsel %vm1729_vm6, %v1727_v53, %v4860_v34 }
 0x21a   : > { %2111 = vmatmul.mubr.f32.gmra.mrb[52].mxu0 %v1789_v57  ;;  %v1695_v46 = vsel %vm1663_vm4, %v1662_v54, %v4626_v62  ;;  %v4866_v57 = vunpack.i.h.bf16 %v4864_v38  ;;  %v1793_v9 = vsel %vm1762_vm7, %v1760_v58, %v4865_v36  ;;  %v3628_v54 = vld [vmem:[%s7662_s3 + $0x78] sm:$0xff]  ;;  %v3630_v58 = vld [vmem:[%s7662_s3 + $0x88] sm:$0xff] }
 0x21b   : > { %4159 = vmatprep.mubr.msk.f32.mxu0 %vm223_vm0, %v5435_v31  ;;  %v1728_v43 = vsel %vm1696_vm5, %v1695_v46, %v4856_v37  ;;  %v3616_v31 = vld [vmem:[%s7662_s3 + $0x18] sm:$0xff]  ;;  %v3627_v37 = vld [vmem:[%s7662_s3 + $0x70] sm:$0xff] }
 0x21c   : > { %v1761_v29 = vsel %vm1729_vm6, %v1728_v43, %v4861_v47  ;;  %v4234_v61 = vpack.c.bf16 %v3616_v31, %v3615_v6  ;;  %v4252_v46 = vpack.c.bf16 %v3628_v54, %v3627_v37  ;;  %v3629_v47 = vld [vmem:[%s7662_s3 + $0x80] sm:$0xff] }
 0x21d   : > { %v1794_v49 = vsel %vm1762_vm7, %v1761_v29, %v4866_v57  ;;  %v4255_v31 = vpack.c.bf16 %v3630_v58, %v3629_v47 }
 0x21e   : > { %2116 = vmatmul.mubr.f32.gmra.mrb[54].mxu0 %v1790_v27  ;;  %4235 = vmatpush1.bf16.msra.mxu1 %v4234_v61  ;;  %v3620_v27 = vld [vmem:[%s7662_s3 + $0x38] sm:$0xff] }
 0x21f   : > { %4160 = vmatprep.mubr.msk.f32.mxu0 %vm223_vm0, %v5436_v56  ;;  %4236 = vmatprep.subr.bf16.mxu1 %v7781_v2  ;;  %v4240_v32 = vpack.c.bf16 %v3620_v27, %v3619_v39  ;;  %v3622_v56 = vld [vmem:[%s7662_s3 + $0x48] sm:$0xff] }
 0x220   : > { %v4243_v52 = vpack.c.bf16 %v3622_v56, %v3621_v15 }
 0x222   : > { %2121 = vmatmul.mubr.f32.gmra.mrb[56].mxu0 %v1791_v7  ;;  %4238 = vmatpush1.bf16.msra.mxu1 %v4237_v1  ;;  %v4246_v7 = vpack.c.bf16 %v3624_v40, %v3623_v48 }
 0x223   : > { %4161 = vmatprep.mubr.msk.f32.mxu0 %vm223_vm0, %v5438_v17  ;;  %4239 = vmatprep.subr.bf16.mxu1 %v7781_v2  ;;  %v3625_v17 = vld [vmem:[%s7662_s3 + $0x60] sm:$0xff] }
 0x224   : > { %v4249_v25 = vpack.c.bf16 %v3626_v10, %v3625_v17 }
 0x226   : > { %2126 = vmatmul.mubr.f32.gmra.mrb[58].mxu0 %v1792_v28  ;;  %4241 = vmatpush1.bf16.msra.mxu1 %v4240_v32 }
 0x227   : > { %4162 = vmatprep.mubr.msk.f32.mxu0 %vm223_vm0, %v667_v30  ;;  %4242 = vmatprep.subr.bf16.mxu1 %v7781_v2 }
 0x22a   : > { %2131 = vmatmul.mubr.f32.gmra.mrb[60].mxu0 %v1793_v9  ;;  %4244 = vmatpush1.bf16.msra.mxu1 %v4243_v52 }
 0x22b   : > { %4163 = vmatprep.mubr.msk.f32.mxu0 %vm223_vm0, %v668_v11  ;;  %4245 = vmatprep.subr.bf16.mxu1 %v7781_v2 }
 0x22e   : > { %2136 = vmatmul.mubr.f32.gmra.mrb[62].mxu0 %v1794_v49  ;;  %4247 = vmatpush1.bf16.msra.mxu1 %v4246_v7 }
 0x22f   : > { %4248 = vmatprep.subr.bf16.mxu1 %v7781_v2 }
 0x232   : > { %4250 = vmatpush1.bf16.msra.mxu1 %v4249_v25 }
 0x233   : > { %4251 = vmatprep.subr.bf16.mxu1 %v7781_v2 }
 0x236   : > { %4253 = vmatpush1.bf16.msra.mxu1 %v4252_v46 }
 0x237   : > { %4254 = vmatprep.subr.bf16.mxu1 %v7781_v2 }
 0x23a   : > { %4256 = vmatpush1.bf16.msra.mxu1 %v4255_v31 }
 0x285   : > { %v1982_v63 = vpop.f32.mrb[0].mxu0 }
 0x286   : > { %v1983_v21 = vadd.f32 %v6845_v18, %v1982_v63  ;;  %v1984_v14 = vpop.f32.mrb[1].mxu0 }
 0x288   : > { %v2141_v3 = vmax.f32 %v1983_v21, 0.0 }
 0x289   : > { %v1987_v16 = vpop.f32.mrb[2].mxu0 }
 0x28a   : > { %2173 = vst.msk [vmem:[#allocation2 + $0x19] sm:$0xff] %vm223_vm0, %v2141_v3  ;;  %v1988_v19 = vadd.f32 %v6845_v18, %v1987_v16  ;;  %v1989_v13 = vpop.f32.mrb[3].mxu0 }
 0x28c   : > { %v2142_v45 = vmax.f32 %v1988_v19, 0.0 }
 0x28d   : > { %v1992_v35 = vpop.f32.mrb[4].mxu0 }
 0x28e   : > { %2174 = vst.msk [vmem:[#allocation2 + $0x21] sm:$0xff] %vm223_vm0, %v2142_v45  ;;  %v1993_v22 = vadd.f32 %v6845_v18, %v1992_v35  ;;  %v1994_v50 = vpop.f32.mrb[5].mxu0 }
 0x290   : > { %v2143_v26 = vmax.f32 %v1993_v22, 0.0 }
 0x291   : > { %v1997_v5 = vpop.f32.mrb[6].mxu0  ;;  %v2333_v4 = vld [vmem:[#allocation2 + $0x19] sm:$0xff] }
 0x292   : > { %2175 = vst.msk [vmem:[#allocation2 + $0x31] sm:$0xff] %vm223_vm0, %v2143_v26  ;;  %v1998_v60 = vadd.f32 %v6845_v18, %v1997_v5  ;;  %v1999_v12 = vpop.f32.mrb[7].mxu0  ;;  %v6911_v57 = vld [vmem:[#allocation2 + $0x18] sm:$0xff] }
 0x294   : > { %v2144_v59 = vmax.f32 %v1998_v60, 0.0 }
 0x295   : > { %v2002_v44 = vpop.f32.mrb[8].mxu0  ;;  %v2334_v38 = vld [vmem:[#allocation2 + $0x21] sm:$0xff] }
 0x296   : > { %2176 = vst.msk [vmem:[#allocation2 + $0x39] sm:$0xff] %vm223_vm0, %v2144_v59  ;;  %v2003_v33 = vadd.f32 %v6845_v18, %v2002_v44  ;;  %v2004_v41 = vpop.f32.mrb[9].mxu0  ;;  %v4892_v8 = vpack.i.bf16 %v2334_v38, %v2333_v4  ;;  %v2271_v51 = vld [vmem:[#allocation2 + $0x1a] sm:$0xff]  ;;  %v2272_v62 = vld [vmem:[#allocation2 + $0x22] sm:$0xff] }
 0x297   : > { %v4882_v53 = vpack.i.bf16 %v2272_v62, %v2271_v51  ;;  %v6898_v42 = vld [vmem:[#allocation2 + $0x20] sm:$0xff] }
 0x298   : > { %v2145_v34 = vmax.f32 %v2003_v33, 0.0  ;;  %4893 = vrot.lane.b32.xlu1 %v4892_v8, %s5514_s17  ;;  %4878 = vrot.lane.b32.xlu0 %v4892_v8, %s5510_s10  ;;  %v4887_v23 = vpack.i.bf16 %v6898_v42, %v6911_v57 }
 0x299   : > { %v2007_v30 = vpop.f32.mrb[10].mxu0  ;;  %v2241_v29 = vld [vmem:[#allocation2 + $0x31] sm:$0xff] }
 0x29a   : > { %2177 = vst.msk [vmem:[#allocation2 + $0x49] sm:$0xff] %vm223_vm0, %v2145_v34  ;;  %v2008_v36 = vadd.f32 %v6845_v18, %v2007_v30  ;;  %v2009_v28 = vpop.f32.mrb[11].mxu0  ;;  %v6930_v3 = vld [vmem:[#allocation2 + $0x30] sm:$0xff] }
 0x29c   : > { %v2146_v11 = vmax.f32 %v2008_v36, 0.0  ;;  %4883 = vrot.lane.b32.xlu0 %v4882_v53, %s5511_s11 }
 0x29d   : > { %v2012_v9 = vpop.f32.mrb[12].mxu0  ;;  %v2461_v43 = vld [vmem:[#allocation2 + $0x32] sm:$0xff]  ;;  %v6918_v61 = vld [vmem:[#allocation2 + $0x3a] sm:$0xff] }
 0x29e   : > { %v2242_v49 = vld [vmem:[#allocation2 + $0x39] sm:$0xff]  ;;  %2178 = vst.msk [vmem:[#allocation2 + $0x51] sm:$0xff] %vm223_vm0, %v2146_v11  ;;  %v2013_v20 = vadd.f32 %v6845_v18, %v2012_v9  ;;  %v2014_v0 = vpop.f32.mrb[13].mxu0  ;;  %4164 = vmatprep.mubr.msk.f32.mxu1 %vm223_vm0, %v2461_v43  ;;  %v4907_v55 = vpack.i.bf16 %v6918_v61, %v2461_v43 }
 0x29f   : > { %v4902_v6 = vpack.i.bf16 %v2242_v49, %v2241_v29  ;;  %v6926_v39 = vld [vmem:[#allocation2 + $0x38] sm:$0xff] }
 0x2a0   : > { %v2147_v63 = vmax.f32 %v2013_v20, 0.0  ;;  %4888 = vrot.lane.b32.xlu0 %v4887_v23, %s5512_s12  ;;  %v4912_v19 = vpack.i.bf16 %v6926_v39, %v6930_v3 }
 0x2a1   : > { %4903 = vrot.lane.b32.xlu1 %v4902_v6, %s5510_s10  ;;  %v2017_v21 = vpop.f32.mrb[14].mxu0  ;;  %v2243_v50 = vld [vmem:[#allocation2 + $0x49] sm:$0xff] }
 0x2a2   : > { %2179 = vst.msk [vmem:[#allocation2 + $0x61] sm:$0xff] %vm223_vm0, %v2147_v63  ;;  %v2018_v14 = vadd.f32 %v6845_v18, %v2017_v21  ;;  %v2019_v24 = vpop.f32.mrb[15].mxu0  ;;  %v6955_v41 = vld [vmem:[#allocation2 + $0x48] sm:$0xff] }
 0x2a4   : > { %v2148_v27 = vmax.f32 %v2018_v14, 0.0  ;;  %4898 = vrot.lane.b32.xlu0 %v4882_v53, %s5515_s16 }
 0x2a5   : > { %4908 = vrot.lane.b32.xlu1 %v4907_v55, %s5511_s11  ;;  %v2022_v2 = vpop.f32.mrb[16].mxu0  ;;  %v2244_v15 = vld [vmem:[#allocation2 + $0x51] sm:$0xff] }
 0x2a6   : > { %2180 = vst.msk [vmem:[#allocation2 + $0x69] sm:$0xff] %vm223_vm0, %v2148_v27  ;;  %v2023_v1 = vadd.f32 %v6845_v18, %v2022_v2  ;;  %v2024_v16 = vpop.f32.mrb[17].mxu0  ;;  %v4937_v5 = vpack.i.bf16 %v2244_v15, %v2243_v50  ;;  %v6944_v48 = vld [vmem:[#allocation2 + $0x4a] sm:$0xff]  ;;  %v2276_v60 = vld [vmem:[#allocation2 + $0x52] sm:$0xff] }
 0x2a7   : > { %v4942_v44 = vpack.i.bf16 %v2276_v60, %v6944_v48  ;;  %v6951_v4 = vld [vmem:[#allocation2 + $0x50] sm:$0xff] }
 0x2a8   : > { %v2149_v13 = vmax.f32 %v2023_v1, 0.0  ;;  %4918 = vrot.lane.b32.xlu0 %v4902_v6, %s7783_s15  ;;  %v4947_v10 = vpack.i.bf16 %v6951_v4, %v6955_v41 }
 0x2a9   : > { %4913 = vrot.lane.b32.xlu1 %v4912_v19, %s7782_s14  ;;  %v2027_v32 = vpop.f32.mrb[18].mxu0  ;;  %v2245_v34 = vld [vmem:[#allocation2 + $0x61] sm:$0xff] }
 0x2aa   : > { %2181 = vst.msk [vmem:[#allocation2 + $0x79] sm:$0xff] %vm223_vm0, %v2149_v13  ;;  %v2028_v45 = vadd.f32 %v6845_v18, %v2027_v32  ;;  %v2029_v35 = vpop.f32.mrb[19].mxu0  ;;  %v6976_v49 = vld [vmem:[#allocation2 + $0x60] sm:$0xff] }
 0x2ac   : > { %v2150_v56 = vmax.f32 %v2028_v45, 0.0  ;;  %4928 = vrot.lane.b32.xlu0 %v4902_v6, %s5514_s17 }
 0x2ad   : > { %4923 = vrot.lane.b32.xlu1 %v4912_v19, %s5512_s12  ;;  %v2032_v22 = vpop.f32.mrb[20].mxu0  ;;  %v2246_v51 = vld [vmem:[#allocation2 + $0x69] sm:$0xff] }
 0x2ae   : > { %2182 = vst.msk [vmem:[#allocation2 + $0x81] sm:$0xff] %vm223_vm0, %v2150_v56  ;;  %v2033_v52 = vadd.f32 %v6845_v18, %v2032_v22  ;;  %v2034_v26 = vpop.f32.mrb[21].mxu0  ;;  %v4972_v36 = vpack.i.bf16 %v2246_v51, %v2245_v34  ;;  %v6965_v28 = vld [vmem:[#allocation2 + $0x62] sm:$0xff]  ;;  %v2278_v53 = vld [vmem:[#allocation2 + $0x6a] sm:$0xff] }
 0x2af   : > { %v4977_v11 = vpack.i.bf16 %v2278_v53, %v6965_v28  ;;  %v6972_v9 = vld [vmem:[#allocation2 + $0x68] sm:$0xff] }
 0x2b0   : > { %v2151_v12 = vmax.f32 %v2033_v52, 0.0  ;;  %4938 = vrot.lane.b32.xlu0 %v4937_v5, %s5510_s10  ;;  %v4982_v0 = vpack.i.bf16 %v6972_v9, %v6976_v49 }
 0x2b1   : > { %4933 = vrot.lane.b32.xlu1 %v4907_v55, %s5515_s16  ;;  %v2037_v40 = vpop.f32.mrb[22].mxu0  ;;  %v2247_v27 = vld [vmem:[#allocation2 + $0x79] sm:$0xff] }
 0x2b2   : > { %2183 = vst.msk [vmem:[#allocation2 + $0x91] sm:$0xff] %vm223_vm0, %v2151_v12  ;;  %v2038_v7 = vadd.f32 %v6845_v18, %v2037_v40  ;;  %v2039_v59 = vpop.f32.mrb[23].mxu0  ;;  %v7001_v26 = vld [vmem:[#allocation2 + $0x78] sm:$0xff] }
 0x2b4   : > { %v2152_v38 = vmax.f32 %v2038_v7, 0.0  ;;  %4943 = vrot.lane.b32.xlu0 %v4942_v44, %s5511_s11 }
 0x2b5   : > { %4953 = vrot.lane.b32.xlu1 %v4937_v5, %s7783_s15  ;;  %v2042_v33 = vpop.f32.mrb[24].mxu0  ;;  %v2248_v14 = vld [vmem:[#allocation2 + $0x81] sm:$0xff] }
 0x2b6   : > { %2184 = vst.msk [vmem:[#allocation2 + $0x99] sm:$0xff] %vm223_vm0, %v2152_v38  ;;  %v2043_v8 = vadd.f32 %v6845_v18, %v2042_v33  ;;  %v2044_v17 = vpop.f32.mrb[25].mxu0  ;;  %v5007_v16 = vpack.i.bf16 %v2248_v14, %v2247_v27  ;;  %v6990_v19 = vld [vmem:[#allocation2 + $0x7a] sm:$0xff]  ;;  %v2280_v13 = vld [vmem:[#allocation2 + $0x82] sm:$0xff] }
 0x2b7   : > { %v5012_v56 = vpack.i.bf16 %v2280_v13, %v6990_v19  ;;  %v6997_v22 = vld [vmem:[#allocation2 + $0x80] sm:$0xff] }
 0x2b8   : > { %v2153_v62 = vmax.f32 %v2043_v8, 0.0  ;;  %4948 = vrot.lane.b32.xlu0 %v4947_v10, %s7782_s14  ;;  %v5017_v12 = vpack.i.bf16 %v6997_v22, %v7001_v26 }
 0x2b9   : > { %4963 = vrot.lane.b32.xlu1 %v4937_v5, %s5514_s17  ;;  %v2047_v25 = vpop.f32.mrb[26].mxu0 }
 0x2ba   : > { %2185 = vst.msk [vmem:[#allocation2 + $0xa9] sm:$0xff] %vm223_vm0, %v2153_v62  ;;  %v2048_v30 = vadd.f32 %v6845_v18, %v2047_v25  ;;  %v2049_v37 = vpop.f32.mrb[27].mxu0 }
 0x2bc   : > { %v2154_v54 = vmax.f32 %v2048_v30, 0.0  ;;  %4958 = vrot.lane.b32.xlu0 %v4947_v10, %s5512_s12 }
 0x2bd   : > { %4973 = vrot.lane.b32.xlu1 %v4972_v36, %s5510_s10  ;;  %v2052_v46 = vpop.f32.mrb[28].mxu0  ;;  %v2250_v40 = vld [vmem:[#allocation2 + $0x99] sm:$0xff] }
 0x2be   : > { %2186 = vst.msk [vmem:[#allocation2 + $0xb1] sm:$0xff] %vm223_vm0, %v2154_v54  ;;  %v2053_v47 = vadd.f32 %v6845_v18, %v2052_v46  ;;  %v2054_v58 = vpop.f32.mrb[29].mxu0  ;;  %v2281_v17 = vld [vmem:[#allocation2 + $0x92] sm:$0xff]  ;;  %v2282_v10 = vld [vmem:[#allocation2 + $0x9a] sm:$0xff] }
 0x2bf   : > { %v5047_v30 = vpack.i.bf16 %v2282_v10, %v2281_v17  ;;  %v7015_v37 = vld [vmem:[#allocation2 + $0x98] sm:$0xff]  ;;  %v7019_v54 = vld [vmem:[#allocation2 + $0x90] sm:$0xff] }
 0x2c0   : > { %v2155_v43 = vmax.f32 %v2053_v47, 0.0  ;;  %4968 = vrot.lane.b32.xlu0 %v4942_v44, %s5515_s16  ;;  %v2249_v44 = vld [vmem:[#allocation2 + $0x91] sm:$0xff]  ;;  %v5052_v58 = vpack.i.bf16 %v7015_v37, %v7019_v54 }
 0x2c1   : > { %4978 = vrot.lane.b32.xlu1 %v4977_v11, %s5511_s11  ;;  %v2057_v29 = vpop.f32.mrb[30].mxu0  ;;  %v5042_v8 = vpack.i.bf16 %v2250_v40, %v2249_v44 }
 0x2c2   : > { %2187 = vst.msk [vmem:[#allocation2 + $0xc1] sm:$0xff] %vm223_vm0, %v2155_v43  ;;  %v2058_v23 = vadd.f32 %v6845_v18, %v2057_v29  ;;  %v2059_v20 = vpop.f32.mrb[31].mxu0 }
 0x2c4   : > { %v2156_v6 = vmax.f32 %v2058_v23, 0.0  ;;  %4988 = vrot.lane.b32.xlu0 %v4972_v36, %s7783_s15 }
 0x2c5   : > { %4983 = vrot.lane.b32.xlu1 %v4982_v0, %s7782_s14  ;;  %v2062_v31 = vpop.f32.mrb[32].mxu0  ;;  %v2252_v20 = vld [vmem:[#allocation2 + $0xb1] sm:$0xff] }
 0x2c6   : > { %2188 = vst.msk [vmem:[#allocation2 + $0xc9] sm:$0xff] %vm223_vm0, %v2156_v6  ;;  %v2063_v63 = vadd.f32 %v6845_v18, %v2062_v31  ;;  %v2064_v21 = vpop.f32.mrb[33].mxu0  ;;  %v2251_v31 = vld [vmem:[#allocation2 + $0xa9] sm:$0xff] }
 0x2c7   : > { %v5077_v14 = vpack.i.bf16 %v2252_v20, %v2251_v31 }
 0x2c8   : > { %v2157_v24 = vmax.f32 %v2063_v63, 0.0  ;;  %4998 = vrot.lane.b32.xlu0 %v4972_v36, %s5514_s17 }
 0x2c9   : > { %4993 = vrot.lane.b32.xlu1 %v4982_v0, %s5512_s12  ;;  %v2067_v55 = vpop.f32.mrb[34].mxu0  ;;  %v2253_v40 = vld [vmem:[#allocation2 + $0xc1] sm:$0xff] }
 0x2ca   : > { %2189 = vst.msk [vmem:[#allocation2 + $0xd9] sm:$0xff] %vm223_vm0, %v2157_v24  ;;  %v2068_v2 = vadd.f32 %v6845_v18, %v2067_v55  ;;  %v2069_v1 = vpop.f32.mrb[35].mxu0  ;;  %v2283_v24 = vld [vmem:[#allocation2 + $0xaa] sm:$0xff]  ;;  %v2284_v55 = vld [vmem:[#allocation2 + $0xb2] sm:$0xff] }
 0x2cb   : > { %v5082_v13 = vpack.i.bf16 %v2284_v55, %v2283_v24 }
 0x2cc   : > { %v2158_v32 = vmax.f32 %v2068_v2, 0.0  ;;  %5008 = vrot.lane.b32.xlu0 %v5007_v16, %s5510_s10 }
 0x2cd   : > { %5003 = vrot.lane.b32.xlu1 %v4977_v11, %s5515_s16  ;;  %v2072_v45 = vpop.f32.mrb[36].mxu0 }
 0x2ce   : > { %2190 = vst.msk [vmem:[#allocation2 + $0xe1] sm:$0xff] %vm223_vm0, %v2158_v32  ;;  %v2073_v35 = vadd.f32 %v6845_v18, %v2072_v45  ;;  %v2074_v15 = vpop.f32.mrb[37].mxu0  ;;  %v2408_v32 = vld [vmem:[#allocation2 + $0xb0] sm:$0xff] }
 0x2cf   : > { %v2407_v15 = vld [vmem:[#allocation2 + $0xa8] sm:$0xff] }
 0x2d0   : > { %v2159_v50 = vmax.f32 %v2073_v35, 0.0  ;;  %5013 = vrot.lane.b32.xlu0 %v5012_v56, %s5511_s11 }
 0x2d1   : > { %5023 = vrot.lane.b32.xlu1 %v5007_v16, %s7783_s15  ;;  %v2077_v52 = vpop.f32.mrb[38].mxu0 }
 0x2d2   : > { %2191 = vst.msk [vmem:[#allocation2 + $0xf1] sm:$0xff] %vm223_vm0, %v2159_v50  ;;  %v2078_v5 = vadd.f32 %v6845_v18, %v2077_v52  ;;  %v2079_v60 = vpop.f32.mrb[39].mxu0  ;;  %v5087_v52 = vpack.i.bf16 %v2408_v32, %v2407_v15 }
 0x2d4   : > { %v2160_v7 = vmax.f32 %v2078_v5, 0.0  ;;  %5018 = vrot.lane.b32.xlu0 %v5017_v12, %s7782_s14  ;;  %v2254_v5 = vld [vmem:[#allocation2 + $0xc9] sm:$0xff] }
 0x2d5   : > { %5033 = vrot.lane.b32.xlu1 %v5007_v16, %s5514_s17  ;;  %v2082_v59 = vpop.f32.mrb[40].mxu0  ;;  %v5112_v44 = vpack.i.bf16 %v2254_v5, %v2253_v40  ;;  %v2287_v24 = vld [vmem:[#allocation2 + $0xda] sm:$0xff]  ;;  %v2288_v55 = vld [vmem:[#allocation2 + $0xe2] sm:$0xff] }
 0x2d6   : > { %2192 = vst.msk [vmem:[#allocation2 + $0xf9] sm:$0xff] %vm223_vm0, %v2160_v7  ;;  %v2083_v38 = vadd.f32 %v6845_v18, %v2082_v59  ;;  %v2084_v33 = vpop.f32.mrb[41].mxu0 }
 0x2d7   : > { %v2286_v33 = vld [vmem:[#allocation2 + $0xca] sm:$0xff] }
 0x2d8   : > { %v2161_v51 = vmax.f32 %v2083_v38, 0.0  ;;  %5028 = vrot.lane.b32.xlu0 %v5017_v12, %s5512_s12  ;;  %v2285_v38 = vld [vmem:[#allocation2 + $0xc2] sm:$0xff] }
 0x2d9   : > { %5043 = vrot.lane.b32.xlu1 %v5042_v8, %s5510_s10  ;;  %v2087_v62 = vpop.f32.mrb[42].mxu0 }
 0x2da   : > { %2193 = vst.msk [vmem:[#allocation2 + $0x109] sm:$0xff] %vm223_vm0, %v2161_v51  ;;  %v2088_v25 = vadd.f32 %v6845_v18, %v2087_v62  ;;  %v2089_v34 = vpop.f32.mrb[43].mxu0  ;;  %v5117_v62 = vpack.i.bf16 %v2286_v33, %v2285_v38  ;;  %v2206_v38 = vld [vmem:[#allocation2 + $0x8] sm:$0xff] }
 0x2dc   : > { %v2162_v36 = vmax.f32 %v2088_v25, 0.0  ;;  %5038 = vrot.lane.b32.xlu0 %v5012_v56, %s5515_s16  ;;  %v2410_v25 = vld [vmem:[#allocation2 + $0xc8] sm:$0xff] }
 0x2dd   : > { %5048 = vrot.lane.b32.xlu1 %v5047_v30, %s5511_s11  ;;  %v2092_v53 = vpop.f32.mrb[44].mxu0  ;;  %v2290_v5 = vld [vmem:[#allocation2 + $0xfa] sm:$0xff] }
 0x2de   : > { %2194 = vst.msk [vmem:[#allocation2 + $0x111] sm:$0xff] %vm223_vm0, %v2162_v36  ;;  %v2093_v46 = vadd.f32 %v6845_v18, %v2092_v53  ;;  %v2094_v47 = vpop.f32.mrb[45].mxu0  ;;  %v2409_v36 = vld [vmem:[#allocation2 + $0xc0] sm:$0xff] }
 0x2df   : > { %v5122_v47 = vpack.i.bf16 %v2410_v25, %v2409_v36 }
 0x2e0   : > { %v2163_v11 = vmax.f32 %v2093_v46, 0.0  ;;  %5058 = vrot.lane.b32.xlu0 %v5042_v8, %s7783_s15 }
 0x2e1   : > { %5053 = vrot.lane.b32.xlu1 %v5052_v58, %s7782_s14  ;;  %v2097_v43 = vpop.f32.mrb[46].mxu0 }
 0x2e2   : > { %2195 = vst.msk [vmem:[#allocation2 + $0x121] sm:$0xff] %vm223_vm0, %v2163_v11  ;;  %v2098_v29 = vadd.f32 %v6845_v18, %v2097_v43  ;;  %v2099_v23 = vpop.f32.mrb[47].mxu0 }
 0x2e3   : > { %v2256_v23 = vld [vmem:[#allocation2 + $0xe1] sm:$0xff] }
 0x2e4   : > { %v2164_v0 = vmax.f32 %v2098_v29, 0.0  ;;  %5068 = vrot.lane.b32.xlu0 %v5042_v8, %s5514_s17 }
 0x2e5   : > { %5063 = vrot.lane.b32.xlu1 %v5052_v58, %s5512_s12  ;;  %v2102_v6 = vpop.f32.mrb[48].mxu0 }
 0x2e6   : > { %2196 = vst.msk [vmem:[#allocation2 + $0x129] sm:$0xff] %vm223_vm0, %v2164_v0  ;;  %v2103_v63 = vadd.f32 %v6845_v18, %v2102_v6  ;;  %v2104_v21 = vpop.f32.mrb[49].mxu0  ;;  %v2255_v6 = vld [vmem:[#allocation2 + $0xd9] sm:$0xff] }
 0x2e8   : > { %v2165_v27 = vmax.f32 %v2103_v63, 0.0  ;;  %5078 = vrot.lane.b32.xlu0 %v5077_v14, %s5510_s10  ;;  %v4869_v63 = vpop.permute.xlu1 %4868 }
 0x2e9   : > { %5073 = vrot.lane.b32.xlu1 %v5047_v30, %s5515_s16  ;;  %v2107_v2 = vpop.f32.mrb[50].mxu0  ;;  %v4871_v40 = vunpack.i.h.bf16 %v4869_v63 }
 0x2ea   : > { %2197 = vst.msk [vmem:[#allocation2 + $0x139] sm:$0xff] %vm223_vm0, %v2165_v27  ;;  %v2108_v1 = vadd.f32 %v6845_v18, %v2107_v2  ;;  %v2109_v16 = vpop.f32.mrb[51].mxu0  ;;  %v5152_v2 = vpack.i.bf16 %v2288_v55, %v2287_v24  ;;  %v2260_v24 = vld [vmem:[#allocation2 + $0x111] sm:$0xff] }
 0x2eb   : > { %v3390_v25 = vsel %vm223_vm0, %v2206_v38, %v4871_v40 }
 0x2ec   : > { %v2166_v45 = vmax.f32 %v2108_v1, 0.0  ;;  %5083 = vrot.lane.b32.xlu0 %v5082_v13, %s5511_s11  ;;  %v2412_v1 = vld [vmem:[#allocation2 + $0xe0] sm:$0xff]  ;;  %v4874_v16 = vpop.permute.xlu1 %4873 }
 0x2ed   : > { %5093 = vrot.lane.b32.xlu1 %v5077_v14, %s7783_s15  ;;  %v2112_v35 = vpop.f32.mrb[52].mxu0  ;;  %v4875_v33 = vunpack.i.l.bf16 %v4874_v16 }
 0x2ee   : > { %2198 = vst.msk [vmem:[#allocation2 + $0x141] sm:$0xff] %vm223_vm0, %v2166_v45  ;;  %v2113_v56 = vadd.f32 %v6845_v18, %v2112_v35  ;;  %v2114_v50 = vpop.f32.mrb[53].mxu0  ;;  %v2258_v45 = vld [vmem:[#allocation2 + $0xf9] sm:$0xff]  ;;  %v2257_v35 = vld [vmem:[#allocation2 + $0xf1] sm:$0xff] }
 0x2ef   : > { %v5182_v50 = vpack.i.bf16 %v2258_v45, %v2257_v35 }
 0x2f0   : > { %v2167_v60 = vmax.f32 %v2113_v56, 0.0  ;;  %5088 = vrot.lane.b32.xlu0 %v5087_v52, %s7782_s14 }
 0x2f1   : > { %5103 = vrot.lane.b32.xlu1 %v5077_v14, %s5514_s17  ;;  %v2117_v12 = vpop.f32.mrb[54].mxu0  ;;  %v5147_v14 = vpack.i.bf16 %v2256_v23, %v2255_v6 }
 0x2f2   : > { %2199 = vst.msk [vmem:[#allocation2 + $0x151] sm:$0xff] %vm223_vm0, %v2167_v60  ;;  %v2118_v7 = vadd.f32 %v6845_v18, %v2117_v12  ;;  %v2119_v59 = vpop.f32.mrb[55].mxu0  ;;  %v4870_v60 = vunpack.i.l.bf16 %v4869_v63  ;;  %v2205_v12 = vld [vmem:[#allocation2] sm:$0xff] }
 0x2f4   : > { %v2168_v8 = vmax.f32 %v2118_v7, 0.0  ;;  %5098 = vrot.lane.b32.xlu0 %v5087_v52, %s5512_s12  ;;  %v2289_v52 = vld [vmem:[#allocation2 + $0xf2] sm:$0xff] }
 0x2f5   : > { %5113 = vrot.lane.b32.xlu1 %v5112_v44, %s5510_s10  ;;  %v2122_v17 = vpop.f32.mrb[56].mxu0 }
 0x2f6   : > { %2200 = vst.msk [vmem:[#allocation2 + $0x159] sm:$0xff] %vm223_vm0, %v2168_v8  ;;  %v2123_v10 = vadd.f32 %v6845_v18, %v2122_v17  ;;  %v2124_v51 = vpop.f32.mrb[57].mxu0  ;;  %v2414_v8 = vld [vmem:[#allocation2 + $0xf8] sm:$0xff]  ;;  %v3389_v17 = vsel %vm223_vm0, %v2205_v12, %v4870_v60 }
 0x2f7   : > { %v4876_v51 = vunpack.i.h.bf16 %v4874_v16 }
 0x2f8   : > { %v2169_v34 = vmax.f32 %v2123_v10, 0.0  ;;  %5108 = vrot.lane.b32.xlu0 %v5082_v13, %s5515_s16 }
 0x2f9   : > { %5118 = vrot.lane.b32.xlu1 %v5117_v62, %s5511_s11  ;;  %v2127_v30 = vpop.f32.mrb[58].mxu0 }
 0x2fa   : > { %2201 = vst.msk [vmem:[#allocation2 + $0x169] sm:$0xff] %vm223_vm0, %v2169_v34  ;;  %v2128_v53 = vadd.f32 %v6845_v18, %v2127_v30  ;;  %v2129_v46 = vpop.f32.mrb[59].mxu0 }
 0x2fb   : > { %v3421_v46 = vsel %vm1597_vm2, %v3389_v17, %v4875_v33 }
 0x2fc   : > { %v2170_v58 = vmax.f32 %v2128_v53, 0.0  ;;  %5128 = vrot.lane.b32.xlu0 %v5112_v44, %s7783_s15 }
 0x2fd   : > { %5123 = vrot.lane.b32.xlu1 %v5122_v47, %s7782_s14  ;;  %v2132_v11 = vpop.f32.mrb[60].mxu0 }
 0x2fe   : > { %2202 = vst.msk [vmem:[#allocation2 + $0x171] sm:$0xff] %vm223_vm0, %v2170_v58  ;;  %v2133_v43 = vadd.f32 %v6845_v18, %v2132_v11  ;;  %v2134_v29 = vpop.f32.mrb[61].mxu0  ;;  %v3422_v11 = vsel %vm1597_vm2, %v3390_v25, %v4876_v51 }
 0x300   : > { %v2171_v20 = vmax.f32 %v2133_v43, 0.0  ;;  %5138 = vrot.lane.b32.xlu0 %v5112_v44, %s5514_s17  ;;  %v5187_v44 = vpack.i.bf16 %v2290_v5, %v2289_v52  ;;  %v2416_v5 = vld [vmem:[#allocation2 + $0x110] sm:$0xff] }
 0x301   : > { %5133 = vrot.lane.b32.xlu1 %v5122_v47, %s5512_s12  ;;  %v2137_v0 = vpop.f32.mrb[62].mxu0 }
 0x302   : > { %2203 = vst.msk [vmem:[#allocation2 + $0x181] sm:$0xff] %vm223_vm0, %v2171_v20  ;;  %v2138_v31 = vadd.f32 %v6845_v18, %v2137_v0  ;;  %v2139_v21 = vpop.f32.mrb[63].mxu0  ;;  %v2411_v18 = vld [vmem:[#allocation2 + $0xd8] sm:$0xff] }
 0x303   : > { %v5157_v32 = vpack.i.bf16 %v2412_v1, %v2411_v18 }
 0x304   : > { %v2172_v27 = vmax.f32 %v2138_v31, 0.0  ;;  %5148 = vrot.lane.b32.xlu0 %v5147_v14, %s5510_s10 }
 0x305   : > { %5143 = vrot.lane.b32.xlu1 %v5117_v62, %s5515_s16  ;;  %v2413_v62 = vld [vmem:[#allocation2 + $0xf0] sm:$0xff] }
 0x306   : > { %2204 = vst.msk [vmem:[#allocation2 + $0x189] sm:$0xff] %vm223_vm0, %v2172_v27  ;;  %v5192_v53 = vpack.i.bf16 %v2414_v8, %v2413_v62 }
 0x308   : > { %5153 = vrot.lane.b32.xlu0 %v5152_v2, %s5511_s11 }
 0x309   : > { %5163 = vrot.lane.b32.xlu1 %v5147_v14, %s7783_s15 }
 0x30a   : > { %v7066_v13 = vpop.permute.xlu0 %4878  ;;  %v4894_v15 = vpop.permute.xlu1 %4893 }
 0x30b   : > { %v4895_v43 = vunpack.i.l.bf16 %v4894_v15  ;;  %v4896_v29 = vunpack.i.h.bf16 %v4894_v15  ;;  %v4880_v60 = vunpack.i.l.bf16 %v7066_v13  ;;  %v4881_v8 = vunpack.i.h.bf16 %v7066_v13 }
 0x30c   : > { %5158 = vrot.lane.b32.xlu0 %v5157_v32, %s7782_s14 }
 0x30d   : > { %5173 = vrot.lane.b32.xlu1 %v5147_v14, %s5514_s17  ;;  %v3391_v17 = vsel %vm223_vm0, %v6911_v57, %v4880_v60  ;;  %v7150_v60 = vld [vmem:[#allocation2 + $0x120] sm:$0xff] }
 0x30e   : > { %v7070_v56 = vpop.permute.xlu0 %4883 }
 0x30f   : > { %v4885_v33 = vunpack.i.l.bf16 %v7070_v56 }
 0x310   : > { %5168 = vrot.lane.b32.xlu0 %v5157_v32, %s5512_s12 }
 0x311   : > { %5183 = vrot.lane.b32.xlu1 %v5182_v50, %s5510_s10  ;;  %v3423_v25 = vsel %vm1597_vm2, %v3391_v17, %v4885_v33 }
 0x312   : > { %v4889_v59 = vpop.permute.xlu0 %4888 }
 0x313   : > { %v7074_v7 = vpop.permute.xlu1 %4903  ;;  %v4890_v10 = vunpack.i.l.bf16 %v4889_v59  ;;  %v4891_v34 = vunpack.i.h.bf16 %v4889_v59 }
 0x314   : > { %5178 = vrot.lane.b32.xlu0 %v5152_v2, %s5515_s16  ;;  %v2259_v2 = vld [vmem:[#allocation2 + $0x109] sm:$0xff] }
 0x315   : > { %5188 = vrot.lane.b32.xlu1 %v5187_v44, %s5511_s11  ;;  %v3453_v47 = vsel %vm1630_vm3, %v3421_v46, %v4890_v10  ;;  %v3454_v23 = vsel %vm1630_vm3, %v3422_v11, %v4891_v34  ;;  %v5217_v35 = vpack.i.bf16 %v2260_v24, %v2259_v2  ;;  %v7117_v34 = vld [vmem:[#allocation2 + $0x10a] sm:$0xff]  ;;  %v4905_v24 = vunpack.i.l.bf16 %v7074_v7 }
 0x316   : > { %v4899_v36 = vpop.permute.xlu0 %4898  ;;  %v3485_v14 = vsel %vm1663_vm4, %v3453_v47, %v4895_v43  ;;  %v3486_v1 = vsel %vm1663_vm4, %v3454_v23, %v4896_v29 }
 0x317   : > { %v7080_v30 = vpop.permute.xlu1 %4908  ;;  %v4900_v58 = vunpack.i.l.bf16 %v4899_v36  ;;  %v4901_v20 = vunpack.i.h.bf16 %v4899_v36  ;;  %v7119_v36 = vld [vmem:[#allocation2 + $0x112] sm:$0xff] }
 0x318   : > { %5198 = vrot.lane.b32.xlu0 %v5182_v50, %s7783_s15  ;;  %v5247_v29 = vpack.i.bf16 %v7119_v36, %v7117_v34 }
 0x319   : > { %5193 = vrot.lane.b32.xlu1 %v5192_v53, %s7782_s14  ;;  %v3517_v55 = vsel %vm1696_vm5, %v3485_v14, %v4900_v58  ;;  %v3518_v15 = vsel %vm1696_vm5, %v3486_v1, %v4901_v20  ;;  %v2261_v14 = vld [vmem:[#allocation2 + $0x121] sm:$0xff] }
 0x31a   : > { %v4919_v6 = vpop.permute.xlu0 %4918 }
 0x31b   : > { %v4914_v0 = vpop.permute.xlu1 %4913  ;;  %v4920_v21 = vunpack.i.l.bf16 %v4919_v6  ;;  %v4921_v16 = vunpack.i.h.bf16 %v4919_v6 }
 0x31c   : > { %v4916_v31 = vunpack.i.h.bf16 %v4914_v0  ;;  %v4915_v63 = vunpack.i.l.bf16 %v4914_v0  ;;  %5208 = vrot.lane.b32.xlu0 %v5182_v50, %s5514_s17  ;;  %v2415_v50 = vld [vmem:[#allocation2 + $0x108] sm:$0xff] }
 0x31d   : > { %5203 = vrot.lane.b32.xlu1 %v5192_v53, %s5512_s12  ;;  %v5222_v38 = vpack.i.bf16 %v2416_v5, %v2415_v50  ;;  %v2262_v0 = vld [vmem:[#allocation2 + $0x129] sm:$0xff]  ;;  %v2464_v5 = vld [vmem:[#allocation2 + $0x52] sm:$0xff]  ;;  %v4911_v50 = vunpack.i.h.bf16 %v7080_v30 }
 0x31e   : > { %v3549_v27 = vsel %vm1729_vm6, %v3517_v55, %v4915_v63  ;;  %v4929_v32 = vpop.permute.xlu0 %4928  ;;  %v3550_v52 = vsel %vm1729_vm6, %v3518_v15, %v4916_v31  ;;  %v5252_v1 = vpack.i.bf16 %v2262_v0, %v2261_v14 }
 0x31f   : > { %v4924_v18 = vpop.permute.xlu1 %4923  ;;  %v3581_v45 = vsel %vm1762_vm7, %v3549_v27, %v4920_v21  ;;  %v3582_v59 = vsel %vm1762_vm7, %v3550_v52, %v4921_v16  ;;  %v4930_v13 = vunpack.i.l.bf16 %v4929_v32  ;;  %v4931_v46 = vunpack.i.h.bf16 %v4929_v32 }
 0x320   : > { %3792 = vmatmul.mubr.f32.vlgmr.msra.gmra.mrb[0].mxu1 %v3581_v45  ;;  %5218 = vrot.lane.b32.xlu0 %v5217_v35, %s5510_s10  ;;  %v4926_v10 = vunpack.i.h.bf16 %v4924_v18  ;;  %v2418_v45 = vld [vmem:[#allocation2 + $0x128] sm:$0xff] }
 0x321   : > { %5213 = vrot.lane.b32.xlu1 %v5187_v44, %s5515_s16  ;;  %4165 = vmatprep.mubr.msk.f32.mxu1 %vm223_vm0, %v6918_v61  ;;  %v4925_v44 = vunpack.i.l.bf16 %v4924_v18  ;;  %v4886_v61 = vunpack.i.h.bf16 %v7070_v56  ;;  %v3392_v56 = vsel %vm223_vm0, %v6898_v42, %v4881_v8  ;;  %v4910_v18 = vunpack.i.l.bf16 %v7080_v30  ;;  %v7161_v30 = vld [vmem:[#allocation2 + $0x12a] sm:$0xff] }
 0x322   : > { %v7102_v40 = vpop.permute.xlu0 %4938  ;;  %v5257_v8 = vpack.i.bf16 %v2418_v45, %v7150_v60 }
 0x323   : > { %v4934_v12 = vpop.permute.xlu1 %4933  ;;  %v3455_v53 = vsel %vm1630_vm3, %v3423_v25, %v4925_v44  ;;  %v3424_v57 = vsel %vm1597_vm2, %v3392_v56, %v4886_v61  ;;  %v7159_v61 = vld [vmem:[#allocation2 + $0x122] sm:$0xff] }
 0x324   : > { %3797 = vmatmul.mubr.f32.gmra.mrb[2].mxu1 %v3582_v59  ;;  %5223 = vrot.lane.b32.xlu0 %v5222_v38, %s7782_s14  ;;  %v3456_v47 = vsel %vm1630_vm3, %v3424_v57, %v4926_v10  ;;  %v4936_v58 = vunpack.i.h.bf16 %v4934_v12  ;;  %v3487_v42 = vsel %vm1663_vm4, %v3455_v53, %v4930_v13  ;;  %v5277_v57 = vpack.i.bf16 %v7161_v30, %v7159_v61 }
 0x325   : > { %5228 = vrot.lane.b32.xlu1 %v5217_v35, %s7783_s15  ;;  %4166 = vmatprep.mubr.msk.f32.mxu1 %vm223_vm0, %v6944_v48  ;;  %v4935_v48 = vunpack.i.l.bf16 %v4934_v12  ;;  %v3488_v63 = vsel %vm1663_vm4, %v3456_v47, %v4931_v46  ;;  %v3393_v12 = vsel %vm223_vm0, %v6930_v3, %v4905_v24  ;;  %v7185_v24 = vld [vmem:[#allocation2 + $0x140] sm:$0xff] }
 0x326   : > { %v7114_v62 = vpop.permute.xlu0 %4943  ;;  %v3520_v16 = vsel %vm1696_vm5, %v3488_v63, %v4936_v58  ;;  %v3425_v44 = vsel %vm1597_vm2, %v3393_v12, %v4910_v18 }
 0x327   : > { %v4954_v51 = vpop.permute.xlu1 %4953  ;;  %v3519_v31 = vsel %vm1696_vm5, %v3487_v42, %v4935_v48  ;;  %v2263_v42 = vld [vmem:[#allocation2 + $0x139] sm:$0xff] }
 0x328   : > { %5233 = vrot.lane.b32.xlu0 %v5222_v38, %s5512_s12  ;;  %v4955_v6 = vunpack.i.l.bf16 %v4954_v51  ;;  %v4956_v15 = vunpack.i.h.bf16 %v4954_v51 }
 0x329   : > { %5238 = vrot.lane.b32.xlu1 %v5217_v35, %s5514_s17  ;;  %v4906_v35 = vunpack.i.h.bf16 %v7074_v7 }
 0x32a   : > { %v4949_v43 = vpop.permute.xlu0 %4948 }
 0x32b   : > { %v7128_v11 = vpop.permute.xlu1 %4963  ;;  %v4951_v23 = vunpack.i.h.bf16 %v4949_v43  ;;  %v4950_v20 = vunpack.i.l.bf16 %v4949_v43  ;;  %v3394_v17 = vsel %vm223_vm0, %v6926_v39, %v4906_v35  ;;  %v4945_v35 = vunpack.i.l.bf16 %v7114_v62 }
 0x32c   : > { %5243 = vrot.lane.b32.xlu0 %v5247_v29, %s5515_s16  ;;  %v3426_v51 = vsel %vm1597_vm2, %v3394_v17, %v4911_v50  ;;  %v4965_v25 = vunpack.i.l.bf16 %v7128_v11  ;;  %v4966_v13 = vunpack.i.h.bf16 %v7128_v11 }
 0x32d   : > { %5248 = vrot.lane.b32.xlu1 %v5247_v29, %s5511_s11  ;;  %v3551_v21 = vsel %vm1729_vm6, %v3519_v31, %v4950_v20  ;;  %v3552_v32 = vsel %vm1729_vm6, %v3520_v16, %v4951_v23  ;;  %v2264_v29 = vld [vmem:[#allocation2 + $0x141] sm:$0xff] }
 0x32e   : > { %v4959_v27 = vpop.permute.xlu0 %4958  ;;  %v3583_v2 = vsel %vm1762_vm7, %v3551_v21, %v4955_v6  ;;  %v3584_v33 = vsel %vm1762_vm7, %v3552_v32, %v4956_v15  ;;  %v5287_v63 = vpack.i.bf16 %v2264_v29, %v2263_v42  ;;  %v4941_v15 = vunpack.i.h.bf16 %v7102_v40 }
 0x32f   : > { %v7139_v55 = vpop.permute.xlu1 %4973  ;;  %3802 = vmatmul.mubr.f32.gmra.mrb[4].mxu1 %v3583_v2  ;;  %v4960_v52 = vunpack.i.l.bf16 %v4959_v27  ;;  %v4961_v59 = vunpack.i.h.bf16 %v4959_v27  ;;  %v2466_v27 = vld [vmem:[#allocation2 + $0x6a] sm:$0xff]  ;;  %v7190_v2 = vld [vmem:[#allocation2 + $0x138] sm:$0xff] }
 0x330   : > { %5263 = vrot.lane.b32.xlu0 %v5252_v1, %s7783_s15  ;;  %4167 = vmatprep.mubr.msk.f32.mxu1 %vm223_vm0, %v2464_v5  ;;  %v5292_v45 = vpack.i.bf16 %v7185_v24, %v7190_v2  ;;  %v4946_v5 = vunpack.i.h.bf16 %v7114_v62  ;;  %v3396_v62 = vsel %vm223_vm0, %v6951_v4, %v4941_v15  ;;  %v4975_v29 = vunpack.i.l.bf16 %v7139_v55 }
 0x331   : > { %5253 = vrot.lane.b32.xlu1 %v5252_v1, %s5510_s10  ;;  %v3457_v3 = vsel %vm1630_vm3, %v3425_v44, %v4960_v52  ;;  %v3458_v56 = vsel %vm1630_vm3, %v3426_v51, %v4961_v59  ;;  %v7212_v44 = vld [vmem:[#allocation2 + $0x142] sm:$0xff] }
 0x332   : > { %v4969_v7 = vpop.permute.xlu0 %4968  ;;  %v3489_v43 = vsel %vm1663_vm4, %v3457_v3, %v4965_v25  ;;  %v3490_v23 = vsel %vm1663_vm4, %v3458_v56, %v4966_v13 }
 0x333   : > { %v7154_v38 = vpop.permute.xlu1 %4978  ;;  %3807 = vmatmul.mubr.f32.gmra.mrb[6].mxu1 %v3584_v33  ;;  %v4970_v10 = vunpack.i.l.bf16 %v4969_v7  ;;  %v4971_v53 = vunpack.i.h.bf16 %v4969_v7 }
 0x334   : > { %5268 = vrot.lane.b32.xlu0 %v5257_v8, %s5512_s12  ;;  %4168 = vmatprep.mubr.msk.f32.mxu1 %vm223_vm0, %v6965_v28 }
 0x335   : > { %5258 = vrot.lane.b32.xlu1 %v5257_v8, %s7782_s14  ;;  %v3521_v28 = vsel %vm1696_vm5, %v3489_v43, %v4970_v10  ;;  %v3522_v21 = vsel %vm1696_vm5, %v3490_v23, %v4971_v53  ;;  %v7210_v8 = vld [vmem:[#allocation2 + $0x13a] sm:$0xff]  ;;  %v2265_v43 = vld [vmem:[#allocation2 + $0x151] sm:$0xff] }
 0x336   : > { %v4989_v48 = vpop.permute.xlu0 %4988  ;;  %v5317_v56 = vpack.i.bf16 %v7212_v44, %v7210_v8 }
 0x337   : > { %v4984_v39 = vpop.permute.xlu1 %4983  ;;  %v4990_v58 = vunpack.i.l.bf16 %v4989_v48  ;;  %v4991_v20 = vunpack.i.h.bf16 %v4989_v48  ;;  %v2266_v48 = vld [vmem:[#allocation2 + $0x159] sm:$0xff] }
 0x338   : > { %v4986_v46 = vunpack.i.h.bf16 %v4984_v39  ;;  %v4985_v47 = vunpack.i.l.bf16 %v4984_v39  ;;  %5278 = vrot.lane.b32.xlu0 %v5277_v57, %s5515_s16  ;;  %v5322_v23 = vpack.i.bf16 %v2266_v48, %v2265_v43  ;;  %v2267_v48 = vld [vmem:[#allocation2 + $0x169] sm:$0xff] }
 0x339   : > { %5273 = vrot.lane.b32.xlu1 %v5252_v1, %s5514_s17  ;;  %v4940_v1 = vunpack.i.l.bf16 %v7102_v40 }
 0x33a   : > { %v3553_v11 = vsel %vm1729_vm6, %v3521_v28, %v4985_v47  ;;  %v4999_v6 = vpop.permute.xlu0 %4998  ;;  %v3554_v14 = vsel %vm1729_vm6, %v3522_v21, %v4986_v46 }
 0x33b   : > { %v4994_v0 = vpop.permute.xlu1 %4993  ;;  %v3585_v31 = vsel %vm1762_vm7, %v3553_v11, %v4990_v58  ;;  %v3586_v32 = vsel %vm1762_vm7, %v3554_v14, %v4991_v20  ;;  %v3395_v50 = vsel %vm223_vm0, %v6955_v41, %v4940_v1  ;;  %v5000_v40 = vunpack.i.l.bf16 %v4999_v6 }
 0x33c   : > { %3812 = vmatmul.mubr.f32.gmra.mrb[8].mxu1 %v3585_v31  ;;  %5288 = vrot.lane.b32.xlu0 %v5287_v63, %s5510_s10  ;;  %v4995_v52 = vunpack.i.l.bf16 %v4994_v0  ;;  %v4996_v12 = vunpack.i.h.bf16 %v4994_v0  ;;  %v3427_v33 = vsel %vm1597_vm2, %v3395_v50, %v4945_v35  ;;  %v3428_v41 = vsel %vm1597_vm2, %v3396_v62, %v4946_v5  ;;  %v7238_v31 = vld [vmem:[#allocation2 + $0x158] sm:$0xff] }
 0x33d   : > { %5283 = vrot.lane.b32.xlu1 %v5277_v57, %s5511_s11  ;;  %4169 = vmatprep.mubr.msk.f32.mxu1 %vm223_vm0, %v2466_v27  ;;  %v5001_v3 = vunpack.i.h.bf16 %v4999_v6  ;;  %v4980_v0 = vunpack.i.l.bf16 %v7154_v38  ;;  %v2468_v27 = vld [vmem:[#allocation2 + $0x82] sm:$0xff]  ;;  %v4981_v1 = vunpack.i.h.bf16 %v7154_v38  ;;  %v7255_v38 = vld [vmem:[#allocation2 + $0x152] sm:$0xff]  ;;  %v7257_v50 = vld [vmem:[#allocation2 + $0x15a] sm:$0xff] }
 0x33e   : > { %v7193_v18 = vpop.permute.xlu0 %5008  ;;  %v3459_v17 = vsel %vm1630_vm3, %v3427_v33, %v4995_v52  ;;  %v3460_v10 = vsel %vm1630_vm3, %v3428_v41, %v4996_v12  ;;  %v2469_v33 = vld [vmem:[#allocation2 + $0x92] sm:$0xff] }
 0x33f   : > { %v5004_v16 = vpop.permute.xlu1 %5003  ;;  %v3491_v4 = vsel %vm1663_vm4, %v3459_v17, %v5000_v40  ;;  %v3492_v47 = vsel %vm1663_vm4, %v3460_v10, %v5001_v3  ;;  %v5347_v10 = vpack.i.bf16 %v7257_v50, %v7255_v38 }
 0x340   : > { %3817 = vmatmul.mubr.f32.gmra.mrb[10].mxu1 %v3586_v32  ;;  %5298 = vrot.lane.b32.xlu0 %v5287_v63, %s7783_s15  ;;  %v5006_v51 = vunpack.i.h.bf16 %v5004_v16  ;;  %v3397_v32 = vsel %vm223_vm0, %v6976_v49, %v4975_v29 }
 0x341   : > { %5293 = vrot.lane.b32.xlu1 %v5292_v45, %s7782_s14  ;;  %4170 = vmatprep.mubr.msk.f32.mxu1 %vm223_vm0, %v6990_v19  ;;  %v5005_v19 = vunpack.i.l.bf16 %v5004_v16  ;;  %v7245_v16 = vld [vmem:[#allocation2 + $0x150] sm:$0xff]  ;;  %v3429_v5 = vsel %vm1597_vm2, %v3397_v32, %v4980_v0  ;;  %v7285_v0 = vld [vmem:[#allocation2 + $0x168] sm:$0xff]  ;;  %v5011_v32 = vunpack.i.h.bf16 %v7193_v18 }
 0x342   : > { %v7207_v7 = vpop.permute.xlu0 %5013  ;;  %v3524_v20 = vsel %vm1696_vm5, %v3492_v47, %v5006_v51  ;;  %v5327_v52 = vpack.i.bf16 %v7238_v31, %v7245_v16 }
 0x343   : > { %v5024_v59 = vpop.permute.xlu1 %5023  ;;  %v3523_v46 = vsel %vm1696_vm5, %v3491_v4, %v5005_v19 }
 0x344   : > { %5303 = vrot.lane.b32.xlu0 %v5292_v45, %s5512_s12  ;;  %v5025_v57 = vunpack.i.l.bf16 %v5024_v59  ;;  %v5026_v21 = vunpack.i.h.bf16 %v5024_v59 }
 0x345   : > { %5308 = vrot.lane.b32.xlu1 %v5287_v63, %s5514_s17  ;;  %v4976_v63 = vunpack.i.h.bf16 %v7139_v55 }
 0x346   : > { %v5019_v13 = vpop.permute.xlu0 %5018 }
 0x347   : > { %v7221_v25 = vpop.permute.xlu1 %5033  ;;  %v5021_v53 = vunpack.i.h.bf16 %v5019_v13  ;;  %v5020_v39 = vunpack.i.l.bf16 %v5019_v13  ;;  %v3398_v12 = vsel %vm223_vm0, %v6972_v9, %v4976_v63 }
 0x348   : > { %5313 = vrot.lane.b32.xlu0 %v5317_v56, %s5515_s16  ;;  %v3430_v40 = vsel %vm1597_vm2, %v3398_v12, %v4981_v1  ;;  %v5035_v62 = vunpack.i.l.bf16 %v7221_v25  ;;  %v5036_v17 = vunpack.i.h.bf16 %v7221_v25  ;;  %v5015_v1 = vunpack.i.l.bf16 %v7207_v7 }
 0x349   : > { %5318 = vrot.lane.b32.xlu1 %v5317_v56, %s5511_s11  ;;  %v3555_v58 = vsel %vm1729_vm6, %v3523_v46, %v5020_v39  ;;  %v3556_v6 = vsel %vm1729_vm6, %v3524_v20, %v5021_v53  ;;  %v2268_v53 = vld [vmem:[#allocation2 + $0x171] sm:$0xff]  ;;  %v2470_v20 = vld [vmem:[#allocation2 + $0x9a] sm:$0xff] }
 0x34a   : > { %v5029_v11 = vpop.permute.xlu0 %5028  ;;  %v3587_v42 = vsel %vm1762_vm7, %v3555_v58, %v5025_v57  ;;  %v3588_v15 = vsel %vm1762_vm7, %v3556_v6, %v5026_v21  ;;  %v5357_v29 = vpack.i.bf16 %v2268_v53, %v2267_v48  ;;  %v5010_v6 = vunpack.i.l.bf16 %v7193_v18  ;;  %v2458_v53 = vld [vmem:[#allocation2 + $0x189] sm:$0xff]  ;;  %v2425_v48 = vld [vmem:[#allocation2 + $0x180] sm:$0xff] }
 0x34b   : > { %v7232_v28 = vpop.permute.xlu1 %5043  ;;  %3822 = vmatmul.mubr.f32.gmra.mrb[12].mxu1 %v3587_v42  ;;  %v5030_v14 = vunpack.i.l.bf16 %v5029_v11  ;;  %v5031_v45 = vunpack.i.h.bf16 %v5029_v11 }
 0x34c   : > { %5333 = vrot.lane.b32.xlu0 %v5322_v23, %s7783_s15  ;;  %4171 = vmatprep.mubr.msk.f32.mxu1 %vm223_vm0, %v2468_v27 }
 0x34d   : > { %5323 = vrot.lane.b32.xlu1 %v5322_v23, %s5510_s10  ;;  %v3461_v49 = vsel %vm1630_vm3, %v3429_v5, %v5030_v14  ;;  %v3462_v19 = vsel %vm1630_vm3, %v3430_v40, %v5031_v45  ;;  %v7306_v40 = vld [vmem:[#allocation2 + $0x172] sm:$0xff] }
 0x34e   : > { %v5039_v55 = vpop.permute.xlu0 %5038  ;;  %v3493_v4 = vsel %vm1663_vm4, %v3461_v49, %v5035_v62  ;;  %v3494_v57 = vsel %vm1663_vm4, %v3462_v19, %v5036_v17  ;;  %v3400_v62 = vsel %vm223_vm0, %v6997_v22, %v5011_v32  ;;  %v2426_v22 = vld [vmem:[#allocation2 + $0x188] sm:$0xff] }
 0x34f   : > { %v7249_v35 = vpop.permute.xlu1 %5048  ;;  %3827 = vmatmul.mubr.f32.gmra.mrb[14].mxu1 %v3588_v15  ;;  %v5040_v59 = vunpack.i.l.bf16 %v5039_v55  ;;  %v5041_v41 = vunpack.i.h.bf16 %v5039_v55  ;;  %v2471_v55 = vld [vmem:[#allocation2 + $0xaa] sm:$0xff]  ;;  %v5016_v15 = vunpack.i.h.bf16 %v7207_v7 }
 0x350   : > { %5338 = vrot.lane.b32.xlu0 %v5327_v52, %s5512_s12  ;;  %4172 = vmatprep.mubr.msk.f32.mxu1 %vm223_vm0, %v2469_v33  ;;  %v7304_v33 = vld [vmem:[#allocation2 + $0x16a] sm:$0xff] }
 0x351   : > { %5328 = vrot.lane.b32.xlu1 %v5327_v52, %s7782_s14  ;;  %v3525_v25 = vsel %vm1696_vm5, %v3493_v4, %v5040_v59  ;;  %v3526_v11 = vsel %vm1696_vm5, %v3494_v57, %v5041_v41  ;;  %v3399_v52 = vsel %vm223_vm0, %v7001_v26, %v5010_v6  ;;  %v3432_v26 = vsel %vm1597_vm2, %v3400_v62, %v5016_v15  ;;  %v2427_v15 = vld [vmem:[#allocation2 + $0x198] sm:$0xff] }
 0x352   : > { %v5059_v3 = vpop.permute.xlu0 %5058  ;;  %v3431_v59 = vsel %vm1597_vm2, %v3399_v52, %v5015_v1 }
 0x353   : > { %v5054_v9 = vpop.permute.xlu1 %5053  ;;  %v5060_v56 = vunpack.i.l.bf16 %v5059_v3  ;;  %v5061_v46 = vunpack.i.h.bf16 %v5059_v3 }
 0x354   : > { %v5056_v51 = vunpack.i.h.bf16 %v5054_v9  ;;  %v5055_v13 = vunpack.i.l.bf16 %v5054_v9  ;;  %5348 = vrot.lane.b32.xlu0 %v5347_v10, %s5515_s16 }
 0x355   : > { %5343 = vrot.lane.b32.xlu1 %v5322_v23, %s5514_s17  ;;  %v7280_v23 = vld [vmem:[#allocation2 + $0x170] sm:$0xff] }
 0x356   : > { %v3557_v39 = vsel %vm1729_vm6, %v3525_v25, %v5055_v13  ;;  %v5069_v58 = vpop.permute.xlu0 %5068  ;;  %v3558_v42 = vsel %vm1729_vm6, %v3526_v11, %v5056_v51  ;;  %v5362_v27 = vpack.i.bf16 %v7280_v23, %v7285_v0  ;;  %v5387_v51 = vpack.i.bf16 %v7306_v40, %v7304_v33 }
 0x357   : > { %v5064_v47 = vpop.permute.xlu1 %5063  ;;  %v3589_v43 = vsel %vm1762_vm7, %v3557_v39, %v5060_v56  ;;  %v3590_v14 = vsel %vm1762_vm7, %v3558_v42, %v5061_v46  ;;  %v5070_v18 = vunpack.i.l.bf16 %v5069_v58  ;;  %v5071_v19 = vunpack.i.h.bf16 %v5069_v58  ;;  %v2457_v58 = vld [vmem:[#allocation2 + $0x181] sm:$0xff] }
 0x358   : > { %3832 = vmatmul.mubr.f32.gmra.mrb[16].mxu1 %v3589_v43  ;;  %5358 = vrot.lane.b32.xlu0 %v5357_v29, %s5510_s10  ;;  %v5065_v45 = vunpack.i.l.bf16 %v5064_v47  ;;  %v5066_v5 = vunpack.i.h.bf16 %v5064_v47  ;;  %v5392_v47 = vpack.i.bf16 %v2426_v22, %v2425_v48  ;;  %v5045_v43 = vunpack.i.l.bf16 %v7232_v28 }
 0x359   : > { %5353 = vrot.lane.b32.xlu1 %v5347_v10, %s5511_s11  ;;  %4173 = vmatprep.mubr.msk.f32.mxu1 %vm223_vm0, %v2470_v20  ;;  %v5397_v20 = vpack.i.bf16 %v2458_v53, %v2457_v58 }
 0x35a   : > { %v7288_v21 = vpop.permute.xlu0 %5078  ;;  %v3463_v7 = vsel %vm1630_vm3, %v3431_v59, %v5065_v45  ;;  %v3464_v41 = vsel %vm1630_vm3, %v3432_v26, %v5066_v5  ;;  %v2472_v45 = vld [vmem:[#allocation2 + $0xb2] sm:$0xff]  ;;  %v3401_v52 = vsel %vm223_vm0, %v7019_v54, %v5045_v43  ;;  %v2473_v54 = vld [vmem:[#allocation2 + $0xc2] sm:$0xff]  ;;  %v7364_v43 = vld [vmem:[#allocation2 + $0x18a] sm:$0xff] }
 0x35b   : > { %v5074_v63 = vpop.permute.xlu1 %5073  ;;  %v3495_v13 = vsel %vm1663_vm4, %v3463_v7, %v5070_v18  ;;  %v3496_v57 = vsel %vm1663_vm4, %v3464_v41, %v5071_v19 }
 0x35c   : > { %3837 = vmatmul.mubr.f32.gmra.mrb[18].mxu1 %v3590_v14  ;;  %5368 = vrot.lane.b32.xlu0 %v5357_v29, %s7783_s15  ;;  %v5075_v17 = vunpack.i.l.bf16 %v5074_v63  ;;  %v5076_v9 = vunpack.i.h.bf16 %v5074_v63  ;;  %v5050_v63 = vunpack.i.l.bf16 %v7249_v35 }
 0x35d   : > { %5363 = vrot.lane.b32.xlu1 %v5362_v27, %s7782_s14  ;;  %4174 = vmatprep.mubr.msk.f32.mxu1 %vm223_vm0, %v2471_v55  ;;  %v5051_v55 = vunpack.i.h.bf16 %v7249_v35 }
 0x35e   : > { %v7301_v49 = vpop.permute.xlu0 %5083  ;;  %v3527_v39 = vsel %vm1696_vm5, %v3495_v13, %v5075_v17  ;;  %v3528_v6 = vsel %vm1696_vm5, %v3496_v57, %v5076_v9 }
 0x35f   : > { %v5094_v12 = vpop.permute.xlu1 %5093 }
 0x360   : > { %5373 = vrot.lane.b32.xlu0 %v5362_v27, %s5512_s12  ;;  %v5095_v25 = vunpack.i.l.bf16 %v5094_v12  ;;  %v5046_v27 = vunpack.i.h.bf16 %v7232_v28  ;;  %v5096_v1 = vunpack.i.h.bf16 %v5094_v12  ;;  %v3433_v12 = vsel %vm1597_vm2, %v3401_v52, %v5050_v63  ;;  %v2219_v52 = vld [vmem:[#allocation2 + $0xa8] sm:$0xff] }
 0x361   : > { %5378 = vrot.lane.b32.xlu1 %v5357_v29, %s5514_s17 }
 0x362   : > { %v5089_v10 = vpop.permute.xlu0 %5088  ;;  %v3402_v62 = vsel %vm223_vm0, %v7015_v37, %v5046_v27 }
 0x363   : > { %v7315_v3 = vpop.permute.xlu1 %5103  ;;  %v5091_v56 = vunpack.i.h.bf16 %v5089_v10  ;;  %v5090_v4 = vunpack.i.l.bf16 %v5089_v10  ;;  %v3434_v17 = vsel %vm1597_vm2, %v3402_v62, %v5051_v55  ;;  %v5081_v55 = vunpack.i.h.bf16 %v7288_v21 }
 0x364   : > { %5383 = vrot.lane.b32.xlu0 %v5387_v51, %s5515_s16  ;;  %v5105_v26 = vunpack.i.l.bf16 %v7315_v3  ;;  %v5106_v19 = vunpack.i.h.bf16 %v7315_v3 }
 0x365   : > { %5388 = vrot.lane.b32.xlu1 %v5387_v51, %s5511_s11  ;;  %v3559_v46 = vsel %vm1729_vm6, %v3527_v39, %v5090_v4  ;;  %v3560_v14 = vsel %vm1729_vm6, %v3528_v6, %v5091_v56  ;;  %v7353_v56 = vld [vmem:[#allocation2 + $0x182] sm:$0xff]  ;;  %v5080_v6 = vunpack.i.l.bf16 %v7288_v21 }
 0x366   : > { %v5099_v11 = vpop.permute.xlu0 %5098  ;;  %v3591_v42 = vsel %vm1762_vm7, %v3559_v46, %v5095_v25  ;;  %v3592_v28 = vsel %vm1762_vm7, %v3560_v14, %v5096_v1  ;;  %v2459_v25 = vld [vmem:[#allocation2 + $0x199] sm:$0xff]  ;;  %v2460_v1 = vld [vmem:[#allocation2 + $0x1a1] sm:$0xff] }
 0x367   : > { %v7326_v29 = vpop.permute.xlu1 %5113  ;;  %3842 = vmatmul.mubr.f32.gmra.mrb[20].mxu1 %v3591_v42  ;;  %v5100_v32 = vunpack.i.l.bf16 %v5099_v11  ;;  %v5101_v5 = vunpack.i.h.bf16 %v5099_v11  ;;  %v2474_v42 = vld [vmem:[#allocation2 + $0xca] sm:$0xff] }
 0x368   : > { %5398 = vrot.lane.b32.xlu0 %v5397_v20, %s7783_s15  ;;  %4175 = vmatprep.mubr.msk.f32.mxu1 %vm223_vm0, %v2472_v45  ;;  %v2475_v45 = vld [vmem:[#allocation2 + $0xda] sm:$0xff] }
 0x369   : > { %5393 = vrot.lane.b32.xlu1 %v5392_v47, %s7782_s14  ;;  %v3465_v35 = vsel %vm1630_vm3, %v3433_v12, %v5100_v32  ;;  %v3466_v41 = vsel %vm1630_vm3, %v3434_v17, %v5101_v5  ;;  %v5085_v32 = vunpack.i.l.bf16 %v7301_v49  ;;  %v5086_v5 = vunpack.i.h.bf16 %v7301_v49 }
 0x36a   : > { %v5109_v18 = vpop.permute.xlu0 %5108  ;;  %v3497_v4 = vsel %vm1663_vm4, %v3465_v35, %v5105_v26  ;;  %v3498_v39 = vsel %vm1663_vm4, %v3466_v41, %v5106_v19  ;;  %v2220_v35 = vld [vmem:[#allocation2 + $0xb0] sm:$0xff] }
 0x36b   : > { %v7339_v59 = vpop.permute.xlu1 %5118  ;;  %3847 = vmatmul.mubr.f32.gmra.mrb[22].mxu1 %v3592_v28  ;;  %v5110_v7 = vunpack.i.l.bf16 %v5109_v18  ;;  %v5111_v9 = vunpack.i.h.bf16 %v5109_v18  ;;  %v3403_v18 = vsel %vm223_vm0, %v2219_v52, %v5080_v6 }
 0x36c   : > { %5403 = vrot.lane.b32.xlu0 %v5392_v47, %s5512_s12  ;;  %4176 = vmatprep.mubr.msk.f32.mxu1 %vm223_vm0, %v2473_v54  ;;  %v3404_v54 = vsel %vm223_vm0, %v2220_v35, %v5081_v55 }
 0x36d   : > { %3225 = vrot.lane.b32.xlu1 %v2427_v15, %s7782_s14  ;;  %v3529_v53 = vsel %vm1696_vm5, %v3497_v4, %v5110_v7  ;;  %v3530_v58 = vsel %vm1696_vm5, %v3498_v39, %v5111_v9  ;;  %v3435_v7 = vsel %vm1597_vm2, %v3403_v18, %v5085_v32  ;;  %v3436_v19 = vsel %vm1597_vm2, %v3404_v54, %v5086_v5  ;;  %v2222_v5 = vld [vmem:[#allocation2 + $0xc8] sm:$0xff] }
 0x36e   : > { %v5129_v10 = vpop.permute.xlu0 %5128  ;;  %v5115_v39 = vunpack.i.l.bf16 %v7326_v29 }
 0x36f   : > { %v5124_v37 = vpop.permute.xlu1 %5123  ;;  %v5130_v13 = vunpack.i.l.bf16 %v5129_v10  ;;  %v5131_v48 = vunpack.i.h.bf16 %v5129_v10 }
 0x370   : > { %v5126_v51 = vunpack.i.h.bf16 %v5124_v37  ;;  %v5125_v22 = vunpack.i.l.bf16 %v5124_v37  ;;  %3097 = vrot.lane.b32.xlu0 %v7353_v56, %s5515_s16 }
 0x371   : > { %5408 = vrot.lane.b32.xlu1 %v5397_v20, %s5514_s17  ;;  %v2428_v20 = vld [vmem:[#allocation2 + $0x1a0] sm:$0xff] }
 0x372   : > { %v3561_v3 = vsel %vm1729_vm6, %v3529_v53, %v5125_v22  ;;  %v5139_v46 = vpop.permute.xlu0 %5138  ;;  %v3562_v11 = vsel %vm1729_vm6, %v3530_v58, %v5126_v51  ;;  %v5120_v58 = vunpack.i.l.bf16 %v7339_v59 }
 0x373   : > { %v5134_v57 = vpop.permute.xlu1 %5133  ;;  %v3593_v47 = vsel %vm1762_vm7, %v3561_v3, %v5130_v13  ;;  %v3594_v27 = vsel %vm1762_vm7, %v3562_v11, %v5131_v48  ;;  %v5140_v21 = vunpack.i.l.bf16 %v5139_v46  ;;  %v5141_v49 = vunpack.i.h.bf16 %v5139_v46  ;;  %v2476_v11 = vld [vmem:[#allocation2 + $0xe2] sm:$0xff] }
 0x374   : > { %3852 = vmatmul.mubr.f32.gmra.mrb[24].mxu1 %v3593_v47  ;;  %3353 = vrot.lane.b32.xlu0 %v2459_v25, %s7783_s15  ;;  %v5135_v15 = vunpack.i.l.bf16 %v5134_v57  ;;  %v5136_v28 = vunpack.i.h.bf16 %v5134_v57 }
 0x375   : > { %3099 = vrot.lane.b32.xlu1 %v7364_v43, %s5515_s16  ;;  %4177 = vmatprep.mubr.msk.f32.mxu1 %vm223_vm0, %v2474_v42 }
 0x376   : > { %v7372_v14 = vpop.permute.xlu0 %5148  ;;  %v3467_v17 = vsel %vm1630_vm3, %v3435_v7, %v5135_v15  ;;  %v3468_v41 = vsel %vm1630_vm3, %v3436_v19, %v5136_v28 }
 0x377   : > { %v5144_v63 = vpop.permute.xlu1 %5143  ;;  %v3499_v51 = vsel %vm1663_vm4, %v3467_v17, %v5140_v21  ;;  %v3500_v3 = vsel %vm1663_vm4, %v3468_v41, %v5141_v49 }
 0x378   : > { %3857 = vmatmul.mubr.f32.gmra.mrb[26].mxu1 %v3594_v27  ;;  %3227 = vrot.lane.b32.xlu0 %v2428_v20, %s7782_s14  ;;  %v5145_v26 = vunpack.i.l.bf16 %v5144_v63  ;;  %v5146_v9 = vunpack.i.h.bf16 %v5144_v63  ;;  %v5116_v20 = vunpack.i.h.bf16 %v7326_v29  ;;  %v2221_v27 = vld [vmem:[#allocation2 + $0xc0] sm:$0xff]  ;;  %v2477_v29 = vld [vmem:[#allocation2 + $0xf2] sm:$0xff]  ;;  %s5445_s14 = scalar_lea.vmem %s7607_s7, 512 }
 0x379   : > { %4178 = vmatprep.mubr.msk.f32.mxu1 %vm223_vm0, %v2475_v45  ;;  %3355 = vrot.lane.b32.xlu1 %v2460_v1, %s7783_s15  ;;  %v5121_v1 = vunpack.i.h.bf16 %v7339_v59  ;;  %v3405_v32 = vsel %vm223_vm0, %v2221_v27, %v5115_v39  ;;  %p5446_p11 = scmp.ne.s32.totalorder %s7607_s7, %s5445_s14  ;;  %s5449_s15 = sshll.u32 %s5519_s22, 4  ;;  %s5450_s15 = int_to_ptr.vmem [resolvable:$false] %s5449_s15 }
 0x37a   : > { %v7382_v62 = vpop.permute.xlu0 %5153  ;;  %v3531_v53 = vsel %vm1696_vm5, %v3499_v51, %v5145_v26  ;;  %v3532_v47 = vsel %vm1696_vm5, %v3500_v3, %v5146_v9  ;;  %v3437_v18 = vsel %vm1597_vm2, %v3405_v32, %v5120_v58  ;;  %v3406_v28 = vsel %vm223_vm0, %v2222_v5, %v5116_v20  ;;  %s5451_s11 = scalar_lea.vmem %s5450_s15, 1024  ;;  %p5452_p0 = scmp.lt.s32.totalorder %s7607_s7, %s5450_s15 }
 0x37b   : > { %v5164_v12 = vpop.permute.xlu1 %5163  ;;  %v3438_v59 = vsel %vm1597_vm2, %v3406_v28, %v5121_v1  ;;  %v5151_v58 = vunpack.i.h.bf16 %v7372_v14  ;;  %v5156_v20 = vunpack.i.h.bf16 %v7382_v62  ;;  %p5447_p12 = pnand %p5446_p11, %p5589_p5  ;;  %p5453_p1 = scmp.lt.s32.totalorder %s5451_s11, %s5445_s14 }
 0x37c   : > { %v5165_v4 = vunpack.i.l.bf16 %v5164_v12  ;;  %v5166_v6 = vunpack.i.h.bf16 %v5164_v12 }
 0x37d   : > { %p5448_p13 = pneg %p5447_p12  ;;  %p5454_p2 = por %p5453_p1, %p5452_p0 }
 0x37e   : > { %v5159_v10 = vpop.permute.xlu0 %5158 }
 0x37f   : > { %v5174_v37 = vpop.permute.xlu1 %5173  ;;  %v5161_v22 = vunpack.i.h.bf16 %v5159_v10  ;;  %v5160_v13 = vunpack.i.l.bf16 %v5159_v10  ;;  %p5455_p3 = pnand %p5454_p2, %p5448_p13 }
 0x380   : > { %v5175_v7 = vunpack.i.l.bf16 %v5174_v37  ;;  %v5176_v21 = vunpack.i.h.bf16 %v5174_v37 }
 0x381   : > { %v3563_v25 = vsel %vm1729_vm6, %v3531_v53, %v5160_v13  ;;  %v3564_v42 = vsel %vm1729_vm6, %v3532_v47, %v5161_v22 }
 0x382   : > { %v5169_v57 = vpop.permute.xlu0 %5168  ;;  %v3595_v46 = vsel %vm1762_vm7, %v3563_v25, %v5165_v4  ;;  %v3596_v52 = vsel %vm1762_vm7, %v3564_v42, %v5166_v6  ;;  %v5150_v4 = vunpack.i.l.bf16 %v7372_v14  ;;  %v2223_v42 = vld [vmem:[#allocation2 + $0xd8] sm:$0xff] }
 0x383   : > { %v7394_v48 = vpop.permute.xlu1 %5183  ;;  %3862 = vmatmul.mubr.f32.gmra.mrb[28].mxu1 %v3595_v46  ;;  %v5170_v63 = vunpack.i.l.bf16 %v5169_v57  ;;  %v5171_v45 = vunpack.i.h.bf16 %v5169_v57  ;;  %v5155_v57 = vunpack.i.l.bf16 %v7382_v62  ;;  %v2478_v46 = vld [vmem:[#allocation2 + $0xfa] sm:$0xff] }
 0x384   : > { %4179 = vmatprep.mubr.msk.f32.mxu1 %vm223_vm0, %v2476_v11  ;;  %v3407_v6 = vsel %vm223_vm0, %v2223_v42, %v5150_v4 }
 0x385   : > { %v3469_v12 = vsel %vm1630_vm3, %v3437_v18, %v5170_v63  ;;  %v3470_v54 = vsel %vm1630_vm3, %v3438_v59, %v5171_v45  ;;  %v2224_v45 = vld [vmem:[#allocation2 + $0xe0] sm:$0xff] }
 0x386   : > { %v5179_v15 = vpop.permute.xlu0 %5178  ;;  %v3501_v10 = vsel %vm1663_vm4, %v3469_v12, %v5175_v7  ;;  %v3502_v13 = vsel %vm1663_vm4, %v3470_v54, %v5176_v21  ;;  %v3408_v14 = vsel %vm223_vm0, %v2224_v45, %v5151_v58 }
 0x387   : > { %v7404_v55 = vpop.permute.xlu1 %5188  ;;  %3867 = vmatmul.mubr.f32.gmra.mrb[30].mxu1 %v3596_v52  ;;  %v5180_v35 = vunpack.i.l.bf16 %v5179_v15  ;;  %v5181_v17 = vunpack.i.h.bf16 %v5179_v15  ;;  %v3439_v15 = vsel %vm1597_vm2, %v3407_v6, %v5155_v57  ;;  %v3440_v62 = vsel %vm1597_vm2, %v3408_v14, %v5156_v20  ;;  %v5441_v6 = vld [vmem:[#allocation2 + $0xf8] sm:$0xff] }
 0x388   : > { %4180 = vmatprep.mubr.msk.f32.mxu1 %vm223_vm0, %v2477_v29  ;;  %v5191_v57 = vunpack.i.h.bf16 %v7404_v55 }
 0x389   : > { %v3533_v51 = vsel %vm1696_vm5, %v3501_v10, %v5180_v35  ;;  %v3534_v39 = vsel %vm1696_vm5, %v3502_v13, %v5181_v17  ;;  %v5185_v13 = vunpack.i.l.bf16 %v7394_v48 }
 0x38a   : > { %v5199_v19 = vpop.permute.xlu0 %5198 }
 0x38b   : > { %v5194_v26 = vpop.permute.xlu1 %5193  ;;  %v5200_v9 = vunpack.i.l.bf16 %v5199_v19  ;;  %v5201_v53 = vunpack.i.h.bf16 %v5199_v19 }
 0x38c   : > { %v5196_v49 = vunpack.i.h.bf16 %v5194_v26  ;;  %v5195_v41 = vunpack.i.l.bf16 %v5194_v26 }
 0x38e   : > { %v3565_v22 = vsel %vm1729_vm6, %v3533_v51, %v5195_v41  ;;  %v5209_v3 = vpop.permute.xlu0 %5208  ;;  %v3566_v47 = vsel %vm1729_vm6, %v3534_v39, %v5196_v49 }
 0x38f   : > { %v5204_v37 = vpop.permute.xlu1 %5203  ;;  %v3597_v25 = vsel %vm1762_vm7, %v3565_v22, %v5200_v9  ;;  %v3598_v32 = vsel %vm1762_vm7, %v3566_v47, %v5201_v53  ;;  %v5210_v52 = vunpack.i.l.bf16 %v5209_v3  ;;  %v5211_v29 = vunpack.i.h.bf16 %v5209_v3 }
 0x390   : > { %3872 = vmatmul.mubr.f32.gmra.mrb[32].mxu1 %v3597_v25  ;;  %v5205_v11 = vunpack.i.l.bf16 %v5204_v37  ;;  %v5206_v63 = vunpack.i.h.bf16 %v5204_v37  ;;  %v5190_v3 = vunpack.i.l.bf16 %v7404_v55  ;;  %v5186_v25 = vunpack.i.h.bf16 %v7394_v48 }
 0x391   : > { %4181 = vmatprep.mubr.msk.f32.mxu1 %vm223_vm0, %v2478_v46  ;;  %v5440_v46 = vld [vmem:[#allocation2 + $0xf0] sm:$0xff] }
 0x392   : > { %v7426_v1 = vpop.permute.xlu0 %5218  ;;  %v3471_v5 = vsel %vm1630_vm3, %v3439_v15, %v5205_v11  ;;  %v3472_v28 = vsel %vm1630_vm3, %v3440_v62, %v5206_v63  ;;  %v3410_v63 = vsel %vm223_vm0, %v5441_v6, %v5186_v25  ;;  %v5443_v25 = vld [vmem:[#allocation2 + $0x110] sm:$0xff] }
 0x393   : > { %v5214_v27 = vpop.permute.xlu1 %5213  ;;  %v3503_v7 = vsel %vm1663_vm4, %v3471_v5, %v5210_v52  ;;  %v3504_v19 = vsel %vm1663_vm4, %v3472_v28, %v5211_v29 }
 0x394   : > { %3877 = vmatmul.mubr.f32.gmra.mrb[34].mxu1 %v3598_v32  ;;  %v5215_v18 = vunpack.i.l.bf16 %v5214_v27  ;;  %v5216_v12 = vunpack.i.h.bf16 %v5214_v27 }
 0x395   : > { %4182 = vmatprep.mubr.msk.f32.mxu1 %vm223_vm0, %v7117_v34 }
 0x396   : > { %v5224_v59 = vpop.permute.xlu0 %5223  ;;  %v3535_v26 = vsel %vm1696_vm5, %v3503_v7, %v5215_v18  ;;  %v3536_v51 = vsel %vm1696_vm5, %v3504_v19, %v5216_v12  ;;  %v5221_v19 = vunpack.i.h.bf16 %v7426_v1 }
 0x397   : > { %v5229_v35 = vpop.permute.xlu1 %5228  ;;  %v5226_v54 = vunpack.i.h.bf16 %v5224_v59  ;;  %v5225_v17 = vunpack.i.l.bf16 %v5224_v59 }
 0x398   : > { %v5230_v21 = vunpack.i.l.bf16 %v5229_v35  ;;  %v5231_v34 = vunpack.i.h.bf16 %v5229_v35  ;;  %v5220_v35 = vunpack.i.l.bf16 %v7426_v1 }
 0x399   : > { %v3567_v49 = vsel %vm1729_vm6, %v3535_v26, %v5225_v17  ;;  %v3568_v22 = vsel %vm1729_vm6, %v3536_v51, %v5226_v54 }
 0x39a   : > { %v5234_v9 = vpop.permute.xlu0 %5233  ;;  %v3599_v10 = vsel %vm1762_vm7, %v3567_v49, %v5230_v21  ;;  %v3600_v37 = vsel %vm1762_vm7, %v3568_v22, %v5231_v34 }
 0x39b   : > { %v5239_v41 = vpop.permute.xlu1 %5238  ;;  %3882 = vmatmul.mubr.f32.gmra.mrb[36].mxu1 %v3599_v10  ;;  %v5235_v39 = vunpack.i.l.bf16 %v5234_v9  ;;  %v5236_v47 = vunpack.i.h.bf16 %v5234_v9  ;;  %v5442_v10 = vld [vmem:[#allocation2 + $0x108] sm:$0xff] }
 0x39c   : > { %4183 = vmatprep.mubr.msk.f32.mxu1 %vm223_vm0, %v7119_v36  ;;  %v3409_v36 = vsel %vm223_vm0, %v5440_v46, %v5185_v13  ;;  %v5240_v20 = vunpack.i.l.bf16 %v5239_v41  ;;  %v5241_v32 = vunpack.i.h.bf16 %v5239_v41  ;;  %v3411_v51 = vsel %vm223_vm0, %v5442_v10, %v5220_v35 }
 0x39d   : > { %v3441_v42 = vsel %vm1597_vm2, %v3409_v36, %v5190_v3 }
 0x39e   : > { %v5244_v53 = vpop.permute.xlu0 %5243  ;;  %v3473_v48 = vsel %vm1630_vm3, %v3441_v42, %v5235_v39 }
 0x39f   : > { %v7446_v4 = vpop.permute.xlu1 %5248  ;;  %3887 = vmatmul.mubr.f32.gmra.mrb[38].mxu1 %v3600_v37  ;;  %v5245_v27 = vunpack.i.l.bf16 %v5244_v53  ;;  %v5246_v45 = vunpack.i.h.bf16 %v5244_v53  ;;  %v3505_v18 = vsel %vm1663_vm4, %v3473_v48, %v5240_v20 }
 0x3a0   : > { %4184 = vmatprep.mubr.msk.f32.mxu1 %vm223_vm0, %v7159_v61  ;;  %v3442_v61 = vsel %vm1597_vm2, %v3410_v63, %v5191_v57  ;;  %v5250_v17 = vunpack.i.l.bf16 %v7446_v4  ;;  %v5251_v41 = vunpack.i.h.bf16 %v7446_v4  ;;  %v3412_v4 = vsel %vm223_vm0, %v5443_v25, %v5221_v19 }
 0x3a1   : > { %v3474_v55 = vsel %vm1630_vm3, %v3442_v61, %v5236_v47  ;;  %v3537_v29 = vsel %vm1696_vm5, %v3505_v18, %v5245_v27  ;;  %v5518_v47 = vmov 0  }
 0x3a2   : > { %v5264_v11 = vpop.permute.xlu0 %5263  ;;  %v3506_v12 = vsel %vm1663_vm4, %v3474_v55, %v5241_v32  ;;  %v3443_v3 = vsel %vm1597_vm2, %v3411_v51, %v5250_v17  ;;  %v3444_v46 = vsel %vm1597_vm2, %v3412_v4, %v5251_v41  ;;  %5412 = vset.pattern.permute.xlu1 %v5518_v47 }
 0x3a3   : > { %v7455_v58 = vpop.permute.xlu1 %5253  ;;  %v5265_v62 = vunpack.i.l.bf16 %v5264_v11  ;;  %v3538_v54 = vsel %vm1696_vm5, %v3506_v12, %v5246_v45  ;;  %v5266_v49 = vunpack.i.h.bf16 %v5264_v11 }
 0x3a6   : > { %v5269_v52 = vpop.permute.xlu0 %5268 }
 0x3a7   : > { %v5259_v15 = vpop.permute.xlu1 %5258  ;;  %v5270_v34 = vunpack.i.l.bf16 %v5269_v52  ;;  %v5271_v22 = vunpack.i.h.bf16 %v5269_v52 }
 0x3a8   : > { %v5261_v14 = vunpack.i.h.bf16 %v5259_v15  ;;  %v5260_v5 = vunpack.i.l.bf16 %v5259_v15 }
 0x3a9   : > { %v3475_v39 = vsel %vm1630_vm3, %v3443_v3, %v5270_v34  ;;  %v3476_v11 = vsel %vm1630_vm3, %v3444_v46, %v5271_v22  ;;  %v5444_v34 = vld [vmem:[#allocation2 + $0x128] sm:$0xff] }
 0x3aa   : > { %v3569_v28 = vsel %vm1729_vm6, %v3537_v29, %v5260_v5  ;;  %v5279_v7 = vpop.permute.xlu0 %5278  ;;  %v3570_v26 = vsel %vm1729_vm6, %v3538_v54, %v5261_v14 }
 0x3ab   : > { %v5274_v59 = vpop.permute.xlu1 %5273  ;;  %v3601_v21 = vsel %vm1762_vm7, %v3569_v28, %v5265_v62  ;;  %v3602_v37 = vsel %vm1762_vm7, %v3570_v26, %v5266_v49  ;;  %v5280_v57 = vunpack.i.l.bf16 %v5279_v7  ;;  %v5281_v42 = vunpack.i.h.bf16 %v5279_v7 }
 0x3ac   : > { %3892 = vmatmul.mubr.f32.gmra.mrb[40].mxu1 %v3601_v21  ;;  %v5275_v9 = vunpack.i.l.bf16 %v5274_v59  ;;  %v5276_v1 = vunpack.i.h.bf16 %v5274_v59  ;;  %v5255_v62 = vunpack.i.l.bf16 %v7455_v58  ;;  %v5256_v59 = vunpack.i.h.bf16 %v7455_v58 }
 0x3ad   : > { %4185 = vmatprep.mubr.msk.f32.mxu1 %vm223_vm0, %v7161_v30  ;;  %v4016_v30 = vld [vmem:[%s7663_s4] sm:$0xff] }
 0x3ae   : > { %v7476_v53 = vpop.permute.xlu0 %5288  ;;  %v3507_v36 = vsel %vm1663_vm4, %v3475_v39, %v5275_v9  ;;  %4020 = vperm.xlu1 %5412, %v4016_v30   ;;  %v3508_v63 = vsel %vm1663_vm4, %v3476_v11, %v5276_v1  ;;  %v3413_v54 = vsel %vm223_vm0, %v7150_v60, %v5255_v62  ;;  %v3414_v41 = vsel %vm223_vm0, %v5444_v34, %v5256_v59 }
 0x3af   : > { %v5284_v13 = vpop.permute.xlu1 %5283  ;;  %v3539_v32 = vsel %vm1696_vm5, %v3507_v36, %v5280_v57  ;;  %v3540_v5 = vsel %vm1696_vm5, %v3508_v63, %v5281_v42  ;;  %v5290_v57 = vunpack.i.l.bf16 %v7476_v53  ;;  %v5291_v63 = vunpack.i.h.bf16 %v7476_v53 }
 0x3b0   : > { %3897 = vmatmul.mubr.f32.gmra.mrb[42].mxu1 %v3602_v37  ;;  %v5285_v35 = vunpack.i.l.bf16 %v5284_v13  ;;  %v5286_v21 = vunpack.i.h.bf16 %v5284_v13 }
 0x3b1   : > { %4186 = vmatprep.mubr.msk.f32.mxu1 %vm223_vm0, %v7210_v8  ;;  %v4017_v8 = vld [vmem:[%s7663_s4 + $0x8] sm:$0xff]  ;;  %v3416_v53 = vsel %vm223_vm0, %v7185_v24, %v5291_v63 }
 0x3b2   : > { %v5299_v6 = vpop.permute.xlu0 %5298  ;;  %4025 = vperm.xlu1 %5412, %v4017_v8   ;;  %v3445_v19 = vsel %vm1597_vm2, %v3413_v54, %v5285_v35  ;;  %v3446_v10 = vsel %vm1597_vm2, %v3414_v41, %v5286_v21 }
 0x3b3   : > { %v5294_v20 = vpop.permute.xlu1 %5293  ;;  %v5300_v61 = vunpack.i.l.bf16 %v5299_v6  ;;  %v5301_v45 = vunpack.i.h.bf16 %v5299_v6 }
 0x3b4   : > { %v5296_v48 = vunpack.i.h.bf16 %v5294_v20  ;;  %v5295_v27 = vunpack.i.l.bf16 %v5294_v20 }
 0x3b6   : > { %v3571_v55 = vsel %vm1729_vm6, %v3539_v32, %v5295_v27  ;;  %v5304_v52 = vpop.permute.xlu0 %5303  ;;  %v3572_v18 = vsel %vm1729_vm6, %v3540_v5, %v5296_v48  ;;  %v3415_v32 = vsel %vm223_vm0, %v7190_v2, %v5290_v57 }
 0x3b7   : > { %v5309_v15 = vpop.permute.xlu1 %5308  ;;  %v3603_v14 = vsel %vm1762_vm7, %v3571_v55, %v5300_v61  ;;  %v3604_v12 = vsel %vm1762_vm7, %v3572_v18, %v5301_v45  ;;  %v5305_v7 = vunpack.i.l.bf16 %v5304_v52  ;;  %v5306_v17 = vunpack.i.h.bf16 %v5304_v52 }
 0x3b8   : > { %3902 = vmatmul.mubr.f32.gmra.mrb[44].mxu1 %v3603_v14  ;;  %v5310_v49 = vunpack.i.l.bf16 %v5309_v15 }
 0x3b9   : > { %4187 = vmatprep.mubr.msk.f32.mxu1 %vm223_vm0, %v7212_v44  ;;  %v3477_v58 = vsel %vm1630_vm3, %v3445_v19, %v5305_v7  ;;  %v3478_v51 = vsel %vm1630_vm3, %v3446_v10, %v5306_v17 }
 0x3ba   : > { %v5314_v28 = vpop.permute.xlu0 %5313  ;;  %v3509_v1 = vsel %vm1663_vm4, %v3477_v58, %v5310_v49 }
 0x3bb   : > { %v5319_v29 = vpop.permute.xlu1 %5318  ;;  %v5315_v9 = vunpack.i.l.bf16 %v5314_v28  ;;  %v5316_v22 = vunpack.i.h.bf16 %v5314_v28 }
 0x3bc   : > { %3907 = vmatmul.mubr.f32.gmra.mrb[46].mxu1 %v3604_v12  ;;  %v5320_v20 = vunpack.i.l.bf16 %v5319_v29  ;;  %v5321_v61 = vunpack.i.h.bf16 %v5319_v29 }
 0x3bd   : > { %4188 = vmatprep.mubr.msk.f32.mxu1 %vm223_vm0, %v7255_v38  ;;  %v5311_v38 = vunpack.i.h.bf16 %v5309_v15  ;;  %v3541_v25 = vsel %vm1696_vm5, %v3509_v1, %v5315_v9 }
 0x3be   : > { %v5334_v26 = vpop.permute.xlu0 %5333  ;;  %v3447_v14 = vsel %vm1597_vm2, %v3415_v32, %v5320_v20  ;;  %v3448_v2 = vsel %vm1597_vm2, %v3416_v53, %v5321_v61 }
 0x3bf   : > { %v7509_v44 = vpop.permute.xlu1 %5323  ;;  %v5335_v30 = vunpack.i.l.bf16 %v5334_v26  ;;  %v3510_v39 = vsel %vm1663_vm4, %v3478_v51, %v5311_v38  ;;  %v5336_v48 = vunpack.i.h.bf16 %v5334_v26 }
 0x3c0   : > { %v3542_v42 = vsel %vm1696_vm5, %v3510_v39, %v5316_v22  ;;  %v5326_v10 = vunpack.i.h.bf16 %v7509_v44 }
 0x3c2   : > { %v5339_v13 = vpop.permute.xlu0 %5338 }
 0x3c3   : > { %v5329_v60 = vpop.permute.xlu1 %5328  ;;  %v5340_v27 = vunpack.i.l.bf16 %v5339_v13  ;;  %v5341_v55 = vunpack.i.h.bf16 %v5339_v13 }
 0x3c4   : > { %v5331_v37 = vunpack.i.h.bf16 %v5329_v60  ;;  %v5330_v3 = vunpack.i.l.bf16 %v5329_v60 }
 0x3c5   : > { %v3480_v29 = vsel %vm1630_vm3, %v3448_v2, %v5341_v55 }
 0x3c6   : > { %v3573_v4 = vsel %vm1729_vm6, %v3541_v25, %v5330_v3  ;;  %v5349_v36 = vpop.permute.xlu0 %5348  ;;  %v3574_v6 = vsel %vm1729_vm6, %v3542_v42, %v5331_v37 }
 0x3c7   : > { %v5344_v46 = vpop.permute.xlu1 %5343  ;;  %v3605_v11 = vsel %vm1762_vm7, %v3573_v4, %v5335_v30  ;;  %v3606_v52 = vsel %vm1762_vm7, %v3574_v6, %v5336_v48  ;;  %v5350_v18 = vunpack.i.l.bf16 %v5349_v36  ;;  %v5351_v28 = vunpack.i.h.bf16 %v5349_v36 }
 0x3c8   : > { %3912 = vmatmul.mubr.f32.gmra.mrb[48].mxu1 %v3605_v11  ;;  %v5345_v8 = vunpack.i.l.bf16 %v5344_v46  ;;  %v5346_v5 = vunpack.i.h.bf16 %v5344_v46 }
 0x3c9   : > { %4189 = vmatprep.mubr.msk.f32.mxu1 %vm223_vm0, %v7257_v50  ;;  %v3479_v50 = vsel %vm1630_vm3, %v3447_v14, %v5340_v27 }
 0x3ca   : > { %v7529_v15 = vpop.permute.xlu0 %5358  ;;  %v3511_v62 = vsel %vm1663_vm4, %v3479_v50, %v5345_v8  ;;  %v3512_v59 = vsel %vm1663_vm4, %v3480_v29, %v5346_v5  ;;  %v2491_v50 = vld [vmem:[#allocation2 + $0x19a] sm:$0xff] }
 0x3cb   : > { %v5354_v45 = vpop.permute.xlu1 %5353  ;;  %v3543_v54 = vsel %vm1696_vm5, %v3511_v62, %v5350_v18  ;;  %v3544_v41 = vsel %vm1696_vm5, %v3512_v59, %v5351_v28  ;;  %v5361_v14 = vunpack.i.h.bf16 %v7529_v15 }
 0x3cc   : > { %3917 = vmatmul.mubr.f32.gmra.mrb[50].mxu1 %v3606_v52  ;;  %v5355_v58 = vunpack.i.l.bf16 %v5354_v45  ;;  %v5356_v51 = vunpack.i.h.bf16 %v5354_v45 }
 0x3cd   : > { %4190 = vmatprep.mubr.msk.f32.mxu1 %vm223_vm0, %v7304_v33  ;;  %v5325_v33 = vunpack.i.l.bf16 %v7509_v44  ;;  %v3418_v44 = vsel %vm223_vm0, %v7238_v31, %v5326_v10 }
 0x3ce   : > { %v5369_v35 = vpop.permute.xlu0 %5368 }
 0x3cf   : > { %v5364_v12 = vpop.permute.xlu1 %5363  ;;  %v5370_v24 = vunpack.i.l.bf16 %v5369_v35  ;;  %v5371_v26 = vunpack.i.h.bf16 %v5369_v35  ;;  %v3417_v22 = vsel %vm223_vm0, %v7245_v16, %v5325_v33  ;;  %v3450_v16 = vsel %vm1597_vm2, %v3418_v44, %v5356_v51 }
 0x3d0   : > { %v5366_v7 = vunpack.i.h.bf16 %v5364_v12  ;;  %v5365_v21 = vunpack.i.l.bf16 %v5364_v12  ;;  %v3449_v1 = vsel %vm1597_vm2, %v3417_v22, %v5355_v58 }
 0x3d2   : > { %v3575_v17 = vsel %vm1729_vm6, %v3543_v54, %v5365_v21  ;;  %v5374_v49 = vpop.permute.xlu0 %5373  ;;  %v3576_v9 = vsel %vm1729_vm6, %v3544_v41, %v5366_v7 }
 0x3d3   : > { %v5379_v19 = vpop.permute.xlu1 %5378  ;;  %v3607_v34 = vsel %vm1762_vm7, %v3575_v17, %v5370_v24  ;;  %v5375_v38 = vunpack.i.l.bf16 %v5374_v49  ;;  %v5376_v60 = vunpack.i.h.bf16 %v5374_v49  ;;  %v3608_v3 = vsel %vm1762_vm7, %v3576_v9, %v5371_v26 }
 0x3d4   : > { %3922 = vmatmul.mubr.f32.gmra.mrb[52].mxu1 %v3607_v34  ;;  %v5380_v30 = vunpack.i.l.bf16 %v5379_v19 }
 0x3d5   : > { %4191 = vmatprep.mubr.msk.f32.mxu1 %vm223_vm0, %v7306_v40  ;;  %v3481_v25 = vsel %vm1630_vm3, %v3449_v1, %v5375_v38  ;;  %v5381_v40 = vunpack.i.h.bf16 %v5379_v19  ;;  %v3482_v39 = vsel %vm1630_vm3, %v3450_v16, %v5376_v60  ;;  %v2492_v19 = vld [vmem:[#allocation2 + $0x1a2] sm:$0xff] }
 0x3d6   : > { %v5384_v37 = vpop.permute.xlu0 %5383  ;;  %v3513_v6 = vsel %vm1663_vm4, %v3481_v25, %v5380_v30 }
 0x3d7   : > { %v5389_v13 = vpop.permute.xlu1 %5388  ;;  %v5385_v4 = vunpack.i.l.bf16 %v5384_v37  ;;  %v5386_v57 = vunpack.i.h.bf16 %v5384_v37  ;;  %v3514_v48 = vsel %vm1663_vm4, %v3482_v39, %v5381_v40 }
 0x3d8   : > { %3927 = vmatmul.mubr.f32.gmra.mrb[54].mxu1 %v3608_v3  ;;  %v5390_v45 = vunpack.i.l.bf16 %v5389_v13  ;;  %v5391_v53 = vunpack.i.h.bf16 %v5389_v13 }
 0x3d9   : > { %4192 = vmatprep.mubr.msk.f32.mxu1 %vm223_vm0, %v7353_v56  ;;  %v3545_v31 = vsel %vm1696_vm5, %v3513_v6, %v5385_v4  ;;  %v5360_v56 = vunpack.i.l.bf16 %v7529_v15  ;;  %v3546_v55 = vsel %vm1696_vm5, %v3514_v48, %v5386_v57  ;;  %v3420_v15 = vsel %vm223_vm0, %v7280_v23, %v5361_v14 }
 0x3da   : > { %v5399_v36 = vpop.permute.xlu0 %5398  ;;  %v3452_v7 = vsel %vm1597_vm2, %v3420_v15, %v5391_v53 }
 0x3db   : > { %v5394_v46 = vpop.permute.xlu1 %5393  ;;  %v5400_v20 = vunpack.i.l.bf16 %v5399_v36  ;;  %v5401_v27 = vunpack.i.h.bf16 %v5399_v36  ;;  %v3419_v18 = vsel %vm223_vm0, %v7285_v0, %v5360_v56 }
 0x3dc   : > { %v5396_v11 = vunpack.i.h.bf16 %v5394_v46  ;;  %v5395_v42 = vunpack.i.l.bf16 %v5394_v46  ;;  %v3451_v12 = vsel %vm1597_vm2, %v3419_v18, %v5390_v45 }
 0x3de   : > { %v3577_v63 = vsel %vm1729_vm6, %v3545_v31, %v5395_v42  ;;  %v5404_v8 = vpop.permute.xlu0 %5403  ;;  %v3578_v52 = vsel %vm1729_vm6, %v3546_v55, %v5396_v11 }
 0x3df   : > { %v3226_v61 = vpop.permute.xlu1 %3225  ;;  %v3609_v32 = vsel %vm1762_vm7, %v3577_v63, %v5400_v20  ;;  %v5405_v5 = vunpack.i.l.bf16 %v5404_v8  ;;  %v5406_v2 = vunpack.i.h.bf16 %v5404_v8  ;;  %v3610_v28 = vsel %vm1762_vm7, %v3578_v52, %v5401_v27 }
 0x3e0   : > { %3932 = vmatmul.mubr.f32.gmra.mrb[56].mxu1 %v3609_v32 }
 0x3e1   : > { %4193 = vmatprep.mubr.msk.f32.mxu1 %vm223_vm0, %v7364_v43  ;;  %v3483_v43 = vsel %vm1630_vm3, %v3451_v12, %v5405_v5  ;;  %v3484_v54 = vsel %vm1630_vm3, %v3452_v7, %v5406_v2 }
 0x3e2   : > { %v3098_v29 = vpop.permute.xlu0 %3097 }
 0x3e3   : > { %v5409_v62 = vpop.permute.xlu1 %5408 }
 0x3e4   : > { %v5411_v35 = vunpack.i.h.bf16 %v5409_v62  ;;  %v5410_v59 = vunpack.i.l.bf16 %v5409_v62  ;;  %3937 = vmatmul.mubr.f32.gmra.mrb[58].mxu1 %v3610_v28 }
 0x3e5   : > { %4194 = vmatprep.mubr.msk.f32.mxu1 %vm223_vm0, %v2491_v50 }
 0x3e6   : > { %v3515_v0 = vsel %vm1663_vm4, %v3483_v43, %v5410_v59  ;;  %v3354_v17 = vpop.permute.xlu0 %3353  ;;  %v3516_v33 = vsel %vm1663_vm4, %v3484_v54, %v5411_v35 }
 0x3e7   : > { %v3547_v21 = vsel %vm1696_vm5, %v3515_v0, %v3098_v29  ;;  %v3100_v24 = vpop.permute.xlu1 %3099 }
 0x3e8   : > { %v3579_v26 = vsel %vm1729_vm6, %v3547_v21, %v3226_v61  ;;  %v3548_v49 = vsel %vm1696_vm5, %v3516_v33, %v3100_v24 }
 0x3e9   : > { %v3611_v23 = vsel %vm1762_vm7, %v3579_v26, %v3354_v17  ;;  %v4032_v17 = vld [vmem:[%s5678_s9] sm:$0xff] }
 0x3ea   : > { %3942 = vmatmul.mubr.f32.gmra.mrb[60].mxu1 %v3611_v23  ;;  %v3228_v34 = vpop.permute.xlu0 %3227  ;;  %v4034_v23 = vld [vmem:[%s5678_s9 + $0x10] sm:$0xff] }
 0x3eb   : > { %4195 = vmatprep.mubr.msk.f32.mxu1 %vm223_vm0, %v2492_v19  ;;  %v3580_v41 = vsel %vm1729_vm6, %v3548_v49, %v3228_v34  ;;  %v3356_v58 = vpop.permute.xlu1 %3355 }
 0x3ec   : > { %v3612_v9 = vsel %vm1762_vm7, %v3580_v41, %v3356_v58 }
 0x3ee   : > { %3947 = vmatmul.mubr.f32.gmra.mrb[62].mxu1 %v3612_v9 }
 0x3f3   : > { %v3793_v10 = vpop.f32.mrb[0].mxu1 }
 0x3f4   : > { %3952 = vxpose.xlu0.b32.start [1/16] (narrow) %v3793_v10, 16  ;;  %v3795_v38 = vpop.f32.mrb[1].mxu1 }
 0x3f7   : > { %v3798_v51 = vpop.f32.mrb[2].mxu1 }
 0x3f8   : > { %3953 = vxpose.xlu0.b32.cont [2/16] (narrow) %v3798_v51, 16  ;;  %v3800_v22 = vpop.f32.mrb[3].mxu1 }
 0x402   : > { %v3803_v60 = vpop.f32.mrb[4].mxu1 }
 0x403   : > { %3954 = vxpose.xlu0.b32.cont [3/16] (narrow) %v3803_v60, 16  ;;  %v3805_v13 = vpop.f32.mrb[5].mxu1 }
 0x406   : > { %v3808_v37 = vpop.f32.mrb[6].mxu1 }
 0x407   : > { %3955 = vxpose.xlu0.b32.cont [4/16] (narrow) %v3808_v37, 16  ;;  %v3810_v3 = vpop.f32.mrb[7].mxu1 }
 0x40f   : > { %v3813_v1 = vpop.f32.mrb[8].mxu1 }
 0x410   : > { %3956 = vxpose.xlu0.b32.cont [5/16] (narrow) %v3813_v1, 16  ;;  %v3815_v30 = vpop.f32.mrb[9].mxu1 }
 0x413   : > { %v3818_v44 = vpop.f32.mrb[10].mxu1 }
 0x414   : > { %3957 = vxpose.xlu0.b32.cont [6/16] (narrow) %v3818_v44, 16  ;;  %v3820_v25 = vpop.f32.mrb[11].mxu1 }
 0x41e   : > { %v3823_v4 = vpop.f32.mrb[12].mxu1 }
 0x41f   : > { %3958 = vxpose.xlu0.b32.cont [7/16] (narrow) %v3823_v4, 16  ;;  %v3825_v16 = vpop.f32.mrb[13].mxu1  ;;  %v4033_v4 = vld [vmem:[%s5678_s9 + $0x8] sm:$0xff] }
 0x422   : > { %v3828_v40 = vpop.f32.mrb[14].mxu1 }
 0x423   : > { %3959 = vxpose.xlu0.b32.cont [8/16] (narrow) %v3828_v40, 16  ;;  %v3830_v39 = vpop.f32.mrb[15].mxu1 }
 0x42b   : > { %v3833_v57 = vpop.f32.mrb[16].mxu1 }
 0x42c   : > { %3960 = vxpose.xlu0.b32.cont [9/16] (narrow) %v3833_v57, 16  ;;  %v3835_v46 = vpop.f32.mrb[17].mxu1  ;;  %v4035_v57 = vld [vmem:[%s5678_s9 + $0x18] sm:$0xff]  ;;  %s7617_s9 = scalar_lea.sflag [#allocation4], %s215_s26 }
 0x42d   : > { %v4021_v21 = vpop.permute.xlu1 %4020 }
 0x42f   : > { %v3838_v36 = vpop.f32.mrb[18].mxu1 }
 0x430   : > { %3961 = vxpose.xlu0.b32.cont [10/16] (narrow) %v3838_v36, 16  ;;  %v3840_v11 = vpop.f32.mrb[19].mxu1 }
 0x431   : > { %v4026_v26 = vpop.permute.xlu1 %4025 }
 0x43a   : > { %v3843_v42 = vpop.f32.mrb[20].mxu1 }
 0x43b   : > { %3962 = vxpose.xlu0.b32.cont [11/16] (narrow) %v3843_v42, 16  ;;  %v3845_v20 = vpop.f32.mrb[21].mxu1 }
 0x43e   : > { %v3848_v6 = vpop.f32.mrb[22].mxu1 }
 0x43f   : > { %3963 = vxpose.xlu0.b32.cont [12/16] (narrow) %v3848_v6, 16  ;;  %v3850_v31 = vpop.f32.mrb[23].mxu1 }
 0x447   : > { %v3853_v63 = vpop.f32.mrb[24].mxu1 }
 0x448   : > { %3964 = vxpose.xlu0.b32.cont [13/16] (narrow) %v3853_v63, 16  ;;  %v3855_v48 = vpop.f32.mrb[25].mxu1 }
 0x44b   : > { %v3858_v56 = vpop.f32.mrb[26].mxu1 }
 0x44c   : > { %3965 = vxpose.xlu0.b32.cont [14/16] (narrow) %v3858_v56, 16  ;;  %v3860_v27 = vpop.f32.mrb[27].mxu1 }
 0x456   : > { %v3863_v61 = vpop.f32.mrb[28].mxu1 }
 0x457   : > { %3966 = vxpose.xlu0.b32.cont [15/16] (narrow) %v3863_v61, 16  ;;  %v3865_v8 = vpop.f32.mrb[29].mxu1 }
 0x45a   : > { %v3868_v32 = vpop.f32.mrb[30].mxu1 }
 0x45b   : > { %3967 = vxpose.xlu0.b32.end [16/16] (narrow) %v3868_v32, 16  ;;  %v3870_v55 = vpop.f32.mrb[31].mxu1 }
 0x463   : > { %v3873_v45 = vpop.f32.mrb[32].mxu1 }
 0x464   : > { %3984 = vxpose.xlu1.b32.start [1/16] (narrow) %v3873_v45, 16  ;;  %v3875_v52 = vpop.f32.mrb[33].mxu1 }
 0x467   : > { %v3878_v14 = vpop.f32.mrb[34].mxu1 }
 0x468   : > { %3985 = vxpose.xlu1.b32.cont [2/16] (narrow) %v3878_v14, 16  ;;  %v3880_v5 = vpop.f32.mrb[35].mxu1 }
 0x46e   : > { %v3883_v53 = vpop.f32.mrb[36].mxu1 }
 0x46f   : > { %3986 = vxpose.xlu1.b32.cont [3/16] (narrow) %v3883_v53, 16  ;;  %v3885_v50 = vpop.f32.mrb[37].mxu1 }
 0x472   : > { %v3888_v18 = vpop.f32.mrb[38].mxu1 }
 0x473   : > { %3987 = vxpose.xlu1.b32.cont [4/16] (narrow) %v3888_v18, 16  ;;  %v3890_v2 = vpop.f32.mrb[39].mxu1 }
 0x47f   : > { %v3893_v62 = vpop.f32.mrb[40].mxu1 }
 0x480   : > { %3988 = vxpose.xlu1.b32.cont [5/16] (narrow) %v3893_v62, 16  ;;  %v3895_v29 = vpop.f32.mrb[41].mxu1 }
 0x483   : > { %v3898_v28 = vpop.f32.mrb[42].mxu1 }
 0x484   : > { %3989 = vxpose.xlu1.b32.cont [6/16] (narrow) %v3898_v28, 16  ;;  %v3900_v12 = vpop.f32.mrb[43].mxu1  ;;  %5413 = vset.pattern.permute.xlu0 %v5518_v47 }
 0x48b   : > { %v3903_v35 = vpop.f32.mrb[44].mxu1 }
 0x48c   : > { %3990 = vxpose.xlu1.b32.cont [7/16] (narrow) %v3903_v35, 16  ;;  %v3905_v59 = vpop.f32.mrb[45].mxu1 }
 0x48f   : > { %v3908_v15 = vpop.f32.mrb[46].mxu1 }
 0x490   : > { %3991 = vxpose.xlu1.b32.cont [8/16] (narrow) %v3908_v15, 16  ;;  %v3910_v43 = vpop.f32.mrb[47].mxu1 }
 0x49b   : > { %v3913_v7 = vpop.f32.mrb[48].mxu1 }
 0x49c   : > { %3992 = vxpose.xlu1.b32.cont [9/16] (narrow) %v3913_v7, 16  ;;  %v3915_v0 = vpop.f32.mrb[49].mxu1 }
 0x49f   : > { %v3918_v24 = vpop.f32.mrb[50].mxu1  ;;  %v3968_v33 = vpop.trf.xlu0 }
 0x4a0   : > { %3993 = vxpose.xlu1.b32.cont [10/16] (narrow) %v3918_v24, 16  ;;  %v3920_v54 = vpop.f32.mrb[51].mxu1  ;;  %v4028_v47 = vadd.f32 %v4021_v21, %v3968_v33 }
 0x4a2   : > { %v4036_v19 = vadd.f32 %v4032_v17, %v4028_v47 }
 0x4a3   : > { %v3969_v49 = vpop.trf.xlu0 }
 0x4a4   : > { %v4040_v34 = vmax.f32 %v4036_v19, 0.0  ;;  %v4030_v41 = vadd.f32 %v4026_v26, %v3969_v49 }
 0x4a6   : > { %4044 = vst [vmem:[%s7598_s6] sm:$0xff] %v4040_v34  ;;  %v4038_v9 = vadd.f32 %v4034_v23, %v4030_v41 }
 0x4a7   : > { %v3923_v58 = vpop.f32.mrb[52].mxu1 }
 0x4a8   : > { %3994 = vxpose.xlu1.b32.cont [11/16] (narrow) %v3923_v58, 16  ;;  %v3925_v10 = vpop.f32.mrb[53].mxu1  ;;  %v4042_v38 = vmax.f32 %v4038_v9, 0.0 }
 0x4aa   : > { %4046 = vst [vmem:[%s7598_s6 + $0x10] sm:$0xff] %v4042_v38 }
 0x4ab   : > { %v3928_v51 = vpop.f32.mrb[54].mxu1 }
 0x4ac   : > { %3995 = vxpose.xlu1.b32.cont [12/16] (narrow) %v3928_v51, 16  ;;  %v3930_v22 = vpop.f32.mrb[55].mxu1 }
 0x4b3   : > { %v3933_v60 = vpop.f32.mrb[56].mxu1 }
 0x4b4   : > { %3996 = vxpose.xlu1.b32.cont [13/16] (narrow) %v3933_v60, 16  ;;  %v3935_v13 = vpop.f32.mrb[57].mxu1 }
 0x4b7   : > { %v3938_v37 = vpop.f32.mrb[58].mxu1 }
 0x4b8   : > { %3997 = vxpose.xlu1.b32.cont [14/16] (narrow) %v3938_v37, 16  ;;  %v3940_v3 = vpop.f32.mrb[59].mxu1 }
 0x4bd   : > { %v3943_v1 = vpop.f32.mrb[60].mxu1 }
 0x4be   : > { %3998 = vxpose.xlu1.b32.cont [15/16] (narrow) %v3943_v1, 16  ;;  %v3945_v30 = vpop.f32.mrb[61].mxu1 }
 0x4c1   : > { %v3948_v44 = vpop.f32.mrb[62].mxu1 }
 0x4c2   : > { %3999 = vxpose.xlu1.b32.end [16/16] (narrow) %v3948_v44, 16  ;;  %v3950_v25 = vpop.f32.mrb[63].mxu1 }
 0x506   : > { %v4000_v16 = vpop.trf.xlu1 }
 0x507   : > { %v4029_v40 = vadd.f32 %v4021_v21, %v4000_v16 }
 0x509   : > { %v4037_v39 = vadd.f32 %v4033_v4, %v4029_v40 }
 0x50a   : > { %v4001_v46 = vpop.trf.xlu1 }
 0x50b   : > { %v4041_v36 = vmax.f32 %v4037_v39, 0.0  ;;  %v4031_v11 = vadd.f32 %v4026_v26, %v4001_v46 }
 0x50d   : > { %4045 = vst [vmem:[%s7598_s6 + $0x8] sm:$0xff] %v4041_v36  ;;  %v4039_v42 = vadd.f32 %v4035_v57, %v4031_v11 }
 0x50f   : > { %v4043_v20 = vmax.f32 %v4039_v42, 0.0 }
 0x511   : > { %4047 = vst [vmem:[%s7598_s6 + $0x18] sm:$0xff] %v4043_v20 }
 0x512   : > { %5458 = shalt.err (!%p5455_p3)
}
 0x513   : > { %s5459_s12 = scalar_lea.hbm %s7612_s13, 512  ;;  %s5463_s26 = scalar_lea.hbm %s7664_s5, 1024 }
 0x514   : > { %p5460_p4 = scmp.ne.s32.totalorder %s7612_s13, %s5459_s12  ;;  %p5464_p9 = scmp.lt.u32.totalorder %s7612_s13, %s7664_s5 }
 0x515   : > { %p5465_p10 = scmp.lt.u32.totalorder %s5463_s26, %s5459_s12  ;;  %p5467_p12 = scmp.lt.u32.totalorder %s5459_s12, %s7612_s13 }
 0x516   : > { %p5461_p7 = pnand %p5460_p4, %p5589_p5 }
 0x517   : > { %p5466_p11 = por %p5465_p10, %p5464_p9 }
 0x518   : > { %p5462_p8 = pneg %p5461_p7 }
 0x519   : > { %p5468_p13 = por %p5467_p12, %p5466_p11 }
 0x51b   : > { %p5469_p0 = pnand %p5468_p13, %p5462_p8 }
 0x51d   : > { %5472 = shalt.err (!%p5469_p0)
}
 0x51e   : > { %s5520_s8 = smov 256  }
 0x51f   : > { %4257 = dma.vmem_to_hbm [thread:$0]  (%p5589_p5), %s7607_s7, 512, %s7612_s13, %s7617_s9, %s5520_s8, %s5520_s8, %s5510_s10  }
 0x520 PF: > { %p4263_p1 = scmp.ge.s32.totalorder %s5507_s21, 2  ;;  %s4077_s23 = sand.u32 1, %s5495_s18  }
 0x521   : > { %s4078_s25 = scalar_lea.sflag [#allocation4], %s4077_s23 }
 0x522   : > { %p4260_p2 = pnand %p4263_p1, %p5593_p6 }
 0x524   : > { %5490 = dma.done.wait (!%p4260_p2), %s4078_s25, 512  }
 0x525   : > { %5492 = vsyncadd (!%p4260_p2), %s4078_s25, 4294966784  ;;  %p15_p3 = scmp.ge.s32.totalorder %s5576_s24, 4   ;;  %s7784_s18 = smov %s5499_s19 }
 0x526   : > { %s7785_s19 = smov %s5503_s20  ;;  %s7786_s20 = smov %s5587_s27 }
 0x527   : > { %s7787_s21 = smov %s5576_s24  ;;  %17 = sbr.rel (!%p15_p3) target bundleno = 3 (0x3), region = 77 }
 0x52e   :  { %4083 = vsyncpa [#allocation4], 1 }
 0x52f   :  { %4085 = vsyncpa [#allocation4 + $0x1], 1 }

</bundles_post_ra>
